<compile_context>
chip_gen: v7x
topology: tpu7x:2x2x1
jax: 0.10.0
libtpu: 0.0.40
codegen_flags: <defaults>
</compile_context>

<pallas_src>
import functools

import jax
import jax.numpy as jnp
import numpy as np
from jax.experimental import pallas as pl
from jax.experimental.pallas import tpu as pltpu


def _window_attention_kernel(x_ref, wqkv_ref, bqkv_ref, wproj_ref, bproj_ref,
                             bias_ref, mask_ref, o_ref, ctx_ref,
                             *, num_heads, head_dim, nw):
    W, n, c = x_ref.shape
    hd = head_dim

    # --- one large-M QKV projection over the whole window block (bf16 MXU, f32 acc) ---
    xf = x_ref[...].reshape(W * n, c)                          # leading-dim merge (no relayout)
    qkv = jnp.dot(xf, wqkv_ref[...],
                  preferred_element_type=jnp.float32) + bqkv_ref[...]    # (W*n, 3c) f32
    qkv = qkv.astype(jnp.bfloat16)                             # single down-cast for MXU operands

    mask = mask_ref[...]                                       # (nw, n, n) f32, hoisted

    # Static loop over a small number of heads; every op inside is batched
    # over the W windows of this block.
    for h in range(num_heads):
        lo = h * hd
        q = qkv[:, lo:lo + hd].reshape(W, n, hd)               # scale folded into wqkv (wrapper)
        k = qkv[:, c + lo:c + lo + hd].reshape(W, n, hd)
        v = qkv[:, 2 * c + lo:2 * c + lo + hd].reshape(W, n, hd)

        attn = jnp.einsum('bqd,bkd->bqk', q, k,
                          preferred_element_type=jnp.float32)            # (W, n, n) f32

        # Per-head relative-position bias + shift mask (combined in-register on the
        # small (nw, n, n) footprint). Windows in a block are ordered (group, mask_idx)
        # with mask_idx fastest and block starts are multiples of nw (asserted in the
        # wrapper), so the reshape lines the nw axis up with the mask exactly like the
        # reference view(b_//nw, nw, ...).
        bm = bias_ref[h][None] + mask                          # (nw, n, n) f32
        attn = (attn.reshape(W // nw, nw, n, n) + bm[None]).reshape(W, n, n)

        # softmax over the last axis; element-wise work stays f32 (v5e-safe)
        m = jnp.max(attn, axis=-1, keepdims=True)
        e = jnp.exp(attn - m)
        s = jnp.sum(e, axis=-1, keepdims=True)
        p = (e * pl.reciprocal(s, approx=True)).astype(jnp.bfloat16)

        out_h = jnp.einsum('bqk,bkd->bqd', p, v,
                           preferred_element_type=jnp.float32)           # (W, n, hd) f32

        # Stash this head's context in the VMEM scratch slab (bounds live ranges);
        # the output projection is done ONCE after the head loop.
        ctx_ref[:, :, lo:lo + hd] = out_h.astype(jnp.bfloat16)

    # --- single (W*n, c) x (c, c) output projection (bf16 MXU, f32 acc) ---
    ctx = ctx_ref[...].reshape(W * n, c)
    y = jnp.dot(ctx, wproj_ref[...],
                preferred_element_type=jnp.float32) + bproj_ref[...]
    o_ref[...] = y.reshape(W, n, c).astype(o_ref.dtype)


def _vmem_limit_bytes():
    """Generation-aware VMEM cap: ~48 MiB on 64 MiB parts (v7x), ~96 MiB on 128 MiB parts."""
    try:
        cap = int(pltpu.get_tpu_info().vmem_capacity_bytes)
    except Exception:
        cap = 64 * 1024 * 1024
    return int(min(cap * 3 // 4, 100 * 1024 * 1024))


def _estimate_block_vmem(W, n, c, num_heads, nw):
    """Rough per-block VMEM estimate: double-buffered I/O blocks + residents + temporaries."""
    f32, bf16 = 4, 2
    x_blk = 2 * W * n * c * bf16                  # double-buffered input block
    o_blk = 2 * W * n * c * f32                   # double-buffered output block
    ctx = W * n * c * bf16                        # per-head context scratch
    qkv = W * n * 3 * c * (f32 + bf16)            # f32 accumulate + bf16 copy
    attn = 3 * W * n * n * f32                    # attn / exp / p live set (per head)
    resid = (3 * c * c + c * c) * bf16 + (num_heads + nw) * n * n * f32 + 8 * c * f32
    return x_blk + o_blk + ctx + qkv + attn + resid


def _pick_block_windows(b_, nw, n, c, num_heads, budget_bytes, min_steps=4):
    """Largest W (multiple of nw dividing b_) whose VMEM estimate fits the budget,
    preferring >= min_steps grid steps (>= 2 per TensorCore on dual-TC v7x)."""
    g_total = b_ // nw
    divisors = [g for g in range(1, g_total + 1) if g_total % g == 0]
    fits = [g for g in divisors
            if _estimate_block_vmem(g * nw, n, c, num_heads, nw) <= budget_bytes] or [1]
    for target in (min_steps, 2, 1):
        ok = [g for g in fits if g_total // g >= target]
        if ok:
            return max(ok) * nw
    return nw


def window_attention(x, params, rpi, mask=None, *, window_size, num_heads):
    """Pallas implementation of WindowAttention.forward (dropout prob = 0)."""
    b_, n, c = x.shape
    assert n == window_size * window_size
    head_dim = c // num_heads
    scale = head_dim ** (-0.5)
    out_dtype = x.dtype

    # --- glue: gather relative position bias from the table -> (H, n, n), f32 ---
    table = params["rpb_table"]
    rel_bias = table[rpi.reshape(-1)].reshape(n, n, num_heads)
    rel_bias = jnp.transpose(rel_bias, (2, 0, 1)).astype(jnp.float32)

    if mask is None:
        mask = jnp.zeros((1, n, n), jnp.float32)
    mask = mask.astype(jnp.float32)
    nw = mask.shape[0]
    assert b_ % nw == 0, "total windows must be a multiple of the number of masks"

    # Fold 1/sqrt(head_dim) into the Q columns of the QKV projection, then cast the
    # MXU operands (x, wqkv, wproj) to bf16; accumulation stays f32 in the kernel.
    wqkv = params["wqkv"].astype(jnp.float32)                  # (c, 3c), x @ W layout
    bqkv = params["bqkv"].astype(jnp.float32)
    q_scale = jnp.concatenate([jnp.full((c,), scale, jnp.float32),
                               jnp.ones((2 * c,), jnp.float32)])
    wqkv = (wqkv * q_scale[None, :]).astype(jnp.bfloat16)
    bqkv = (bqkv * q_scale).reshape(1, 3 * c)                  # f32 (added to f32 accumulator)

    wproj = params["wproj"].astype(jnp.bfloat16)               # (c, c)
    bproj = params["bproj"].astype(jnp.float32).reshape(1, c)

    x_bf = x.astype(jnp.bfloat16)

    vmem_limit = _vmem_limit_bytes()
    W = _pick_block_windows(b_, nw, n, c, num_heads,
                            budget_bytes=int(vmem_limit * 0.7))
    # Shift-mask alignment: every block must start at a multiple of nw windows.
    assert W % nw == 0 and b_ % W == 0

    kernel = functools.partial(_window_attention_kernel,
                               num_heads=num_heads, head_dim=head_dim, nw=nw)

    return pl.pallas_call(
        kernel,
        out_shape=jax.ShapeDtypeStruct((b_, n, c), out_dtype),
        grid_spec=pltpu.PrefetchScalarGridSpec(
            num_scalar_prefetch=0,
            grid=(b_ // W,),
            in_specs=[
                pl.BlockSpec((W, n, c), lambda b: (b, 0, 0)),            # x (W windows, bf16)
                pl.BlockSpec((c, 3 * c), lambda b: (0, 0)),              # wqkv  (resident, bf16)
                pl.BlockSpec((1, 3 * c), lambda b: (0, 0)),              # bqkv  (resident, f32)
                pl.BlockSpec((c, c), lambda b: (0, 0)),                  # wproj (resident, bf16)
                pl.BlockSpec((1, c), lambda b: (0, 0)),                  # bproj (resident, f32)
                pl.BlockSpec((num_heads, n, n), lambda b: (0, 0, 0)),    # rel bias (resident)
                pl.BlockSpec((nw, n, n), lambda b: (0, 0, 0)),           # shift mask (resident)
            ],
            out_specs=pl.BlockSpec((W, n, c), lambda b: (b, 0, 0)),
            scratch_shapes=[pltpu.VMEM((W, n, c), jnp.bfloat16)],        # per-head context slab
        ),
        compiler_params=pltpu.CompilerParams(
            dimension_semantics=("parallel",),
            vmem_limit_bytes=vmem_limit),
    )(x_bf, wqkv, bqkv, wproj, bproj, rel_bias, mask)


def _reference(x, params, rpi, mask, *, window_size, num_heads):
    """Pure-JAX reference mirroring the PyTorch forward."""
    b_, n, c = x.shape
    hd = c // num_heads
    scale = hd ** (-0.5)
    qkv = x @ params["wqkv"] + params["bqkv"]                       # (b_, n, 3c)
    qkv = qkv.reshape(b_, n, 3, num_heads, hd).transpose(2, 0, 3, 1, 4)
    q, k, v = qkv[0], qkv[1], qkv[2]                                # (b_, h, n, hd)
    q = q * scale
    attn = jnp.einsum("bhqd,bhkd->bhqk", q, k)
    rel = params["rpb_table"][rpi.reshape(-1)].reshape(n, n, num_heads)
    rel = jnp.transpose(rel, (2, 0, 1))
    attn = attn + rel[None]
    nw = mask.shape[0]
    attn = attn.reshape(b_ // nw, nw, num_heads, n, n) + mask[None, :, None]
    attn = attn.reshape(-1, num_heads, n, n)
    attn = jax.nn.softmax(attn, axis=-1)
    out = jnp.einsum("bhqk,bhkd->bhqd", attn, v)
    out = out.transpose(0, 2, 1, 3).reshape(b_, n, c)
    return out @ params["wproj"] + params["bproj"]


def _make_rpi(ws):
    """Standard Swin/HAT relative position index, shape (ws*ws, ws*ws), int32."""
    coords = np.stack(np.meshgrid(np.arange(ws), np.arange(ws), indexing="ij"))
    coords = coords.reshape(2, -1)
    rel = coords[:, :, None] - coords[:, None, :]
    rel = rel.transpose(1, 2, 0).astype(np.int64)
    rel[:, :, 0] += ws - 1
    rel[:, :, 1] += ws - 1
    rel[:, :, 0] *= 2 * ws - 1
    return jnp.asarray(rel.sum(-1), dtype=jnp.int32)


if __name__ == "__main__":
    # Small config: dim=32, window_size=8 (n=64 tokens), num_heads=4,
    # nw=4 shift-masks, 4 groups -> 16 windows total (4 grid steps of 4 windows).
    dim, window_size, num_heads = 32, 8, 4
    n = window_size * window_size
    nw, groups = 4, 4
    b_ = nw * groups

    key = jax.random.PRNGKey(0)
    k_x, k_t, k_w1, k_b1, k_w2, k_b2, k_m = jax.random.split(key, 7)

    # Deterministic parameter init (synthetic; shapes match the module's __init__).
    params = {
        # trunc_normal(std=0.02) approximated by normal * 0.02
        "rpb_table": 0.02 * jax.random.normal(
            k_t, ((2 * window_size - 1) ** 2, num_heads), jnp.float32),
        # Linear weights stored as (in, out) for direct x @ W
        "wqkv": 0.05 * jax.random.normal(k_w1, (dim, 3 * dim), jnp.float32),
        "bqkv": 0.05 * jax.random.normal(k_b1, (3 * dim,), jnp.float32),
        "wproj": 0.05 * jax.random.normal(k_w2, (dim, dim), jnp.float32),
        "bproj": 0.05 * jax.random.normal(k_b2, (dim,), jnp.float32),
    }

    x = jax.random.normal(k_x, (b_, n, dim), jnp.float32)
    rpi = _make_rpi(window_size)
    # Shift-window style mask: 0 or -100
    mask = jnp.where(jax.random.bernoulli(k_m, 0.25, (nw, n, n)),
                     jnp.float32(-100.0), jnp.float32(0.0))

    out = window_attention(x, params, rpi, mask,
                           window_size=window_size, num_heads=num_heads)
    out = jax.block_until_ready(out)

    ref = jax.block_until_ready(
        _reference(x, params, rpi, mask,
                   window_size=window_size, num_heads=num_heads))
    # bf16 MXU operands + approx reciprocal: not bit-matching the f32 reference,
    # but well within the module-level tolerance used here.
    np.testing.assert_allclose(np.asarray(out), np.asarray(ref),
                               rtol=2e-2, atol=2e-2)
    print("KERNEL_OK")
</pallas_src>

<mosaic_0001>
module attributes {stable_mosaic.version = 11 : i64} {
  func.func @_window_attention_kernel(%arg0: i32, %arg1: memref<4x64x32xbf16, #tpu.memory_space<vmem>>, %arg2: memref<32x96xbf16, #tpu.memory_space<vmem>>, %arg3: memref<1x96xf32, #tpu.memory_space<vmem>>, %arg4: memref<32x32xbf16, #tpu.memory_space<vmem>>, %arg5: memref<1x32xf32, #tpu.memory_space<vmem>>, %arg6: memref<4x64x64xf32, #tpu.memory_space<vmem>>, %arg7: memref<4x64x64xf32, #tpu.memory_space<vmem>>, %arg8: memref<4x64x32xf32, #tpu.memory_space<vmem>>, %arg9: memref<4x64x32xbf16, #tpu.memory_space<vmem>>) attributes {dimension_semantics = [#tpu.dimension_semantics<parallel>], iteration_bounds = array<i64: 4>, scalar_prefetch = 0 : i64, scratch_operands = 1 : i64, tpu.core_type = #tpu.core_type<tc>, window_params = [{transform_indices = @transform_0, window_bounds = array<i64: 4, 64, 32>}, {pipeline_mode = #tpu.pipeline_mode<synchronous>, transform_indices = @transform_1, window_bounds = array<i64: 32, 96>}, {pipeline_mode = #tpu.pipeline_mode<synchronous>, transform_indices = @transform_2, window_bounds = array<i64: 1, 96>}, {pipeline_mode = #tpu.pipeline_mode<synchronous>, transform_indices = @transform_3, window_bounds = array<i64: 32, 32>}, {pipeline_mode = #tpu.pipeline_mode<synchronous>, transform_indices = @transform_4, window_bounds = array<i64: 1, 32>}, {pipeline_mode = #tpu.pipeline_mode<synchronous>, transform_indices = @transform_5, window_bounds = array<i64: 4, 64, 64>}, {pipeline_mode = #tpu.pipeline_mode<synchronous>, transform_indices = @transform_6, window_bounds = array<i64: 4, 64, 64>}, {transform_indices = @transform_7, window_bounds = array<i64: 4, 64, 32>}]} {
    %c0 = arith.constant 0 : index
    %c0_0 = arith.constant 0 : index
    %c0_1 = arith.constant 0 : index
    %0 = vector.load %arg1[%c0, %c0_0, %c0_1] : memref<4x64x32xbf16, #tpu.memory_space<vmem>>, vector<4x64x32xbf16>
    %1 = vector.shape_cast %0 : vector<4x64x32xbf16> to vector<256x32xbf16>
    %c0_2 = arith.constant 0 : index
    %c0_3 = arith.constant 0 : index
    %2 = vector.load %arg2[%c0_2, %c0_3] : memref<32x96xbf16, #tpu.memory_space<vmem>>, vector<32x96xbf16>
    %cst = arith.constant dense<0.000000e+00> : vector<256x96xf32>
    %3 = tpu.matmul %1, %2, %cst {dimension_numbers = #tpu.dot_dimension_numbers<[1], [0], [0], [1], [0, 0, 1, 1], [], []>} : vector<256x32xbf16>, vector<32x96xbf16>, vector<256x96xf32> -> vector<256x96xf32>
    %c0_4 = arith.constant 0 : index
    %c0_5 = arith.constant 0 : index
    %4 = vector.load %arg3[%c0_4, %c0_5] : memref<1x96xf32, #tpu.memory_space<vmem>>, vector<1x96xf32>
    %5 = vector.broadcast %4 : vector<1x96xf32> to vector<256x96xf32>
    %6 = arith.addf %3, %5 : vector<256x96xf32>
    %7 = arith.truncf %6 : vector<256x96xf32> to vector<256x96xbf16>
    %c0_6 = arith.constant 0 : index
    %c0_7 = arith.constant 0 : index
    %c0_8 = arith.constant 0 : index
    %8 = vector.load %arg7[%c0_6, %c0_7, %c0_8] : memref<4x64x64xf32, #tpu.memory_space<vmem>>, vector<4x64x64xf32>
    %9 = vector.extract_strided_slice %7 {offsets = [0, 0], sizes = [256, 8], strides = [1, 1]} : vector<256x96xbf16> to vector<256x8xbf16>
    %10 = vector.shape_cast %9 : vector<256x8xbf16> to vector<4x64x8xbf16>
    %11 = vector.extract_strided_slice %7 {offsets = [0, 32], sizes = [256, 8], strides = [1, 1]} : vector<256x96xbf16> to vector<256x8xbf16>
    %12 = vector.shape_cast %11 : vector<256x8xbf16> to vector<4x64x8xbf16>
    %13 = vector.extract_strided_slice %7 {offsets = [0, 64], sizes = [256, 8], strides = [1, 1]} : vector<256x96xbf16> to vector<256x8xbf16>
    %14 = vector.shape_cast %13 : vector<256x8xbf16> to vector<4x64x8xbf16>
    "tpu.trace_start"() <{level = 10 : i32, message = "bqd,bkd->bqk"}> : () -> ()
    %cst_9 = arith.constant dense<0.000000e+00> : vector<4x64x64xf32>
    %15 = tpu.matmul %10, %12, %cst_9 {dimension_numbers = #tpu.dot_dimension_numbers<[2], [2], [1], [1], [0, 0, 0, 1, 1, 1], [0], [0]>} : vector<4x64x8xbf16>, vector<4x64x8xbf16>, vector<4x64x64xf32> -> vector<4x64x64xf32>
    "tpu.trace_stop"() : () -> ()
    %c0_10 = arith.constant 0 : index
    %c0_11 = arith.constant 0 : index
    %c0_12 = arith.constant 0 : index
    %16 = vector.load %arg6[%c0_10, %c0_11, %c0_12] : memref<4x64x64xf32, #tpu.memory_space<vmem>>, vector<1x64x64xf32>
    %17 = vector.shape_cast %16 : vector<1x64x64xf32> to vector<64x64xf32>
    %18 = vector.shape_cast %17 : vector<64x64xf32> to vector<1x64x64xf32>
    %19 = vector.broadcast %18 : vector<1x64x64xf32> to vector<4x64x64xf32>
    %20 = arith.addf %19, %8 : vector<4x64x64xf32>
    %21 = vector.shape_cast %15 : vector<4x64x64xf32> to vector<1x4x64x64xf32>
    %22 = vector.shape_cast %20 : vector<4x64x64xf32> to vector<1x4x64x64xf32>
    %23 = arith.addf %21, %22 : vector<1x4x64x64xf32>
    %24 = vector.shape_cast %23 : vector<1x4x64x64xf32> to vector<4x64x64xf32>
    %cst_13 = arith.constant dense<0xFF800000> : vector<4x64xf32>
    %25 = vector.multi_reduction <maximumf>, %24, %cst_13 [2] : vector<4x64x64xf32> to vector<4x64xf32>
    %26 = vector.shape_cast %25 : vector<4x64xf32> to vector<4x64x1xf32>
    %27 = vector.broadcast %26 : vector<4x64x1xf32> to vector<4x64x64xf32>
    %28 = arith.subf %24, %27 : vector<4x64x64xf32>
    %29 = math.exp %28 : vector<4x64x64xf32>
    %cst_14 = arith.constant dense<0.000000e+00> : vector<4x64xf32>
    %30 = vector.multi_reduction <add>, %29, %cst_14 [2] : vector<4x64x64xf32> to vector<4x64xf32>
    %31 = vector.shape_cast %30 : vector<4x64xf32> to vector<4x64x1xf32>
    %32 = tpu.reciprocal %31 {approx = true} : vector<4x64x1xf32> -> vector<4x64x1xf32>
    %33 = vector.broadcast %32 : vector<4x64x1xf32> to vector<4x64x64xf32>
    %34 = arith.mulf %29, %33 : vector<4x64x64xf32>
    %35 = arith.truncf %34 : vector<4x64x64xf32> to vector<4x64x64xbf16>
    "tpu.trace_start"() <{level = 10 : i32, message = "bqk,bkd->bqd"}> : () -> ()
    %cst_15 = arith.constant dense<0.000000e+00> : vector<4x64x8xf32>
    %36 = tpu.matmul %35, %14, %cst_15 {dimension_numbers = #tpu.dot_dimension_numbers<[2], [1], [1], [2], [0, 0, 0, 1, 1, 2], [0], [0]>} : vector<4x64x64xbf16>, vector<4x64x8xbf16>, vector<4x64x8xf32> -> vector<4x64x8xf32>
    "tpu.trace_stop"() : () -> ()
    %37 = arith.truncf %36 : vector<4x64x8xf32> to vector<4x64x8xbf16>
    %c0_16 = arith.constant 0 : index
    %c0_17 = arith.constant 0 : index
    %c0_18 = arith.constant 0 : index
    %38 = vector.load %arg9[%c0_16, %c0_17, %c0_18] : memref<4x64x32xbf16, #tpu.memory_space<vmem>>, vector<4x64x8xbf16>
    tpu.vector_store %arg9[%c0_16, %c0_17, %c0_18], %37 {strides = array<i32>} : memref<4x64x32xbf16, #tpu.memory_space<vmem>>, vector<4x64x8xbf16>,
    %39 = vector.extract_strided_slice %7 {offsets = [0, 8], sizes = [256, 8], strides = [1, 1]} : vector<256x96xbf16> to vector<256x8xbf16>
    %40 = vector.shape_cast %39 : vector<256x8xbf16> to vector<4x64x8xbf16>
    %41 = vector.extract_strided_slice %7 {offsets = [0, 40], sizes = [256, 8], strides = [1, 1]} : vector<256x96xbf16> to vector<256x8xbf16>
    %42 = vector.shape_cast %41 : vector<256x8xbf16> to vector<4x64x8xbf16>
    %43 = vector.extract_strided_slice %7 {offsets = [0, 72], sizes = [256, 8], strides = [1, 1]} : vector<256x96xbf16> to vector<256x8xbf16>
    %44 = vector.shape_cast %43 : vector<256x8xbf16> to vector<4x64x8xbf16>
    "tpu.trace_start"() <{level = 10 : i32, message = "bqd,bkd->bqk"}> : () -> ()
    %cst_19 = arith.constant dense<0.000000e+00> : vector<4x64x64xf32>
    %45 = tpu.matmul %40, %42, %cst_19 {dimension_numbers = #tpu.dot_dimension_numbers<[2], [2], [1], [1], [0, 0, 0, 1, 1, 1], [0], [0]>} : vector<4x64x8xbf16>, vector<4x64x8xbf16>, vector<4x64x64xf32> -> vector<4x64x64xf32>
    "tpu.trace_stop"() : () -> ()
    %c1 = arith.constant 1 : index
    %c0_20 = arith.constant 0 : index
    %c0_21 = arith.constant 0 : index
    %46 = vector.load %arg6[%c1, %c0_20, %c0_21] : memref<4x64x64xf32, #tpu.memory_space<vmem>>, vector<1x64x64xf32>
    %47 = vector.shape_cast %46 : vector<1x64x64xf32> to vector<64x64xf32>
    %48 = vector.shape_cast %47 : vector<64x64xf32> to vector<1x64x64xf32>
    %49 = vector.broadcast %48 : vector<1x64x64xf32> to vector<4x64x64xf32>
    %50 = arith.addf %49, %8 : vector<4x64x64xf32>
    %51 = vector.shape_cast %45 : vector<4x64x64xf32> to vector<1x4x64x64xf32>
    %52 = vector.shape_cast %50 : vector<4x64x64xf32> to vector<1x4x64x64xf32>
    %53 = arith.addf %51, %52 : vector<1x4x64x64xf32>
    %54 = vector.shape_cast %53 : vector<1x4x64x64xf32> to vector<4x64x64xf32>
    %cst_22 = arith.constant dense<0xFF800000> : vector<4x64xf32>
    %55 = vector.multi_reduction <maximumf>, %54, %cst_22 [2] : vector<4x64x64xf32> to vector<4x64xf32>
    %56 = vector.shape_cast %55 : vector<4x64xf32> to vector<4x64x1xf32>
    %57 = vector.broadcast %56 : vector<4x64x1xf32> to vector<4x64x64xf32>
    %58 = arith.subf %54, %57 : vector<4x64x64xf32>
    %59 = math.exp %58 : vector<4x64x64xf32>
    %cst_23 = arith.constant dense<0.000000e+00> : vector<4x64xf32>
    %60 = vector.multi_reduction <add>, %59, %cst_23 [2] : vector<4x64x64xf32> to vector<4x64xf32>
    %61 = vector.shape_cast %60 : vector<4x64xf32> to vector<4x64x1xf32>
    %62 = tpu.reciprocal %61 {approx = true} : vector<4x64x1xf32> -> vector<4x64x1xf32>
    %63 = vector.broadcast %62 : vector<4x64x1xf32> to vector<4x64x64xf32>
    %64 = arith.mulf %59, %63 : vector<4x64x64xf32>
    %65 = arith.truncf %64 : vector<4x64x64xf32> to vector<4x64x64xbf16>
    "tpu.trace_start"() <{level = 10 : i32, message = "bqk,bkd->bqd"}> : () -> ()
    %cst_24 = arith.constant dense<0.000000e+00> : vector<4x64x8xf32>
    %66 = tpu.matmul %65, %44, %cst_24 {dimension_numbers = #tpu.dot_dimension_numbers<[2], [1], [1], [2], [0, 0, 0, 1, 1, 2], [0], [0]>} : vector<4x64x64xbf16>, vector<4x64x8xbf16>, vector<4x64x8xf32> -> vector<4x64x8xf32>
    "tpu.trace_stop"() : () -> ()
    %67 = arith.truncf %66 : vector<4x64x8xf32> to vector<4x64x8xbf16>
    %c0_25 = arith.constant 0 : index
    %c0_26 = arith.constant 0 : index
    %c8 = arith.constant 8 : index
    %68 = vector.load %arg9[%c0_25, %c0_26, %c8] : memref<4x64x32xbf16, #tpu.memory_space<vmem>>, vector<4x64x8xbf16>
    tpu.vector_store %arg9[%c0_25, %c0_26, %c8], %67 {strides = array<i32>} : memref<4x64x32xbf16, #tpu.memory_space<vmem>>, vector<4x64x8xbf16>,
    %69 = vector.extract_strided_slice %7 {offsets = [0, 16], sizes = [256, 8], strides = [1, 1]} : vector<256x96xbf16> to vector<256x8xbf16>
    %70 = vector.shape_cast %69 : vector<256x8xbf16> to vector<4x64x8xbf16>
    %71 = vector.extract_strided_slice %7 {offsets = [0, 48], sizes = [256, 8], strides = [1, 1]} : vector<256x96xbf16> to vector<256x8xbf16>
    %72 = vector.shape_cast %71 : vector<256x8xbf16> to vector<4x64x8xbf16>
    %73 = vector.extract_strided_slice %7 {offsets = [0, 80], sizes = [256, 8], strides = [1, 1]} : vector<256x96xbf16> to vector<256x8xbf16>
    %74 = vector.shape_cast %73 : vector<256x8xbf16> to vector<4x64x8xbf16>
    "tpu.trace_start"() <{level = 10 : i32, message = "bqd,bkd->bqk"}> : () -> ()
    %cst_27 = arith.constant dense<0.000000e+00> : vector<4x64x64xf32>
    %75 = tpu.matmul %70, %72, %cst_27 {dimension_numbers = #tpu.dot_dimension_numbers<[2], [2], [1], [1], [0, 0, 0, 1, 1, 1], [0], [0]>} : vector<4x64x8xbf16>, vector<4x64x8xbf16>, vector<4x64x64xf32> -> vector<4x64x64xf32>
    "tpu.trace_stop"() : () -> ()
    %c2 = arith.constant 2 : index
    %c0_28 = arith.constant 0 : index
    %c0_29 = arith.constant 0 : index
    %76 = vector.load %arg6[%c2, %c0_28, %c0_29] : memref<4x64x64xf32, #tpu.memory_space<vmem>>, vector<1x64x64xf32>
    %77 = vector.shape_cast %76 : vector<1x64x64xf32> to vector<64x64xf32>
    %78 = vector.shape_cast %77 : vector<64x64xf32> to vector<1x64x64xf32>
    %79 = vector.broadcast %78 : vector<1x64x64xf32> to vector<4x64x64xf32>
    %80 = arith.addf %79, %8 : vector<4x64x64xf32>
    %81 = vector.shape_cast %75 : vector<4x64x64xf32> to vector<1x4x64x64xf32>
    %82 = vector.shape_cast %80 : vector<4x64x64xf32> to vector<1x4x64x64xf32>
    %83 = arith.addf %81, %82 : vector<1x4x64x64xf32>
    %84 = vector.shape_cast %83 : vector<1x4x64x64xf32> to vector<4x64x64xf32>
    %cst_30 = arith.constant dense<0xFF800000> : vector<4x64xf32>
    %85 = vector.multi_reduction <maximumf>, %84, %cst_30 [2] : vector<4x64x64xf32> to vector<4x64xf32>
    %86 = vector.shape_cast %85 : vector<4x64xf32> to vector<4x64x1xf32>
    %87 = vector.broadcast %86 : vector<4x64x1xf32> to vector<4x64x64xf32>
    %88 = arith.subf %84, %87 : vector<4x64x64xf32>
    %89 = math.exp %88 : vector<4x64x64xf32>
    %cst_31 = arith.constant dense<0.000000e+00> : vector<4x64xf32>
    %90 = vector.multi_reduction <add>, %89, %cst_31 [2] : vector<4x64x64xf32> to vector<4x64xf32>
    %91 = vector.shape_cast %90 : vector<4x64xf32> to vector<4x64x1xf32>
    %92 = tpu.reciprocal %91 {approx = true} : vector<4x64x1xf32> -> vector<4x64x1xf32>
    %93 = vector.broadcast %92 : vector<4x64x1xf32> to vector<4x64x64xf32>
    %94 = arith.mulf %89, %93 : vector<4x64x64xf32>
    %95 = arith.truncf %94 : vector<4x64x64xf32> to vector<4x64x64xbf16>
    "tpu.trace_start"() <{level = 10 : i32, message = "bqk,bkd->bqd"}> : () -> ()
    %cst_32 = arith.constant dense<0.000000e+00> : vector<4x64x8xf32>
    %96 = tpu.matmul %95, %74, %cst_32 {dimension_numbers = #tpu.dot_dimension_numbers<[2], [1], [1], [2], [0, 0, 0, 1, 1, 2], [0], [0]>} : vector<4x64x64xbf16>, vector<4x64x8xbf16>, vector<4x64x8xf32> -> vector<4x64x8xf32>
    "tpu.trace_stop"() : () -> ()
    %97 = arith.truncf %96 : vector<4x64x8xf32> to vector<4x64x8xbf16>
    %c0_33 = arith.constant 0 : index
    %c0_34 = arith.constant 0 : index
    %c16 = arith.constant 16 : index
    %98 = vector.load %arg9[%c0_33, %c0_34, %c16] : memref<4x64x32xbf16, #tpu.memory_space<vmem>>, vector<4x64x8xbf16>
    tpu.vector_store %arg9[%c0_33, %c0_34, %c16], %97 {strides = array<i32>} : memref<4x64x32xbf16, #tpu.memory_space<vmem>>, vector<4x64x8xbf16>,
    %99 = vector.extract_strided_slice %7 {offsets = [0, 24], sizes = [256, 8], strides = [1, 1]} : vector<256x96xbf16> to vector<256x8xbf16>
    %100 = vector.shape_cast %99 : vector<256x8xbf16> to vector<4x64x8xbf16>
    %101 = vector.extract_strided_slice %7 {offsets = [0, 56], sizes = [256, 8], strides = [1, 1]} : vector<256x96xbf16> to vector<256x8xbf16>
    %102 = vector.shape_cast %101 : vector<256x8xbf16> to vector<4x64x8xbf16>
    %103 = vector.extract_strided_slice %7 {offsets = [0, 88], sizes = [256, 8], strides = [1, 1]} : vector<256x96xbf16> to vector<256x8xbf16>
    %104 = vector.shape_cast %103 : vector<256x8xbf16> to vector<4x64x8xbf16>
    "tpu.trace_start"() <{level = 10 : i32, message = "bqd,bkd->bqk"}> : () -> ()
    %cst_35 = arith.constant dense<0.000000e+00> : vector<4x64x64xf32>
    %105 = tpu.matmul %100, %102, %cst_35 {dimension_numbers = #tpu.dot_dimension_numbers<[2], [2], [1], [1], [0, 0, 0, 1, 1, 1], [0], [0]>} : vector<4x64x8xbf16>, vector<4x64x8xbf16>, vector<4x64x64xf32> -> vector<4x64x64xf32>
    "tpu.trace_stop"() : () -> ()
    %c3 = arith.constant 3 : index
    %c0_36 = arith.constant 0 : index
    %c0_37 = arith.constant 0 : index
    %106 = vector.load %arg6[%c3, %c0_36, %c0_37] : memref<4x64x64xf32, #tpu.memory_space<vmem>>, vector<1x64x64xf32>
    %107 = vector.shape_cast %106 : vector<1x64x64xf32> to vector<64x64xf32>
    %108 = vector.shape_cast %107 : vector<64x64xf32> to vector<1x64x64xf32>
    %109 = vector.broadcast %108 : vector<1x64x64xf32> to vector<4x64x64xf32>
    %110 = arith.addf %109, %8 : vector<4x64x64xf32>
    %111 = vector.shape_cast %105 : vector<4x64x64xf32> to vector<1x4x64x64xf32>
    %112 = vector.shape_cast %110 : vector<4x64x64xf32> to vector<1x4x64x64xf32>
    %113 = arith.addf %111, %112 : vector<1x4x64x64xf32>
    %114 = vector.shape_cast %113 : vector<1x4x64x64xf32> to vector<4x64x64xf32>
    %cst_38 = arith.constant dense<0xFF800000> : vector<4x64xf32>
    %115 = vector.multi_reduction <maximumf>, %114, %cst_38 [2] : vector<4x64x64xf32> to vector<4x64xf32>
    %116 = vector.shape_cast %115 : vector<4x64xf32> to vector<4x64x1xf32>
    %117 = vector.broadcast %116 : vector<4x64x1xf32> to vector<4x64x64xf32>
    %118 = arith.subf %114, %117 : vector<4x64x64xf32>
    %119 = math.exp %118 : vector<4x64x64xf32>
    %cst_39 = arith.constant dense<0.000000e+00> : vector<4x64xf32>
    %120 = vector.multi_reduction <add>, %119, %cst_39 [2] : vector<4x64x64xf32> to vector<4x64xf32>
    %121 = vector.shape_cast %120 : vector<4x64xf32> to vector<4x64x1xf32>
    %122 = tpu.reciprocal %121 {approx = true} : vector<4x64x1xf32> -> vector<4x64x1xf32>
    %123 = vector.broadcast %122 : vector<4x64x1xf32> to vector<4x64x64xf32>
    %124 = arith.mulf %119, %123 : vector<4x64x64xf32>
    %125 = arith.truncf %124 : vector<4x64x64xf32> to vector<4x64x64xbf16>
    "tpu.trace_start"() <{level = 10 : i32, message = "bqk,bkd->bqd"}> : () -> ()
    %cst_40 = arith.constant dense<0.000000e+00> : vector<4x64x8xf32>
    %126 = tpu.matmul %125, %104, %cst_40 {dimension_numbers = #tpu.dot_dimension_numbers<[2], [1], [1], [2], [0, 0, 0, 1, 1, 2], [0], [0]>} : vector<4x64x64xbf16>, vector<4x64x8xbf16>, vector<4x64x8xf32> -> vector<4x64x8xf32>
    "tpu.trace_stop"() : () -> ()
    %127 = arith.truncf %126 : vector<4x64x8xf32> to vector<4x64x8xbf16>
    %c0_41 = arith.constant 0 : index
    %c0_42 = arith.constant 0 : index
    %c24 = arith.constant 24 : index
    %128 = vector.load %arg9[%c0_41, %c0_42, %c24] : memref<4x64x32xbf16, #tpu.memory_space<vmem>>, vector<4x64x8xbf16>
    tpu.vector_store %arg9[%c0_41, %c0_42, %c24], %127 {strides = array<i32>} : memref<4x64x32xbf16, #tpu.memory_space<vmem>>, vector<4x64x8xbf16>,
    %c0_43 = arith.constant 0 : index
    %c0_44 = arith.constant 0 : index
    %c0_45 = arith.constant 0 : index
    %129 = vector.load %arg9[%c0_43, %c0_44, %c0_45] : memref<4x64x32xbf16, #tpu.memory_space<vmem>>, vector<4x64x32xbf16>
    %130 = vector.shape_cast %129 : vector<4x64x32xbf16> to vector<256x32xbf16>
    %c0_46 = arith.constant 0 : index
    %c0_47 = arith.constant 0 : index
    %131 = vector.load %arg4[%c0_46, %c0_47] : memref<32x32xbf16, #tpu.memory_space<vmem>>, vector<32x32xbf16>
    %cst_48 = arith.constant dense<0.000000e+00> : vector<256x32xf32>
    %132 = tpu.matmul %130, %131, %cst_48 {dimension_numbers = #tpu.dot_dimension_numbers<[1], [0], [0], [1], [0, 0, 1, 1], [], []>} : vector<256x32xbf16>, vector<32x32xbf16>, vector<256x32xf32> -> vector<256x32xf32>
    %c0_49 = arith.constant 0 : index
    %c0_50 = arith.constant 0 : index
    %133 = vector.load %arg5[%c0_49, %c0_50] : memref<1x32xf32, #tpu.memory_space<vmem>>, vector<1x32xf32>
    %134 = vector.broadcast %133 : vector<1x32xf32> to vector<256x32xf32>
    %135 = arith.addf %132, %134 : vector<256x32xf32>
    %136 = vector.shape_cast %135 : vector<256x32xf32> to vector<4x64x32xf32>
    %c0_51 = arith.constant 0 : index
    %c0_52 = arith.constant 0 : index
    %c0_53 = arith.constant 0 : index
    %137 = vector.load %arg8[%c0_51, %c0_52, %c0_53] : memref<4x64x32xf32, #tpu.memory_space<vmem>>, vector<4x64x32xf32>
    tpu.vector_store %arg8[%c0_51, %c0_52, %c0_53], %136 {strides = array<i32>} : memref<4x64x32xf32, #tpu.memory_space<vmem>>, vector<4x64x32xf32>,
    return
  }
  func.func @transform_0(%arg0: i32) -> (i32, i32, i32) {
    %c0_i32 = arith.constant 0 : i32
    %c0_i32_0 = arith.constant 0 : i32
    %c0_i32_1 = arith.constant 0 : i32
    return %arg0, %c0_i32, %c0_i32_0 : i32, i32, i32
  }
  func.func @transform_1(%arg0: i32) -> (i32, i32) {
    %c0_i32 = arith.constant 0 : i32
    %c0_i32_0 = arith.constant 0 : i32
    %c0_i32_1 = arith.constant 0 : i32
    return %c0_i32, %c0_i32_0 : i32, i32
  }
  func.func @transform_2(%arg0: i32) -> (i32, i32) {
    %c0_i32 = arith.constant 0 : i32
    %c0_i32_0 = arith.constant 0 : i32
    %c0_i32_1 = arith.constant 0 : i32
    return %c0_i32, %c0_i32_0 : i32, i32
  }
  func.func @transform_3(%arg0: i32) -> (i32, i32) {
    %c0_i32 = arith.constant 0 : i32
    %c0_i32_0 = arith.constant 0 : i32
    %c0_i32_1 = arith.constant 0 : i32
    return %c0_i32, %c0_i32_0 : i32, i32
  }
  func.func @transform_4(%arg0: i32) -> (i32, i32) {
    %c0_i32 = arith.constant 0 : i32
    %c0_i32_0 = arith.constant 0 : i32
    %c0_i32_1 = arith.constant 0 : i32
    return %c0_i32, %c0_i32_0 : i32, i32
  }
  func.func @transform_5(%arg0: i32) -> (i32, i32, i32) {
    %c0_i32 = arith.constant 0 : i32
    %c0_i32_0 = arith.constant 0 : i32
    %c0_i32_1 = arith.constant 0 : i32
    %c0_i32_2 = arith.constant 0 : i32
    return %c0_i32, %c0_i32_0, %c0_i32_1 : i32, i32, i32
  }
  func.func @transform_6(%arg0: i32) -> (i32, i32, i32) {
    %c0_i32 = arith.constant 0 : i32
    %c0_i32_0 = arith.constant 0 : i32
    %c0_i32_1 = arith.constant 0 : i32
    %c0_i32_2 = arith.constant 0 : i32
    return %c0_i32, %c0_i32_0, %c0_i32_1 : i32, i32, i32
  }
  func.func @transform_7(%arg0: i32) -> (i32, i32, i32) {
    %c0_i32 = arith.constant 0 : i32
    %c0_i32_0 = arith.constant 0 : i32
    %c0_i32_1 = arith.constant 0 : i32
    return %arg0, %c0_i32, %c0_i32_0 : i32, i32, i32
  }
}

</mosaic_0001>

<bundles_post_ra>
// kernel: tpu_custom_call.1
= control target key start
LH: loop header
LB: loop body
LE: loop exit
PB: predicated region body
PF: predicated region fallthrough
CT: control target
= control target key end

     0   :  { %s8068_s24 = smov 0   ;;  %s11510_s0 = inlined_call_operand.vmem [shape: bf16[16,64,32], index: 0, kind: input, shape index: {}]   ;;  %s11511_s1 = inlined_call_operand.vmem [shape: bf16[32,96], index: 1, kind: input, shape index: {}]   ;;  %s11512_s2 = inlined_call_operand.vmem [shape: f32[1,96], index: 2, kind: input, shape index: {}]   ;;  %s11513_s3 = inlined_call_operand.vmem [shape: bf16[32,32], index: 3, kind: input, shape index: {}]   ;;  %s11514_s4 = inlined_call_operand.vmem [shape: f32[1,32], index: 4, kind: input, shape index: {}]   ;;  %s11515_s5 = inlined_call_operand.vmem [shape: f32[4,64,64], index: 5, kind: input, shape index: {}]   ;;  %s11516_s6 = inlined_call_operand.vmem [shape: f32[4,64,64], index: 6, kind: input, shape index: {}]   ;;  %s11517_s7 = inlined_call_operand.vmem [shape: f32[16,64,32], index: 7, kind: output, shape index: {}]  }
   0x1 LB: > { %s6195_s25 = sadd.s32 4294967295, %s8012_s24   ;;  %p6199_p0 = scmp.ge.s32.totalorder %s8012_s24, 1  ;;  %s8012_s24 = sphi %s8068_s24, %s17_s24  }
   0x2   : > { %p239_p1 = scmp.lt.s32.totalorder %s8012_s24, 5 }
   0x4   : > { %p240_p2 = pnand %p6199_p0, %p239_p1 }
   0x6   : > { %243 = sbr.rel (%p240_p2) target bundleno = 3477 (0xd95), region = 48 }
   0xd   : > { %v7378_v0 = vld [vmem:[%s11511_s1] sm:$0xff]   ;;  %s6200_s28 = sshll.u32 %s6195_s25, 2  ;;  %v7379_v1 = vld [vmem:[%s11511_s1 + $0x8] sm:$0xff]   ;;  %vm423_vm0 = vcmask 261120   ;;  %vm693_vm1 = vcmask 64512   ;;  %s8014_s14 = smov 96  }
   0xe   : > { %p274_p3 = scmp.lt.s32.totalorder %s6200_s28, 15  ;;  %6708 = vmatprep.subr.bf16.mxu0 %v7378_v0  ;;  %v8125_v19 = vld [vmem:[%s11512_s2] ss:$0 sm:$0xff]  ;;  %s8015_s15 = smov 64   ;;  %vm1158_vm2 = vcmask 523264   ;;  %vm3212_vm3 = vcmask 130112  }
   0xf   : > { %6709 = vmatpush3.bf16.msra.mxu0 %v7378_v0  ;;  %s8016_s16 = smov 88   ;;  %s8017_s17 = smov 120   ;;  %vm4526_vm4 = vcmask 195712   ;;  %vm5840_vm5 = vcmask 261312  }
  0x10   : > { %s11847_s28 = smov (!%p274_p3, %s6200_s28), 15  ;;  %6710 = vmatprep.subr.bf16.mxu0 %v7379_v1  ;;  %s8018_s22 = smov 56  }
  0x11   : > { %s6414_s8 = sshll.u32 %s11847_s28, 5  ;;  %s8021_s29 = smov 48  }
  0x12   : > { %s8088_s11 = scalar_lea.vmem %s11510_s0, %s6414_s8  ;;  %s6415_s18 = sshll.u32 %s11847_s28, 6 }
  0x13   : > { %6711 = vmatpush3.bf16.msra.mxu0 %v7379_v1  ;;  %v7380_v2 = vld [vmem:[%s8088_s11] sm:$0xff]   ;;  %v7381_v3 = vld [vmem:[%s8088_s11 + $0x8] sm:$0xff]   ;;  %v7382_v4 = vld [vmem:[%s8088_s11 + $0x10] sm:$0xff]   ;;  %s11409_s23 = scalar_lea.vmem %s11517_s7, %s6415_s18 }
  0x14   : > { %6712 = vmatprep.mubr.msk.bf16.mxu0 %vm423_vm0, %v7380_v2  ;;  %v7383_v5 = vld [vmem:[%s8088_s11 + $0x18] sm:$0xff]   ;;  %v7384_v6 = vld [vmem:[%s8088_s11 + $0x20] sm:$0xff]   ;;  %v7385_v7 = vld [vmem:[%s8088_s11 + $0x28] sm:$0xff]  }
  0x15   : > { %v7386_v8 = vld [vmem:[%s8088_s11 + $0x30] sm:$0xff]   ;;  %v7387_v9 = vld [vmem:[%s8088_s11 + $0x38] sm:$0xff]   ;;  %v7388_v10 = vld [vmem:[%s8088_s11 + $0x40] sm:$0xff]  }
  0x16   : > { %6713 = vmatmul.mubr.msk.bf16.vlgmr.msra.gmra.mrb[0].mxu0 %vm423_vm0, %v7381_v3  ;;  %v7389_v11 = vld [vmem:[%s8088_s11 + $0x48] sm:$0xff]   ;;  %v7390_v12 = vld [vmem:[%s8088_s11 + $0x50] sm:$0xff]   ;;  %v7391_v13 = vld [vmem:[%s8088_s11 + $0x58] sm:$0xff]  }
  0x17   : > { %6716 = vmatprep.mubr.msk.bf16.mxu0 %vm423_vm0, %v7382_v4  ;;  %v7392_v14 = vld [vmem:[%s8088_s11 + $0x60] sm:$0xff]   ;;  %v7393_v15 = vld [vmem:[%s8088_s11 + $0x68] sm:$0xff]   ;;  %v7394_v16 = vld [vmem:[%s8088_s11 + $0x70] sm:$0xff]  }
  0x18   : > { %v7395_v17 = vld [vmem:[%s8088_s11 + $0x78] sm:$0xff]   ;;  %s8024_s11 = smov 40  }
  0x1e   : > { %6717 = vmatmul.mubr.msk.bf16.gmra.mrb[4].mxu0 %vm423_vm0, %v7383_v5 }
  0x1f   : > { %6720 = vmatprep.mubr.msk.bf16.mxu0 %vm423_vm0, %v7384_v6 }
  0x26   : > { %6721 = vmatmul.mubr.msk.bf16.gmra.mrb[8].mxu0 %vm423_vm0, %v7385_v7 }
  0x27   : > { %6724 = vmatprep.mubr.msk.bf16.mxu0 %vm423_vm0, %v7386_v8 }
  0x2e   : > { %6725 = vmatmul.mubr.msk.bf16.gmra.mrb[12].mxu0 %vm423_vm0, %v7387_v9 }
  0x2f   : > { %6728 = vmatprep.mubr.msk.bf16.mxu0 %vm423_vm0, %v7388_v10 }
  0x36   : > { %6729 = vmatmul.mubr.msk.bf16.gmra.mrb[16].mxu0 %vm423_vm0, %v7389_v11 }
  0x37   : > { %6732 = vmatprep.mubr.msk.bf16.mxu0 %vm423_vm0, %v7390_v12 }
  0x3e   : > { %6733 = vmatmul.mubr.msk.bf16.gmra.mrb[20].mxu0 %vm423_vm0, %v7391_v13 }
  0x3f   : > { %6736 = vmatprep.mubr.msk.bf16.mxu0 %vm423_vm0, %v7392_v14 }
  0x46   : > { %6737 = vmatmul.mubr.msk.bf16.gmra.mrb[24].mxu0 %vm423_vm0, %v7393_v15 }
  0x47   : > { %6740 = vmatprep.mubr.msk.bf16.mxu0 %vm423_vm0, %v7394_v16 }
  0x4e   : > { %6741 = vmatmul.mubr.msk.bf16.gmra.mrb[28].mxu0 %vm423_vm0, %v7395_v17 }
  0xe9   : > { %v6714_v18 = vpop.f32.mrb[0].mxu0 }
  0xea   : > { %v506_v20 = vpop.f32.mrb[1].mxu0  ;;  %v515_v22 = vadd.f32 %v6714_v18, %v8125_v19 }
  0xeb   : > { %v6715_v21 = vpop.f32.mrb[2].mxu0  ;;  %v507_v25 = vadd.f32 %v8125_v19, %v506_v20 }
  0xec   : > { %v518_v23 = vadd.f32 %v6715_v21, %v8125_v19  ;;  %v509_v24 = vpop.f32.mrb[3].mxu0 }
  0xed   : > { %v510_v26 = vadd.f32 %v8125_v19, %v509_v24 }
  0xee   : > { %v8131_v27 = vpack.c.bf16 %v518_v23, %v515_v22 }
  0xef   : > { %v8133_v28 = vpack.c.bf16 %v510_v26, %v507_v25 }
  0xf0   : > { %11616 = vst [vmem:[#allocation3_spill] sm:$0xff] %v8131_v27 }
  0xf1   : > { %11617 = vst [vmem:[#allocation4_spill] sm:$0xff] %v8133_v28  ;;  %685 = vrot.lane.b32.xlu0 %v8133_v28, %s8014_s14  ;;  %6752 = vmatprep.mubr.msk.bf16.mxu0 %vm693_vm1, %v8133_v28  ;;  %v6718_v29 = vpop.f32.mrb[4].mxu0 }
  0xf2   : > { %v531_v30 = vadd.f32 %v6718_v29, %v8125_v19  ;;  %v522_v31 = vpop.f32.mrb[5].mxu0 }
  0xf3   : > { %v523_v32 = vadd.f32 %v8125_v19, %v522_v31  ;;  %v6719_v33 = vpop.f32.mrb[6].mxu0 }
  0xf4   : > { %v534_v34 = vadd.f32 %v6719_v33, %v8125_v19  ;;  %v525_v35 = vpop.f32.mrb[7].mxu0 }
  0xf5   : > { %687 = vrot.lane.b32.xlu0 %v8131_v27, %s8014_s14  ;;  %v526_v36 = vadd.f32 %v8125_v19, %v525_v35 }
  0xf6   : > { %v8145_v37 = vpack.c.bf16 %v534_v34, %v531_v30 }
  0xf7   : > { %v8147_v38 = vpack.c.bf16 %v526_v36, %v523_v32 }
  0xf9   : > { %11618 = vst [vmem:[#allocation5_spill] sm:$0xff] %v8147_v38  ;;  %v6722_v39 = vpop.f32.mrb[8].mxu0  ;;  %689 = vrot.lane.b32.xlu1 %v8147_v38, %s8014_s14  ;;  %691 = vrot.lane.b32.xlu0 %v8145_v37, %s8014_s14 }
  0xfa   : > { %v547_v40 = vadd.f32 %v6722_v39, %v8125_v19  ;;  %v538_v41 = vpop.f32.mrb[9].mxu0 }
  0xfb   : > { %v539_v42 = vadd.f32 %v8125_v19, %v538_v41  ;;  %v6723_v43 = vpop.f32.mrb[10].mxu0 }
  0xfc   : > { %v550_v44 = vadd.f32 %v6723_v43, %v8125_v19  ;;  %v541_v45 = vpop.f32.mrb[11].mxu0 }
  0xfd   : > { %v542_v46 = vadd.f32 %v8125_v19, %v541_v45 }
  0xfe   : > { %v8157_v47 = vpack.c.bf16 %v550_v44, %v547_v40 }
  0xff   : > { %v8159_v48 = vpack.c.bf16 %v542_v46, %v539_v42 }
 0x101   : > { %787 = vrot.lane.b32.xlu1 %v8159_v48, %s8014_s14  ;;  %v6726_v49 = vpop.f32.mrb[12].mxu0  ;;  %6768 = vmatprep.mubr.msk.bf16.mxu1 %vm693_vm1, %v8159_v48 }
 0x102   : > { %v563_v50 = vadd.f32 %v6726_v49, %v8125_v19  ;;  %v554_v51 = vpop.f32.mrb[13].mxu0 }
 0x103   : > { %v555_v52 = vadd.f32 %v8125_v19, %v554_v51  ;;  %v6727_v53 = vpop.f32.mrb[14].mxu0 }
 0x104   : > { %v566_v54 = vadd.f32 %v6727_v53, %v8125_v19  ;;  %v557_v55 = vpop.f32.mrb[15].mxu0 }
 0x105   : > { %v558_v56 = vadd.f32 %v8125_v19, %v557_v55  ;;  %789 = vrot.lane.b32.xlu1 %v8157_v47, %s8014_s14 }
 0x106   : > { %v8171_v57 = vpack.c.bf16 %v566_v54, %v563_v50 }
 0x107   : > { %v8173_v58 = vpack.c.bf16 %v558_v56, %v555_v52 }
 0x109   : > { %11619 = vst [vmem:[#allocation6_spill] sm:$0xff] %v8173_v58  ;;  %v6730_v59 = vpop.f32.mrb[16].mxu0  ;;  %791 = vrot.lane.b32.xlu0 %v8173_v58, %s8014_s14 }
 0x10a   : > { %v579_v60 = vadd.f32 %v6730_v59, %v8125_v19  ;;  %v570_v61 = vpop.f32.mrb[17].mxu0 }
 0x10b   : > { %v571_v62 = vadd.f32 %v8125_v19, %v570_v61  ;;  %v6731_v63 = vpop.f32.mrb[18].mxu0 }
 0x10c   : > { %v582_v0 = vadd.f32 %v6731_v63, %v8125_v19  ;;  %v573_v1 = vpop.f32.mrb[19].mxu0 }
 0x10d   : > { %v574_v2 = vadd.f32 %v8125_v19, %v573_v1  ;;  %793 = vrot.lane.b32.xlu0 %v8171_v57, %s8014_s14 }
 0x10e   : > { %v8183_v3 = vpack.c.bf16 %v582_v0, %v579_v60 }
 0x10f   : > { %v8185_v4 = vpack.c.bf16 %v574_v2, %v571_v62 }
 0x111   : > { %888 = vrot.lane.b32.xlu1 %v8185_v4, %s8014_s14  ;;  %v6734_v5 = vpop.f32.mrb[20].mxu0 }
 0x112   : > { %v595_v6 = vadd.f32 %v6734_v5, %v8125_v19  ;;  %v586_v7 = vpop.f32.mrb[21].mxu0 }
 0x113   : > { %v587_v8 = vadd.f32 %v8125_v19, %v586_v7  ;;  %v6735_v9 = vpop.f32.mrb[22].mxu0 }
 0x114   : > { %v598_v10 = vadd.f32 %v6735_v9, %v8125_v19  ;;  %v589_v11 = vpop.f32.mrb[23].mxu0 }
 0x115   : > { %v590_v12 = vadd.f32 %v8125_v19, %v589_v11  ;;  %890 = vrot.lane.b32.xlu1 %v8183_v3, %s8014_s14 }
 0x116   : > { %v8195_v13 = vpack.c.bf16 %v598_v10, %v595_v6 }
 0x117   : > { %v8197_v14 = vpack.c.bf16 %v590_v12, %v587_v8 }
 0x119   : > { %v6738_v15 = vpop.f32.mrb[24].mxu0  ;;  %892 = vrot.lane.b32.xlu0 %v8197_v14, %s8014_s14 }
 0x11a   : > { %v611_v16 = vadd.f32 %v6738_v15, %v8125_v19  ;;  %v602_v17 = vpop.f32.mrb[25].mxu0 }
 0x11b   : > { %v603_v18 = vadd.f32 %v8125_v19, %v602_v17  ;;  %v6739_v20 = vpop.f32.mrb[26].mxu0 }
 0x11c   : > { %v614_v21 = vadd.f32 %v6739_v20, %v8125_v19  ;;  %v605_v22 = vpop.f32.mrb[27].mxu0 }
 0x11d   : > { %v606_v23 = vadd.f32 %v8125_v19, %v605_v22  ;;  %894 = vrot.lane.b32.xlu0 %v8195_v13, %s8014_s14 }
 0x11e   : > { %v8207_v24 = vpack.c.bf16 %v614_v21, %v611_v16 }
 0x11f   : > { %v8209_v25 = vpack.c.bf16 %v606_v23, %v603_v18 }
 0x121   : > { %v6742_v26 = vpop.f32.mrb[28].mxu0  ;;  %989 = vrot.lane.b32.xlu1 %v8209_v25, %s8014_s14 }
 0x122   : > { %v627_v29 = vadd.f32 %v6742_v26, %v8125_v19  ;;  %v618_v30 = vpop.f32.mrb[29].mxu0 }
 0x123   : > { %v619_v31 = vadd.f32 %v8125_v19, %v618_v30  ;;  %v6743_v32 = vpop.f32.mrb[30].mxu0 }
 0x124   : > { %v630_v33 = vadd.f32 %v6743_v32, %v8125_v19  ;;  %v621_v34 = vpop.f32.mrb[31].mxu0 }
 0x125   : > { %v622_v35 = vadd.f32 %v8125_v19, %v621_v34  ;;  %991 = vrot.lane.b32.xlu1 %v8207_v24, %s8014_s14  ;;  %v651_v34 = vld [vmem:[%s11516_s6 + $0x10] sm:$0xff] }
 0x126   : > { %v8219_v36 = vpack.c.bf16 %v630_v33, %v627_v29 }
 0x127   : > { %v8221_v39 = vpack.c.bf16 %v622_v35, %v619_v31  ;;  %v8340_v35 = vld [vmem:[%s11515_s5 + $0x10] sm:$0xff] }
 0x128   : > { %11620 = vst [vmem:[#allocation7_spill] sm:$0xff] %v8219_v36 }
 0x129   : > { %995 = vrot.lane.b32.xlu1 %v8219_v36, %s8014_s14  ;;  %993 = vrot.lane.b32.xlu0 %v8221_v39, %s8014_s14 }
 0x12d   : > { %1527 = vrot.lane.b32.xlu1 %v8133_v28, %s8015_s15  ;;  %1531 = vrot.lane.b32.xlu0 %v8147_v38, %s8015_s15 }
 0x131   : > { %1529 = vrot.lane.b32.xlu1 %v8131_v27, %s8015_s15  ;;  %1616 = vrot.lane.b32.xlu0 %v8159_v48, %s8015_s15 }
 0x135   : > { %1533 = vrot.lane.b32.xlu1 %v8145_v37, %s8015_s15  ;;  %1705 = vrot.lane.b32.xlu0 %v8185_v4, %s8015_s15 }
 0x139   : > { %1618 = vrot.lane.b32.xlu1 %v8157_v47, %s8015_s15  ;;  %1620 = vrot.lane.b32.xlu0 %v8173_v58, %s8015_s15 }
 0x13d   : > { %1707 = vrot.lane.b32.xlu1 %v8183_v3, %s8015_s15  ;;  %1709 = vrot.lane.b32.xlu0 %v8197_v14, %s8015_s15 }
 0x141   : > { %1622 = vrot.lane.b32.xlu1 %v8171_v57, %s8015_s15  ;;  %1794 = vrot.lane.b32.xlu0 %v8209_v25, %s8015_s15 }
 0x145   : > { %1711 = vrot.lane.b32.xlu1 %v8195_v13, %s8015_s15  ;;  %1923 = vrot.lane.b32.xlu0 %v8133_v28, %s8016_s16 }
 0x149   : > { %1796 = vrot.lane.b32.xlu1 %v8207_v24, %s8015_s15  ;;  %2028 = vrot.lane.b32.xlu0 %v8159_v48, %s8016_s16 }
 0x14d   : > { %1800 = vrot.lane.b32.xlu1 %v8219_v36, %s8015_s15  ;;  %1915 = vrot.lane.b32.xlu0 %v8133_v28, %s8017_s17 }
 0x151   : > { %1925 = vrot.lane.b32.xlu1 %v8131_v27, %s8016_s16 }
 0x155   : > { %1927 = vrot.lane.b32.xlu1 %v8147_v38, %s8016_s16 }
 0x159   : > { %1929 = vrot.lane.b32.xlu1 %v8145_v37, %s8016_s16 }
 0x15d   : > { %2030 = vrot.lane.b32.xlu1 %v8157_v47, %s8016_s16 }
 0x161   : > { %2032 = vrot.lane.b32.xlu1 %v8173_v58, %s8016_s16 }
 0x163   : > { %v686_v19 = vpop.permute.xlu0 %685 }
 0x164   : > { %7292 = vmatprep.subr.msk.bf16.mxu0 %vm693_vm1, %v686_v19  ;;  %v707_v40 = vsel %vm693_vm1, %v686_v19, 0  ;;  %v649_v19 = vld [vmem:[%s11516_s6] sm:$0xff] }
 0x165   : > { %1798 = vrot.lane.b32.xlu1 %v8221_v39, %s8015_s15  ;;  %6745 = vmatpush3.bf16.xpose.msra.mxu0 %v707_v40  ;;  %v8348_v40 = vld [vmem:[%s11515_s5] sm:$0xff]  ;;  %s8027_s15 = smov 24  }
 0x167   : > { %v688_v41 = vpop.permute.xlu0 %687 }
 0x168   : > { %7293 = vmatprep.subr.msk.bf16.mxu0 %vm693_vm1, %v688_v41  ;;  %v710_v43 = vsel %vm693_vm1, %v688_v41, 0  ;;  %v1096_v41 = vadd.f32 %v8340_v35, %v651_v34 }
 0x16b   : > { %v690_v42 = vpop.permute.xlu1 %689  ;;  %v692_v49 = vpop.permute.xlu0 %691 }
 0x16c   : > { %v713_v45 = vsel %vm693_vm1, %v690_v42, 0  ;;  %v716_v52 = vsel %vm693_vm1, %v692_v49, 0 }
 0x16d   : > { %6747 = vmatpush3.bf16.xpose.msra.mxu0 %v710_v43  ;;  %v8357_v43 = vld [vmem:[%s11515_s5 + $0x8] sm:$0xff] }
 0x16e   : > { %7294 = vmatprep.subr.msk.bf16.mxu0 %vm693_vm1, %v690_v42  ;;  %v650_v42 = vld [vmem:[%s11516_s6 + $0x8] sm:$0xff] }
 0x173   : > { %v788_v44 = vpop.permute.xlu1 %787 }
 0x174   : > { %7296 = vmatprep.subr.msk.bf16.mxu1 %vm693_vm1, %v788_v44  ;;  %v808_v46 = vsel %vm693_vm1, %v788_v44, 0  ;;  %v1094_v44 = vadd.f32 %v8348_v40, %v649_v19 }
 0x175   : > { %6749 = vmatpush3.bf16.xpose.msra.mxu0 %v713_v45  ;;  %6761 = vmatpush3.bf16.xpose.msra.mxu1 %v808_v46  ;;  %v652_v46 = vld [vmem:[%s11516_s6 + $0x18] sm:$0xff] }
 0x176   : > { %7295 = vmatprep.subr.msk.bf16.mxu0 %vm693_vm1, %v692_v49  ;;  %v8366_v49 = vld [vmem:[%s11515_s5 + $0x18] sm:$0xff] }
 0x177   : > { %v790_v50 = vpop.permute.xlu1 %789 }
 0x178   : > { %7297 = vmatprep.subr.msk.bf16.mxu1 %vm693_vm1, %v790_v50  ;;  %v811_v53 = vsel %vm693_vm1, %v790_v50, 0  ;;  %v1095_v50 = vadd.f32 %v8357_v43, %v650_v42  ;;  %v657_v42 = vld [vmem:[%s11516_s6 + $0x40] sm:$0xff] }
 0x17b   : > { %v792_v51 = vpop.permute.xlu0 %791 }
 0x17c   : > { %v814_v54 = vsel %vm693_vm1, %v792_v51, 0 }
 0x17d   : > { %6751 = vmatpush3.bf16.xpose.msra.mxu0 %v716_v52  ;;  %6763 = vmatpush3.bf16.xpose.msra.mxu1 %v811_v53 }
 0x17e   : > { %7298 = vmatprep.subr.msk.bf16.mxu1 %vm693_vm1, %v792_v51 }
 0x17f   : > { %v794_v56 = vpop.permute.xlu0 %793 }
 0x180   : > { %v817_v62 = vsel %vm693_vm1, %v794_v56, 0 }
 0x183   : > { %v889_v55 = vpop.permute.xlu1 %888 }
 0x184   : > { %6753 = vmatmul.mubr.msk.bf16.vlgmr.msra.gmra.mrb[32].mxu0 %vm693_vm1, %v8131_v27  ;;  %7300 = vmatprep.subr.msk.bf16.mxu0 %vm693_vm1, %v889_v55  ;;  %v909_v59 = vsel %vm693_vm1, %v889_v55, 0  ;;  %v8377_v55 = vld [vmem:[%s11515_s5 + $0x30] sm:$0xff] }
 0x185   : > { %6756 = vmatprep.mubr.msk.bf16.mxu0 %vm693_vm1, %v8147_v38  ;;  %6765 = vmatpush3.bf16.xpose.msra.mxu1 %v814_v54  ;;  %v655_v54 = vld [vmem:[%s11516_s6 + $0x30] sm:$0xff] }
 0x186   : > { %6777 = vmatpush3.bf16.xpose.msra.mxu0 %v909_v59  ;;  %7299 = vmatprep.subr.msk.bf16.mxu1 %vm693_vm1, %v794_v56  ;;  %v1097_v59 = vadd.f32 %v8366_v49, %v652_v46  ;;  %v1102_v46 = vadd.f32 %v8348_v40, %v657_v42 }
 0x187   : > { %v891_v60 = vpop.permute.xlu1 %890 }
 0x188   : > { %7301 = vmatprep.subr.msk.bf16.mxu0 %vm693_vm1, %v891_v60  ;;  %v912_v61 = vsel %vm693_vm1, %v891_v60, 0 }
 0x18b   : > { %v893_v63 = vpop.permute.xlu0 %892 }
 0x18c   : > { %6757 = vmatmul.mubr.msk.bf16.gmra.mrb[36].mxu0 %vm693_vm1, %v8145_v37  ;;  %v915_v1 = vsel %vm693_vm1, %v893_v63, 0 }
 0x18d   : > { %6767 = vmatpush3.bf16.xpose.msra.mxu1 %v817_v62  ;;  %6784 = vmatprep.mubr.msk.bf16.mxu0 %vm693_vm1, %v8185_v4  ;;  %v653_v62 = vld [vmem:[%s11516_s6 + $0x20] sm:$0xff] }
 0x18e   : > { %6779 = vmatpush3.bf16.xpose.msra.mxu0 %v912_v61 }
 0x18f   : > { %7302 = vmatprep.subr.msk.bf16.mxu0 %vm693_vm1, %v893_v63  ;;  %v895_v5 = vpop.permute.xlu0 %894 }
 0x190   : > { %v918_v10 = vsel %vm693_vm1, %v895_v5, 0 }
 0x193   : > { %v990_v0 = vpop.permute.xlu1 %989 }
 0x194   : > { %6769 = vmatmul.mubr.msk.bf16.vlgmr.msra.gmra.mrb[0].mxu1 %vm693_vm1, %v8157_v47  ;;  %7304 = vmatprep.subr.msk.bf16.mxu1 %vm693_vm1, %v990_v0  ;;  %v1010_v2 = vsel %vm693_vm1, %v990_v0, 0  ;;  %v8392_v0 = vld [vmem:[%s11515_s5 + $0x20] sm:$0xff] }
 0x195   : > { %6772 = vmatprep.mubr.msk.bf16.mxu1 %vm693_vm1, %v8173_v58  ;;  %6793 = vmatpush3.bf16.xpose.msra.mxu1 %v1010_v2  ;;  %v8400_v2 = vld [vmem:[%s11515_s5 + $0x38] sm:$0xff] }
 0x196   : > { %6781 = vmatpush3.bf16.xpose.msra.mxu0 %v915_v1  ;;  %v656_v1 = vld [vmem:[%s11516_s6 + $0x38] sm:$0xff] }
 0x197   : > { %v992_v6 = vpop.permute.xlu1 %991  ;;  %7303 = vmatprep.subr.msk.bf16.mxu0 %vm693_vm1, %v895_v5  ;;  %v1100_v5 = vadd.f32 %v8377_v55, %v655_v54 }
 0x198   : > { %7305 = vmatprep.subr.msk.bf16.mxu1 %vm693_vm1, %v992_v6  ;;  %v1013_v7 = vsel %vm693_vm1, %v992_v6, 0 }
 0x19b   : > { %v996_v8 = vpop.permute.xlu1 %995  ;;  %v994_v9 = vpop.permute.xlu0 %993 }
 0x19c   : > { %6773 = vmatmul.mubr.msk.bf16.gmra.mrb[4].mxu1 %vm693_vm1, %v8171_v57  ;;  %v1016_v15 = vsel %vm693_vm1, %v994_v9, 0  ;;  %v1019_v21 = vsel %vm693_vm1, %v996_v8, 0 }
 0x19d   : > { %6795 = vmatpush3.bf16.xpose.msra.mxu1 %v1013_v7  ;;  %6800 = vmatprep.mubr.msk.bf16.mxu1 %vm693_vm1, %v8209_v25 }
 0x19e   : > { %6783 = vmatpush3.bf16.xpose.msra.mxu0 %v918_v10  ;;  %7306 = vmatprep.subr.msk.bf16.mxu1 %vm693_vm1, %v994_v9  ;;  %v1098_v9 = vadd.f32 %v8392_v0, %v653_v62  ;;  %v1101_v10 = vadd.f32 %v8400_v2, %v656_v1 }
 0x19f   : > { %v1528_v11 = vpop.permute.xlu1 %1527  ;;  %v1532_v12 = vpop.permute.xlu0 %1531 }
 0x1a0   : > { %6808 = vmatprep.subr.bf16.mxu0 %v1528_v11 }
 0x1a3   : > { %v1530_v16 = vpop.permute.xlu1 %1529  ;;  %v8305_v17 = vpop.permute.xlu0 %1616 }
 0x1a5   : > { %6785 = vmatmul.mubr.msk.bf16.vlgmr.msra.gmra.mrb[40].mxu0 %vm693_vm1, %v8183_v3  ;;  %6797 = vmatpush3.bf16.xpose.msra.mxu1 %v1016_v15 }
 0x1a6   : > { %6788 = vmatprep.mubr.msk.bf16.mxu0 %vm693_vm1, %v8197_v14  ;;  %6809 = vmatpush3.bf16.msra.mxu0 %v1528_v11  ;;  %v654_v11 = vld [vmem:[%s11516_s6 + $0x28] sm:$0xff] }
 0x1a7   : > { %6810 = vmatprep.subr.bf16.mxu0 %v1530_v16  ;;  %v1534_v18 = vpop.permute.xlu1 %1533  ;;  %7307 = vmatprep.subr.msk.bf16.mxu1 %vm693_vm1, %v996_v8  ;;  %v1706_v20 = vpop.permute.xlu0 %1705 }
 0x1aa   : > { %6811 = vmatpush3.bf16.msra.mxu0 %v1530_v16 }
 0x1ab   : > { %6812 = vmatprep.subr.bf16.mxu0 %v1532_v12  ;;  %v8313_v22 = vpop.permute.xlu1 %1618  ;;  %v8317_v23 = vpop.permute.xlu0 %1620 }
 0x1ac   : > { %11621 = vst [vmem:[#allocation8_spill] sm:$0xff] %v8317_v23 }
 0x1ad   : > { %6789 = vmatmul.mubr.msk.bf16.gmra.mrb[44].mxu0 %vm693_vm1, %v8195_v13  ;;  %6799 = vmatpush3.bf16.xpose.msra.mxu1 %v1019_v21 }
 0x1ae   : > { %6813 = vmatpush3.bf16.msra.mxu0 %v1532_v12  ;;  %6840 = vmatprep.subr.bf16.mxu1 %v1706_v20  ;;  %v8417_v12 = vld [vmem:[%s11515_s5 + $0x28] sm:$0xff] }
 0x1af   : > { %6814 = vmatprep.subr.bf16.mxu0 %v1534_v18  ;;  %v1708_v26 = vpop.permute.xlu1 %1707  ;;  %v1710_v29 = vpop.permute.xlu0 %1709  ;;  %v1099_v21 = vadd.f32 %v8417_v12, %v654_v11 }
 0x1b2   : > { %6815 = vmatpush3.bf16.msra.mxu0 %v1534_v18 }
 0x1b3   : > { %6824 = vmatprep.subr.bf16.mxu0 %v8305_v17  ;;  %v8324_v30 = vpop.permute.xlu1 %1622  ;;  %v8326_v31 = vpop.permute.xlu0 %1794 }
 0x1b4   : > { %6801 = vmatmul.mubr.msk.bf16.vlgmr.msra.gmra.mrb[8].mxu1 %vm693_vm1, %v8207_v24  ;;  %11622 = vst [vmem:[#allocation9_spill] sm:$0xff] %v8324_v30  ;;  %11623 = vst [vmem:[#allocation10_spill] sm:$0xff] %v8326_v31 }
 0x1b5   : > { %6804 = vmatprep.mubr.msk.bf16.mxu1 %vm693_vm1, %v8221_v39  ;;  %6841 = vmatpush3.bf16.msra.mxu1 %v1706_v20 }
 0x1b6   : > { %6842 = vmatprep.subr.bf16.mxu1 %v1708_v26 }
 0x1b7   : > { %v1712_v32 = vpop.permute.xlu1 %1711  ;;  %v8330_v33 = vpop.permute.xlu0 %1923 }
 0x1b8   : > { %11624 = vst [vmem:[#allocation11_spill] sm:$0xff] %v8330_v33 }
 0x1b9   : > { %6843 = vmatpush3.bf16.msra.mxu1 %v1708_v26  ;;  %v659_v26 = vld [vmem:[%s11516_s6 + $0x50] sm:$0xff] }
 0x1ba   : > { %6844 = vmatprep.subr.bf16.mxu1 %v1710_v29 }
 0x1bc   : > { %6805 = vmatmul.mubr.msk.bf16.gmra.mrb[12].mxu1 %vm693_vm1, %v8219_v36 }
 0x1bd   : > { %6845 = vmatpush3.bf16.msra.mxu1 %v1710_v29 }
 0x1be   : > { %6846 = vmatprep.subr.bf16.mxu1 %v1712_v32 }
 0x1c1   : > { %6847 = vmatpush3.bf16.msra.mxu1 %v1712_v32 }
 0x1c2   : > { %7308 = vmatprep.subr.msk.bf16.mxu1 %vm693_vm1, %v8330_v33 }
 0x257   : > { %v6754_v45 = vpop.f32.mrb[32].mxu0 }
 0x258   : > { %v8369_v51 = vadd.f32 %v6754_v45, %v1096_v41  ;;  %v752_v52 = vpop.f32.mrb[33].mxu0  ;;  %v1104_v45 = vadd.f32 %v8340_v35, %v659_v26 }
 0x259   : > { %v6755_v53 = vpop.f32.mrb[34].mxu0  ;;  %v8379_v56 = vadd.f32 %v1094_v44, %v752_v52  ;;  %v660_v44 = vld [vmem:[%s11516_s6 + $0x58] sm:$0xff] }
 0x25a   : > { %v755_v60 = vpop.f32.mrb[35].mxu0  ;;  %v1165_v61 = vsel %vm1158_vm2, %v8369_v51, -inf  ;;  %v8405_v7 = vadd.f32 %v6755_v53, %v1097_v59  ;;  %v1105_v54 = vadd.f32 %v8366_v49, %v660_v44  ;;  %v658_v59 = vld [vmem:[%s11516_s6 + $0x48] sm:$0xff] }
 0x25b   : > { %v8387_v63 = vadd.f32 %v1095_v50, %v755_v60  ;;  %1166 = vmax.xlane.f32.xlu0 %v1165_v61  ;;  %v1159_v8 = vsel %vm1158_vm2, %v8379_v56, -inf  ;;  %v662_v44 = vld [vmem:[%s11516_s6 + $0x68] sm:$0xff] }
 0x25c   : > { %v1168_v19 = vsel %vm1158_vm2, %v8405_v7, -inf }
 0x25d   : > { %v1162_v6 = vsel %vm1158_vm2, %v8387_v63, -inf }
 0x25e   : > { %1163 = vmax.xlane.f32.xlu1 %v1162_v6  ;;  %v663_v6 = vld [vmem:[%s11516_s6 + $0x70] sm:$0xff] }
 0x25f   : > { %1160 = vmax.xlane.f32.xlu0 %v1159_v8  ;;  %v6758_v15 = vpop.f32.mrb[36].mxu0 }
 0x260   : > { %v8419_v16 = vadd.f32 %v6758_v15, %v1100_v5  ;;  %v768_v18 = vpop.f32.mrb[37].mxu0  ;;  %v1103_v5 = vadd.f32 %v8357_v43, %v658_v59 }
 0x261   : > { %v6759_v20 = vpop.f32.mrb[38].mxu0  ;;  %v8425_v29 = vadd.f32 %v1098_v9, %v768_v18  ;;  %v661_v18 = vld [vmem:[%s11516_s6 + $0x60] sm:$0xff] }
 0x262   : > { %v8427_v32 = vadd.f32 %v6759_v20, %v1101_v10  ;;  %v771_v34 = vpop.f32.mrb[39].mxu0  ;;  %v1177_v41 = vsel %vm1158_vm2, %v8419_v16, -inf  ;;  %v664_v20 = vld [vmem:[%s11516_s6 + $0x78] sm:$0xff]  ;;  %v1106_v26 = vadd.f32 %v8392_v0, %v661_v18 }
 0x263   : > { %1169 = vmax.xlane.f32.xlu0 %v1168_v19  ;;  %1178 = vmax.xlane.f32.xlu1 %v1177_v41  ;;  %v8441_v50 = vadd.f32 %v1099_v21, %v771_v34  ;;  %v1171_v52 = vsel %vm1158_vm2, %v8425_v29, -inf  ;;  %v1108_v21 = vadd.f32 %v8377_v55, %v663_v6  ;;  %v1109_v42 = vadd.f32 %v8400_v2, %v664_v20  ;;  %v667_v6 = vld [vmem:[%s11516_s6 + $0x90] sm:$0xff] }
 0x264   : > { %v1180_v53 = vsel %vm1158_vm2, %v8427_v32, -inf }
 0x265   : > { %v1174_v15 = vsel %vm1158_vm2, %v8441_v50, -inf }
 0x267   : > { %v6770_v60 = vpop.f32.mrb[0].mxu1  ;;  %1172 = vmax.xlane.f32.xlu1 %v1171_v52  ;;  %1181 = vmax.xlane.f32.xlu0 %v1180_v53 }
 0x268   : > { %v8451_v61 = vadd.f32 %v6770_v60, %v1104_v45  ;;  %v853_v62 = vpop.f32.mrb[1].mxu1 }
 0x269   : > { %v6771_v1 = vpop.f32.mrb[2].mxu1  ;;  %v8457_v8 = vadd.f32 %v1102_v46, %v853_v62 }
 0x26a   : > { %v8459_v9 = vadd.f32 %v6771_v1, %v1105_v54  ;;  %v856_v10 = vpop.f32.mrb[3].mxu1  ;;  %v1189_v11 = vsel %vm1158_vm2, %v8451_v61, -inf  ;;  %v1107_v54 = vadd.f32 %v8417_v12, %v662_v44 }
 0x26b   : > { %1190 = vmax.xlane.f32.xlu1 %v1189_v11  ;;  %1175 = vmax.xlane.f32.xlu0 %v1174_v15  ;;  %v8473_v34 = vadd.f32 %v1103_v5, %v856_v10  ;;  %v1183_v19 = vsel %vm1158_vm2, %v8457_v8, -inf  ;;  %v665_v10 = vld [vmem:[%s11516_s6 + $0x80] sm:$0xff]  ;;  %v668_v11 = vld [vmem:[%s11516_s6 + $0x98] sm:$0xff]  ;;  %v1112_v15 = vadd.f32 %v8340_v35, %v667_v6 }
 0x26c   : > { %v1192_v41 = vsel %vm1158_vm2, %v8459_v9, -inf }
 0x26d   : > { %v1186_v5 = vsel %vm1158_vm2, %v8473_v34, -inf }
 0x26f   : > { %v6774_v45 = vpop.f32.mrb[4].mxu1  ;;  %1184 = vmax.xlane.f32.xlu1 %v1183_v19  ;;  %1193 = vmax.xlane.f32.xlu0 %v1192_v41  ;;  %v1113_v19 = vadd.f32 %v8366_v49, %v668_v11  ;;  %v666_v41 = vld [vmem:[%s11516_s6 + $0x88] sm:$0xff]  ;;  %v669_v11 = vld [vmem:[%s11516_s6 + $0xa0] sm:$0xff] }
 0x270   : > { %v8483_v46 = vadd.f32 %v6774_v45, %v1108_v21  ;;  %v869_v52 = vpop.f32.mrb[5].mxu1 }
 0x271   : > { %v6775_v53 = vpop.f32.mrb[6].mxu1  ;;  %v8486_v59 = vadd.f32 %v1106_v26, %v869_v52  ;;  %v1110_v26 = vadd.f32 %v8348_v40, %v665_v10 }
 0x272   : > { %v8488_v60 = vadd.f32 %v6775_v53, %v1109_v42  ;;  %v872_v62 = vpop.f32.mrb[7].mxu1  ;;  %v1201_v1 = vsel %vm1158_vm2, %v8483_v46, -inf  ;;  %v1111_v53 = vadd.f32 %v8357_v43, %v666_v41  ;;  %v1114_v41 = vadd.f32 %v8392_v0, %v669_v11 }
 0x273   : > { %1202 = vmax.xlane.f32.xlu1 %v1201_v1  ;;  %1187 = vmax.xlane.f32.xlu0 %v1186_v5  ;;  %v8504_v18 = vadd.f32 %v1107_v54, %v872_v62  ;;  %v1195_v20 = vsel %vm1158_vm2, %v8486_v59, -inf  ;;  %v671_v62 = vld [vmem:[%s11516_s6 + $0xb0] sm:$0xff] }
 0x274   : > { %v1204_v21 = vsel %vm1158_vm2, %v8488_v60, -inf }
 0x275   : > { %v1198_v54 = vsel %vm1158_vm2, %v8504_v18, -inf }
 0x277   : > { %1196 = vmax.xlane.f32.xlu1 %v1195_v20  ;;  %1205 = vmax.xlane.f32.xlu0 %v1204_v21  ;;  %v1116_v20 = vadd.f32 %v8377_v55, %v671_v62  ;;  %v675_v62 = vld [vmem:[%s11516_s6 + $0xd0] sm:$0xff] }
 0x278   : > { %v6786_v42 = vpop.f32.mrb[40].mxu0 }
 0x279   : > { %v8515_v44 = vadd.f32 %v6786_v42, %v1112_v15  ;;  %v954_v45 = vpop.f32.mrb[41].mxu0  ;;  %v672_v15 = vld [vmem:[%s11516_s6 + $0xb8] sm:$0xff] }
 0x27a   : > { %v6787_v52 = vpop.f32.mrb[42].mxu0  ;;  %v8523_v1 = vadd.f32 %v1110_v26, %v954_v45  ;;  %v1117_v42 = vadd.f32 %v8400_v2, %v672_v15  ;;  %v670_v45 = vld [vmem:[%s11516_s6 + $0xa8] sm:$0xff] }
 0x27b   : > { %v8525_v5 = vadd.f32 %v6787_v52, %v1113_v19  ;;  %v957_v6 = vpop.f32.mrb[43].mxu0  ;;  %1199 = vmax.xlane.f32.xlu0 %v1198_v54  ;;  %v1213_v10 = vsel %vm1158_vm2, %v8515_v44, -inf }
 0x27c   : > { %1214 = vmax.xlane.f32.xlu1 %v1213_v10  ;;  %v8536_v21 = vadd.f32 %v1111_v53, %v957_v6  ;;  %v1207_v19 = vsel %vm1158_vm2, %v8523_v1, -inf  ;;  %v1115_v10 = vadd.f32 %v8417_v12, %v670_v45  ;;  %v673_v45 = vld [vmem:[%s11516_s6 + $0xc0] sm:$0xff] }
 0x27d   : > { %v1216_v26 = vsel %vm1158_vm2, %v8525_v5, -inf }
 0x27e   : > { %v1210_v11 = vsel %vm1158_vm2, %v8536_v21, -inf }
 0x27f   : > { %1217 = vmax.xlane.f32.xlu0 %v1216_v26 }
 0x280   : > { %1208 = vmax.xlane.f32.xlu1 %v1207_v19  ;;  %v6790_v52 = vpop.f32.mrb[44].mxu0  ;;  %v676_v19 = vld [vmem:[%s11516_s6 + $0xd8] sm:$0xff] }
 0x281   : > { %v8547_v54 = vadd.f32 %v6790_v52, %v1116_v20  ;;  %v970_v53 = vpop.f32.mrb[45].mxu0  ;;  %v1120_v52 = vadd.f32 %v8340_v35, %v675_v62  ;;  %v674_v35 = vld [vmem:[%s11516_s6 + $0xc8] sm:$0xff] }
 0x282   : > { %v6791_v6 = vpop.f32.mrb[46].mxu0  ;;  %v8555_v15 = vadd.f32 %v1114_v41, %v970_v53  ;;  %v1121_v53 = vadd.f32 %v8366_v49, %v676_v19  ;;  %v679_v49 = vld [vmem:[%s11516_s6 + $0xf0] sm:$0xff] }
 0x283   : > { %v8557_v26 = vadd.f32 %v6791_v6, %v1117_v42  ;;  %v973_v33 = vpop.f32.mrb[47].mxu0  ;;  %1211 = vmax.xlane.f32.xlu0 %v1210_v11  ;;  %v1225_v20 = vsel %vm1158_vm2, %v8547_v54, -inf }
 0x284   : > { %1226 = vmax.xlane.f32.xlu1 %v1225_v20  ;;  %v8568_v41 = vadd.f32 %v1115_v10, %v973_v33  ;;  %v1219_v11 = vsel %vm1158_vm2, %v8555_v15, -inf  ;;  %v1118_v20 = vadd.f32 %v8348_v40, %v673_v45 }
 0x285   : > { %v1228_v42 = vsel %vm1158_vm2, %v8557_v26, -inf }
 0x286   : > { %v1222_v45 = vsel %vm1158_vm2, %v8568_v41, -inf }
 0x287   : > { %v6802_v6 = vpop.f32.mrb[8].mxu1  ;;  %1229 = vmax.xlane.f32.xlu0 %v1228_v42  ;;  %v1119_v42 = vadd.f32 %v8357_v43, %v674_v35  ;;  %v677_v43 = vld [vmem:[%s11516_s6 + $0xe0] sm:$0xff] }
 0x288   : > { %v8579_v62 = vadd.f32 %v6802_v6, %v1120_v52  ;;  %1220 = vmax.xlane.f32.xlu1 %v1219_v11  ;;  %v1055_v33 = vpop.f32.mrb[9].mxu1  ;;  %v680_v6 = vld [vmem:[%s11516_s6 + $0xf8] sm:$0xff] }
 0x289   : > { %v6803_v10 = vpop.f32.mrb[10].mxu1  ;;  %v8591_v52 = vadd.f32 %v1118_v20, %v1055_v33  ;;  %v1125_v20 = vadd.f32 %v8400_v2, %v680_v6 }
 0x28a   : > { %v8584_v19 = vadd.f32 %v6803_v10, %v1121_v53  ;;  %v1058_v31 = vpop.f32.mrb[11].mxu1  ;;  %v1237_v40 = vsel %vm1158_vm2, %v8579_v62, -inf  ;;  %v1124_v53 = vadd.f32 %v8377_v55, %v679_v49  ;;  %v678_v55 = vld [vmem:[%s11516_s6 + $0xe8] sm:$0xff] }
 0x28b   : > { %1223 = vmax.xlane.f32.xlu0 %v1222_v45  ;;  %v8600_v11 = vadd.f32 %v1119_v42, %v1058_v31  ;;  %v1231_v10 = vsel %vm1158_vm2, %v8591_v52, -inf  ;;  %v1123_v2 = vadd.f32 %v8417_v12, %v678_v55 }
 0x28c   : > { %1238 = vmax.xlane.f32.xlu1 %v1237_v40  ;;  %v1240_v35 = vsel %vm1158_vm2, %v8584_v19, -inf  ;;  %v1122_v40 = vadd.f32 %v8392_v0, %v677_v43 }
 0x28d   : > { %v1234_v0 = vsel %vm1158_vm2, %v8600_v11, -inf }
 0x28f   : > { %v6806_v33 = vpop.f32.mrb[12].mxu1  ;;  %1241 = vmax.xlane.f32.xlu0 %v1240_v35 }
 0x290   : > { %v8611_v49 = vadd.f32 %v6806_v33, %v1124_v53  ;;  %1232 = vmax.xlane.f32.xlu1 %v1231_v10  ;;  %v1071_v31 = vpop.f32.mrb[13].mxu1  ;;  %v8630_v33 = vpop.permute.xlu1 %1796 }
 0x291   : > { %v6807_v42 = vpop.f32.mrb[14].mxu1  ;;  %v8620_v43 = vadd.f32 %v1122_v40, %v1071_v31  ;;  %11625 = vst [vmem:[#allocation12_spill] sm:$0xff] %v8630_v33 }
 0x292   : > { %v8613_v45 = vadd.f32 %v6807_v42, %v1125_v20  ;;  %v1074_v30 = vpop.f32.mrb[15].mxu1  ;;  %v1249_v6 = vsel %vm1158_vm2, %v8611_v49, -inf  ;;  %v8642_v42 = vpop.permute.xlu0 %2028 }
 0x293   : > { %1235 = vmax.xlane.f32.xlu0 %v1234_v0  ;;  %v8622_v53 = vadd.f32 %v1123_v2, %v1074_v30  ;;  %v1243_v20 = vsel %vm1158_vm2, %v8620_v43, -inf  ;;  %11631 = vst [vmem:[#allocation18_spill] sm:$0xff] %v8642_v42 }
 0x294   : > { %1250 = vmax.xlane.f32.xlu1 %v1249_v6  ;;  %v1252_v35 = vsel %vm1158_vm2, %v8613_v45, -inf  ;;  %v8632_v10 = vpop.permute.xlu1 %1800 }
 0x295   : > { %v1246_v12 = vsel %vm1158_vm2, %v8622_v53, -inf  ;;  %11626 = vst [vmem:[#allocation13_spill] sm:$0xff] %v8632_v10 }
 0x296   : > { %v8646_v6 = vpop.permute.xlu0 %1915 }
 0x297   : > { %1253 = vmax.xlane.f32.xlu0 %v1252_v35  ;;  %11633 = vst [vmem:[#allocation20_spill] sm:$0xff] %v8646_v6 }
 0x298   : > { %1244 = vmax.xlane.f32.xlu1 %v1243_v20  ;;  %v8634_v40 = vpop.permute.xlu1 %1925 }
 0x299   : > { %11627 = vst [vmem:[#allocation14_spill] sm:$0xff] %v8634_v40 }
 0x29b   : > { %1247 = vmax.xlane.f32.xlu0 %v1246_v12 }
 0x29c   : > { %v8636_v30 = vpop.permute.xlu1 %1927 }
 0x29d   : > { %11628 = vst [vmem:[#allocation15_spill] sm:$0xff] %v8636_v30 }
 0x2a0   : > { %v8638_v55 = vpop.permute.xlu1 %1929 }
 0x2a1   : > { %11629 = vst [vmem:[#allocation16_spill] sm:$0xff] %v8638_v55 }
 0x2a4   : > { %v8640_v31 = vpop.permute.xlu1 %2030 }
 0x2a5   : > { %11630 = vst [vmem:[#allocation17_spill] sm:$0xff] %v8640_v31 }
 0x2a8   : > { %v8644_v2 = vpop.permute.xlu1 %2032 }
 0x2a9   : > { %11632 = vst [vmem:[#allocation19_spill] sm:$0xff] %v8644_v2 }
 0x2ac   : > { %v8648_v0 = vpop.permute.xlu1 %1798 }
 0x2ad   : > { %11634 = vst [vmem:[#allocation21_spill] sm:$0xff] %v8648_v0 }
 0x2e8   : > { %v1167_v35 = vpop.xlane.xlu0 %1166 }
 0x2e9   : > { %v1257_v20 = vsub.f32 %v8369_v51, %v1167_v35 }
 0x2eb   : > { %v1291_v12 = vmul.f32 1.442695, %v1257_v20  ;;  %v1164_v10 = vpop.xlane.xlu1 %1163 }
 0x2ec   : > { %v1161_v40 = vpop.xlane.xlu0 %1160  ;;  %v1256_v55 = vsub.f32 %v8387_v63, %v1164_v10 }
 0x2ed   : > { %7398 = vpow2.f32 %v1291_v12  ;;  %v1255_v30 = vsub.f32 %v8379_v56, %v1161_v40 }
 0x2ee   : > { %v1289_v0 = vmul.f32 1.442695, %v1256_v55 }
 0x2ef   : > { %v1287_v31 = vmul.f32 1.442695, %v1255_v30 }
 0x2f0   : > { %v1170_v33 = vpop.xlane.xlu0 %1169  ;;  %v1179_v42 = vpop.xlane.xlu1 %1178 }
 0x2f1   : > { %7400 = vpow2.f32 %v1287_v31  ;;  %v1258_v2 = vsub.f32 %v8405_v7, %v1170_v33  ;;  %v1261_v6 = vsub.f32 %v8419_v16, %v1179_v42 }
 0x2f3   : > { %v1293_v23 = vmul.f32 1.442695, %v1258_v2  ;;  %v1299_v28 = vmul.f32 1.442695, %v1261_v6 }
 0x2f4   : > { %v1173_v51 = vpop.xlane.xlu1 %1172  ;;  %v1182_v35 = vpop.xlane.xlu0 %1181 }
 0x2f5   : > { %7402 = vpow2.f32 %v1293_v23  ;;  %v1259_v20 = vsub.f32 %v8425_v29, %v1173_v51  ;;  %v1262_v56 = vsub.f32 %v8427_v32, %v1182_v35 }
 0x2f6   : > { %7404 = vpow2.f32 %v1299_v28 }
 0x2f7   : > { %v8657_v63 = vpop.eup %7398  ;;  %7406 = vpow2.f32 %v1289_v0  ;;  %v1295_v10 = vmul.f32 1.442695, %v1259_v20  ;;  %v1301_v40 = vmul.f32 1.442695, %v1262_v56 }
 0x2f8   : > { %v1191_v30 = vpop.xlane.xlu1 %1190  ;;  %v1176_v7 = vpop.xlane.xlu0 %1175  ;;  %v1357_v16 = vsel %vm1158_vm2, %v8657_v63, 0.0 }
 0x2f9   : > { %7408 = vpow2.f32 %v1295_v10  ;;  %v1260_v33 = vsub.f32 %v8441_v50, %v1176_v7  ;;  %1358 = vadd.xlane.f32.xlu1 %v1357_v16  ;;  %v1265_v29 = vsub.f32 %v8451_v61, %v1191_v30 }
 0x2fa   : > { %7410 = vpow2.f32 %v1301_v40 }
 0x2fb   : > { %v8662_v23 = vpop.eup %7400  ;;  %v1297_v28 = vmul.f32 1.442695, %v1260_v33  ;;  %v1307_v2 = vmul.f32 1.442695, %v1265_v29 }
 0x2fc   : > { %v1185_v32 = vpop.xlane.xlu1 %1184  ;;  %v1194_v55 = vpop.xlane.xlu0 %1193  ;;  %v1351_v31 = vsel %vm1158_vm2, %v8662_v23, 0.0 }
 0x2fd   : > { %1352 = vadd.xlane.f32.xlu1 %v1351_v31  ;;  %7412 = vpow2.f32 %v1297_v28  ;;  %v1263_v6 = vsub.f32 %v8457_v8, %v1185_v32  ;;  %v1266_v8 = vsub.f32 %v8459_v9, %v1194_v55 }
 0x2fe   : > { %7414 = vpow2.f32 %v1307_v2 }
 0x2ff   : > { %v8667_v42 = vpop.eup %7402  ;;  %v1303_v56 = vmul.f32 1.442695, %v1263_v6  ;;  %v1309_v29 = vmul.f32 1.442695, %v1266_v8 }
 0x300   : > { %v8670_v50 = vpop.eup %7404  ;;  %v1203_v0 = vpop.xlane.xlu1 %1202  ;;  %v1360_v61 = vsel %vm1158_vm2, %v8667_v42, 0.0 }
 0x301   : > { %v1188_v12 = vpop.xlane.xlu0 %1187  ;;  %v8674_v51 = vpop.eup %7406  ;;  %v1369_v35 = vsel %vm1158_vm2, %v8670_v50, 0.0  ;;  %1361 = vadd.xlane.f32.xlu0 %v1360_v61  ;;  %7416 = vpow2.f32 %v1303_v56 }
 0x302   : > { %1370 = vadd.xlane.f32.xlu1 %v1369_v35  ;;  %v1354_v7 = vsel %vm1158_vm2, %v8674_v51, 0.0  ;;  %v1264_v28 = vsub.f32 %v8473_v34, %v1188_v12 }
 0x303   : > { %v8678_v20 = vpop.eup %7408 }
 0x304   : > { %v1197_v10 = vpop.xlane.xlu1 %1196  ;;  %v1363_v30 = vsel %vm1158_vm2, %v8678_v20, 0.0  ;;  %v8685_v16 = vpop.eup %7410  ;;  %v1305_v61 = vmul.f32 1.442695, %v1264_v28 }
 0x305   : > { %v1206_v40 = vpop.xlane.xlu0 %1205  ;;  %1355 = vadd.xlane.f32.xlu0 %v1354_v7  ;;  %v1372_v55 = vsel %vm1158_vm2, %v8685_v16, 0.0 }
 0x306   : > { %v1270_v33 = vsub.f32 %v8488_v60, %v1206_v40  ;;  %1364 = vadd.xlane.f32.xlu1 %v1363_v30  ;;  %v1269_v60 = vsub.f32 %v8483_v46, %v1203_v0  ;;  %v1267_v30 = vsub.f32 %v8486_v59, %v1197_v10 }
 0x307   : > { %v8691_v31 = vpop.eup %7412 }
 0x308   : > { %v1317_v32 = vmul.f32 1.442695, %v1270_v33  ;;  %v1366_v34 = vsel %vm1158_vm2, %v8691_v31, 0.0  ;;  %v8697_v12 = vpop.eup %7414 }
 0x309   : > { %v1200_v9 = vpop.xlane.xlu0 %1199  ;;  %v1215_v6 = vpop.xlane.xlu1 %1214  ;;  %1373 = vadd.xlane.f32.xlu0 %v1372_v55  ;;  %v1381_v46 = vsel %vm1158_vm2, %v8697_v12, 0.0 }
 0x30a   : > { %v1268_v2 = vsub.f32 %v8504_v18, %v1200_v9  ;;  %7418 = vpow2.f32 %v1317_v32  ;;  %v1315_v18 = vmul.f32 1.442695, %v1269_v60  ;;  %v1311_v32 = vmul.f32 1.442695, %v1267_v30 }
 0x30b   : > { %7420 = vpow2.f32 %v1309_v29  ;;  %v8703_v0 = vpop.eup %7416 }
 0x30c   : > { %v1313_v35 = vmul.f32 1.442695, %v1268_v2  ;;  %v1375_v10 = vsel %vm1158_vm2, %v8703_v0, 0.0 }
 0x30d   : > { %v1218_v56 = vpop.xlane.xlu0 %1217  ;;  %v1209_v8 = vpop.xlane.xlu1 %1208  ;;  %1367 = vadd.xlane.f32.xlu0 %v1366_v34 }
 0x30e   : > { %7422 = vpow2.f32 %v1313_v35  ;;  %v1274_v40 = vsub.f32 %v8525_v5, %v1218_v56  ;;  %v1273_v5 = vsub.f32 %v8515_v44, %v1215_v6  ;;  %v1271_v6 = vsub.f32 %v8523_v1, %v1209_v8 }
 0x30f   : > { %7424 = vpow2.f32 %v1305_v61 }
 0x310   : > { %v1325_v7 = vmul.f32 1.442695, %v1274_v40  ;;  %v1323_v44 = vmul.f32 1.442695, %v1273_v5  ;;  %v1319_v1 = vmul.f32 1.442695, %v1271_v6 }
 0x311   : > { %v1212_v33 = vpop.xlane.xlu0 %1211  ;;  %1382 = vadd.xlane.f32.xlu0 %v1381_v46  ;;  %v1227_v28 = vpop.xlane.xlu1 %1226 }
 0x312   : > { %7426 = vpow2.f32 %v1325_v7  ;;  %v1272_v29 = vsub.f32 %v8536_v21, %v1212_v33  ;;  %v1277_v8 = vsub.f32 %v8547_v54, %v1227_v28 }
 0x313   : > { %7428 = vpow2.f32 %v1315_v18 }
 0x314   : > { %v1321_v9 = vmul.f32 1.442695, %v1272_v29  ;;  %v8707_v55 = vpop.eup %7418  ;;  %v1331_v54 = vmul.f32 1.442695, %v1277_v8 }
 0x315   : > { %v1230_v59 = vpop.xlane.xlu0 %1229  ;;  %v8711_v2 = vpop.eup %7420  ;;  %v1396_v21 = vsel %vm1158_vm2, %v8707_v55, 0.0  ;;  %1376 = vadd.xlane.f32.xlu0 %v1375_v10 }
 0x316   : > { %7430 = vpow2.f32 %v1321_v9  ;;  %v1278_v60 = vsub.f32 %v8557_v26, %v1230_v59  ;;  %1397 = vadd.xlane.f32.xlu1 %v1396_v21  ;;  %v1221_v56 = vpop.xlane.xlu1 %1220  ;;  %v1384_v26 = vsel %vm1158_vm2, %v8711_v2, 0.0 }
 0x317   : > { %7432 = vpow2.f32 %v1311_v32  ;;  %v1275_v28 = vsub.f32 %v8555_v15, %v1221_v56 }
 0x318   : > { %v8716_v61 = vpop.eup %7422  ;;  %v1333_v35 = vmul.f32 1.442695, %v1278_v60 }
 0x319   : > { %v1224_v34 = vpop.xlane.xlu0 %1223  ;;  %v1390_v40 = vsel %vm1158_vm2, %v8716_v61, 0.0  ;;  %v8723_v18 = vpop.eup %7424  ;;  %1385 = vadd.xlane.f32.xlu0 %v1384_v26 }
 0x31a   : > { %7434 = vpow2.f32 %v1333_v35  ;;  %v1276_v30 = vsub.f32 %v8568_v41, %v1224_v34  ;;  %1391 = vadd.xlane.f32.xlu1 %v1390_v40  ;;  %v1378_v32 = vsel %vm1158_vm2, %v8723_v18, 0.0  ;;  %v1239_v9 = vpop.xlane.xlu1 %1238  ;;  %v1327_v34 = vmul.f32 1.442695, %v1275_v28 }
 0x31b   : > { %7436 = vpow2.f32 %v1323_v44  ;;  %v1281_v15 = vsub.f32 %v8579_v62, %v1239_v9 }
 0x31c   : > { %v8726_v7 = vpop.eup %7426  ;;  %v1329_v33 = vmul.f32 1.442695, %v1276_v30 }
 0x31d   : > { %v1242_v46 = vpop.xlane.xlu0 %1241  ;;  %v1408_v29 = vsel %vm1158_vm2, %v8726_v7, 0.0  ;;  %v8733_v5 = vpop.eup %7428  ;;  %1379 = vadd.xlane.f32.xlu0 %v1378_v32  ;;  %v1339_v8 = vmul.f32 1.442695, %v1281_v15 }
 0x31e   : > { %7438 = vpow2.f32 %v1329_v33  ;;  %v1282_v41 = vsub.f32 %v8584_v19, %v1242_v46  ;;  %1409 = vadd.xlane.f32.xlu1 %v1408_v29  ;;  %v1393_v44 = vsel %vm1158_vm2, %v8733_v5, 0.0  ;;  %v1233_v40 = vpop.xlane.xlu1 %1232 }
 0x31f   : > { %7440 = vpow2.f32 %v1319_v1  ;;  %v1279_v33 = vsub.f32 %v8591_v52, %v1233_v40 }
 0x320   : > { %v8736_v59 = vpop.eup %7430  ;;  %v1341_v10 = vmul.f32 1.442695, %v1282_v41 }
 0x321   : > { %v1236_v60 = vpop.xlane.xlu0 %1235  ;;  %v1402_v21 = vsel %vm1158_vm2, %v8736_v59, 0.0  ;;  %v8743_v6 = vpop.eup %7432  ;;  %1394 = vadd.xlane.f32.xlu0 %v1393_v44  ;;  %v1335_v41 = vmul.f32 1.442695, %v1279_v33 }
 0x322   : > { %7442 = vpow2.f32 %v1341_v10  ;;  %v1280_v19 = vsub.f32 %v8600_v11, %v1236_v60  ;;  %1403 = vadd.xlane.f32.xlu1 %v1402_v21  ;;  %v1387_v30 = vsel %vm1158_vm2, %v8743_v6, 0.0  ;;  %v1251_v40 = vpop.xlane.xlu1 %1250 }
 0x323   : > { %7444 = vpow2.f32 %v1331_v54 }
 0x324   : > { %v8746_v35 = vpop.eup %7434  ;;  %v1337_v56 = vmul.f32 1.442695, %v1280_v19 }
 0x325   : > { %v1420_v26 = vsel %vm1158_vm2, %v8746_v35, 0.0  ;;  %v8753_v1 = vpop.eup %7436  ;;  %1388 = vadd.xlane.f32.xlu0 %v1387_v30 }
 0x326   : > { %7446 = vpow2.f32 %v1337_v56  ;;  %1421 = vadd.xlane.f32.xlu1 %v1420_v26  ;;  %v1405_v62 = vsel %vm1158_vm2, %v8753_v1, 0.0  ;;  %v1285_v26 = vsub.f32 %v8611_v49, %v1251_v40  ;;  %v1245_v30 = vpop.xlane.xlu1 %1244 }
 0x327   : > { %7448 = vpow2.f32 %v1327_v34  ;;  %v1283_v33 = vsub.f32 %v8620_v43, %v1245_v30 }
 0x328   : > { %v8755_v11 = vpop.eup %7438  ;;  %7450 = vpow2.f32 %v1339_v8  ;;  %v1347_v8 = vmul.f32 1.442695, %v1285_v26 }
 0x329   : > { %v1414_v46 = vsel %vm1158_vm2, %v8755_v11, 0.0  ;;  %v8762_v29 = vpop.eup %7440  ;;  %1406 = vadd.xlane.f32.xlu0 %v1405_v62  ;;  %7452 = vpow2.f32 %v1335_v41  ;;  %v1254_v62 = vpop.xlane.xlu0 %1253 }
 0x32a   : > { %1415 = vadd.xlane.f32.xlu1 %v1414_v46  ;;  %v1399_v9 = vsel %vm1158_vm2, %v8762_v29, 0.0  ;;  %7454 = vpow2.f32 %v1347_v8  ;;  %v1343_v46 = vmul.f32 1.442695, %v1283_v33  ;;  %v1286_v41 = vsub.f32 %v8613_v45, %v1254_v62 }
 0x32c   : > { %v8764_v32 = vpop.eup %7442  ;;  %7456 = vpow2.f32 %v1343_v46 }
 0x32d   : > { %v1432_v52 = vsel %vm1158_vm2, %v8764_v32, 0.0  ;;  %v8770_v54 = vpop.eup %7444  ;;  %1400 = vadd.xlane.f32.xlu0 %v1399_v9  ;;  %v1248_v9 = vpop.xlane.xlu0 %1247 }
 0x32e   : > { %1433 = vadd.xlane.f32.xlu1 %v1432_v52  ;;  %v1417_v10 = vsel %vm1158_vm2, %v8770_v54, 0.0  ;;  %v1349_v52 = vmul.f32 1.442695, %v1286_v41 }
 0x330   : > { %v8772_v28 = vpop.eup %7446  ;;  %7458 = vpow2.f32 %v1349_v52 }
 0x331   : > { %v1426_v60 = vsel %vm1158_vm2, %v8772_v28, 0.0  ;;  %v8778_v21 = vpop.eup %7448  ;;  %1418 = vadd.xlane.f32.xlu0 %v1417_v10  ;;  %v1284_v10 = vsub.f32 %v8622_v53, %v1248_v9 }
 0x332   : > { %1427 = vadd.xlane.f32.xlu1 %v1426_v60  ;;  %v1411_v44 = vsel %vm1158_vm2, %v8778_v21, 0.0  ;;  %v8782_v19 = vpop.eup %7450 }
 0x333   : > { %v1429_v34 = vsel %vm1158_vm2, %v8782_v19, 0.0  ;;  %v8786_v15 = vpop.eup %7452  ;;  %v1345_v49 = vmul.f32 1.442695, %v1284_v10 }
 0x334   : > { %v1423_v56 = vsel %vm1158_vm2, %v8786_v15, 0.0  ;;  %v8798_v60 = vpop.eup %7454 }
 0x335   : > { %1412 = vadd.xlane.f32.xlu0 %v1411_v44  ;;  %v1441_v44 = vsel %vm1158_vm2, %v8798_v60, 0.0  ;;  %7460 = vpow2.f32 %v1345_v49 }
 0x339   : > { %1430 = vadd.xlane.f32.xlu0 %v1429_v34  ;;  %v8802_v34 = vpop.eup %7456 }
 0x33a   : > { %v1435_v43 = vsel %vm1158_vm2, %v8802_v34, 0.0  ;;  %v8806_v45 = vpop.eup %7458 }
 0x33b   : > { %v1444_v53 = vsel %vm1158_vm2, %v8806_v45, 0.0 }
 0x33d   : > { %1424 = vadd.xlane.f32.xlu0 %v1423_v56 }
 0x33f   : > { %v8810_v56 = vpop.eup %7460 }
 0x340   : > { %v1438_v40 = vsel %vm1158_vm2, %v8810_v56, 0.0 }
 0x343   : > { %1917 = vrot.lane.b32.xlu1 %v8131_v27, %s8017_s17 }
 0x353   : > { %2133 = vrot.lane.b32.xlu0 %v8185_v4, %s8016_s16 }
 0x367   : > { %1442 = vadd.xlane.f32.xlu1 %v1441_v44 }
 0x36b   : > { %1436 = vadd.xlane.f32.xlu1 %v1435_v43 }
 0x372   : > { %1445 = vadd.xlane.f32.xlu0 %v1444_v53 }
 0x376   : > { %1439 = vadd.xlane.f32.xlu0 %v1438_v40 }
 0x37c   : > { %2135 = vrot.lane.b32.xlu1 %v8183_v3, %s8016_s16 }
 0x380   : > { %2137 = vrot.lane.b32.xlu1 %v8197_v14, %s8016_s16 }
 0x384   : > { %2022 = vrot.lane.b32.xlu1 %v8157_v47, %s8017_s17 }
 0x386   : > { %v1359_v26 = vpop.xlane.xlu1 %1358 }
 0x388   : > { %1921 = vrot.lane.b32.xlu1 %v8145_v37, %s8017_s17 }
 0x38a   : > { %v1353_v30 = vpop.xlane.xlu1 %1352 }
 0x38c   : > { %2240 = vrot.lane.b32.xlu1 %v8207_v24, %s8016_s16  ;;  %2034 = vrot.lane.b32.xlu0 %v8171_v57, %s8016_s16 }
 0x38e   : > { %v1362_v8 = vpop.xlane.xlu0 %1361 }
 0x38f   : > { %v1371_v33 = vpop.xlane.xlu1 %1370  ;;  %7462 = vrcp.f32 %v1362_v8 }
 0x390   : > { %2127 = vrot.lane.b32.xlu1 %v8183_v3, %s8017_s17  ;;  %2020 = vrot.lane.b32.xlu0 %v8159_v48, %s8017_s17  ;;  %7464 = vrcp.f32 %v1353_v30 }
 0x391   : > { %7466 = vrcp.f32 %v1359_v26 }
 0x392   : > { %v1356_v62 = vpop.xlane.xlu0 %1355 }
 0x393   : > { %7468 = vrcp.f32 %v1356_v62  ;;  %v1365_v46 = vpop.xlane.xlu1 %1364 }
 0x394   : > { %2024 = vrot.lane.b32.xlu1 %v8173_v58, %s8017_s17  ;;  %2238 = vrot.lane.b32.xlu0 %v8209_v25, %s8016_s16 }
 0x396   : > { %v1374_v41 = vpop.xlane.xlu0 %1373 }
 0x397   : > { %7470 = vrcp.f32 %v1374_v41 }
 0x398   : > { %2244 = vrot.lane.b32.xlu1 %v8219_v36, %s8016_s16  ;;  %1919 = vrot.lane.b32.xlu0 %v8147_v38, %s8017_s17  ;;  %7472 = vrcp.f32 %v1365_v46 }
 0x399   : > { %v7463_v9 = vpop.eup %7462  ;;  %7474 = vrcp.f32 %v1371_v33 }
 0x39a   : > { %v1368_v52 = vpop.xlane.xlu0 %1367  ;;  %v7465_v10 = vpop.eup %7464  ;;  %v1482_v43 = vmul.f32 %v7463_v9, %v8667_v42 }
 0x39b   : > { %7476 = vrcp.f32 %v1368_v52  ;;  %v7467_v49 = vpop.eup %7466  ;;  %v1479_v40 = vmul.f32 %v7465_v10, %v8662_v23 }
 0x39c   : > { %2232 = vrot.lane.b32.xlu1 %v8207_v24, %s8017_s17  ;;  %2139 = vrot.lane.b32.xlu0 %v8195_v13, %s8016_s16  ;;  %v1481_v30 = vmul.f32 %v7467_v49, %v8657_v63 }
 0x39d   : > { %v7469_v44 = vpop.eup %7468 }
 0x39e   : > { %v1383_v53 = vpop.xlane.xlu0 %1382  ;;  %v1480_v26 = vmul.f32 %v7469_v44, %v8674_v51  ;;  %v1512_v33 = vpack.c.bf16 %v1482_v43, %v1481_v30 }
 0x3a0   : > { %2131 = vrot.lane.b32.xlu1 %v8195_v13, %s8017_s17  ;;  %2125 = vrot.lane.b32.xlu0 %v8185_v4, %s8017_s17  ;;  %v1511_v8 = vpack.c.bf16 %v1480_v26, %v1479_v40 }
 0x3a1   : > { %v7471_v62 = vpop.eup %7470 }
 0x3a2   : > { %6816 = vmatprep.mubr.msk.bf16.mxu0 %vm1158_vm2, %v1511_v8  ;;  %v1377_v46 = vpop.xlane.xlu0 %1376  ;;  %v7473_v42 = vpop.eup %7472  ;;  %v1486_v51 = vmul.f32 %v7471_v62, %v8685_v16  ;;  %v11636_v16 = vld [vmem:[#allocation8_spill] sm:$0xff] }
 0x3a3   : > { %v1398_v41 = vpop.xlane.xlu1 %1397  ;;  %6817 = vmatmul.mubr.msk.bf16.vlgmr.msra.gmra.mrb[48].mxu0 %vm1158_vm2, %v1512_v33  ;;  %v7475_v23 = vpop.eup %7474  ;;  %v1483_v52 = vmul.f32 %v7473_v42, %v8678_v20 }
 0x3a4   : > { %2236 = vrot.lane.b32.xlu1 %v8219_v36, %s8017_s17  ;;  %6825 = vmatpush3.bf16.msra.mxu0 %v8305_v17  ;;  %v1485_v44 = vmul.f32 %v7475_v23, %v8670_v50  ;;  %v11635_v17 = vld [vmem:[#allocation4_spill] sm:$0xff] }
 0x3a5   : > { %v7477_v63 = vpop.eup %7476  ;;  %2242 = vrot.lane.b32.xlu0 %v8221_v39, %s8016_s16  ;;  %6826 = vmatprep.subr.bf16.mxu0 %v8313_v22  ;;  %s8019_s16 = smov 80  }
 0x3a6   : > { %v1386_v9 = vpop.xlane.xlu0 %1385  ;;  %v1484_v10 = vmul.f32 %v7477_v63, %v8691_v31  ;;  %v1514_v20 = vpack.c.bf16 %v1486_v51, %v1485_v44 }
 0x3a7   : > { %v1392_v49 = vpop.xlane.xlu1 %1391  ;;  %7478 = vrcp.f32 %v1386_v9 }
 0x3a8   : > { %2776 = vrot.lane.b32.xlu1 %v11635_v17, %s8018_s22  ;;  %6827 = vmatpush3.bf16.msra.mxu0 %v8313_v22  ;;  %v1513_v43 = vpack.c.bf16 %v1484_v10, %v1483_v52  ;;  %7480 = vrcp.f32 %v1377_v46  ;;  %v11637_v22 = vld [vmem:[#allocation9_spill] sm:$0xff] }
 0x3a9   : > { %2026 = vrot.lane.b32.xlu0 %v8171_v57, %s8017_s17  ;;  %6828 = vmatprep.subr.bf16.mxu0 %v11636_v16  ;;  %7482 = vrcp.f32 %v1383_v53  ;;  %v11638_v53 = vld [vmem:[#allocation10_spill] sm:$0xff] }
 0x3aa   : > { %6820 = vmatprep.mubr.msk.bf16.mxu0 %vm1158_vm2, %v1513_v43  ;;  %v1380_v31 = vpop.xlane.xlu0 %1379  ;;  %v11639_v43 = vld [vmem:[#allocation12_spill] sm:$0xff] }
 0x3ab   : > { %v1410_v50 = vpop.xlane.xlu1 %1409  ;;  %7484 = vrcp.f32 %v1380_v31  ;;  %6821 = vmatmul.mubr.msk.bf16.gmra.mrb[52].mxu0 %vm1158_vm2, %v1514_v20 }
 0x3ac   : > { %2780 = vrot.lane.b32.xlu1 %v8147_v38, %s8018_s22  ;;  %6829 = vmatpush3.bf16.msra.mxu0 %v11636_v16 }
 0x3ad   : > { %2230 = vrot.lane.b32.xlu0 %v8209_v25, %s8017_s17  ;;  %6830 = vmatprep.subr.bf16.mxu0 %v11637_v22 }
 0x3ae   : > { %v1395_v40 = vpop.xlane.xlu0 %1394 }
 0x3af   : > { %v1404_v26 = vpop.xlane.xlu1 %1403  ;;  %7486 = vrcp.f32 %v1395_v40 }
 0x3b0   : > { %2865 = vrot.lane.b32.xlu1 %v8159_v48, %s8018_s22  ;;  %6831 = vmatpush3.bf16.msra.mxu0 %v11637_v22  ;;  %7488 = vrcp.f32 %v1392_v49 }
 0x3b1   : > { %2129 = vrot.lane.b32.xlu0 %v8197_v14, %s8017_s17  ;;  %6856 = vmatprep.subr.bf16.mxu0 %v11638_v53  ;;  %v7479_v30 = vpop.eup %7478  ;;  %7490 = vrcp.f32 %v1398_v41 }
 0x3b2   : > { %v1389_v8 = vpop.xlane.xlu0 %1388  ;;  %v7481_v33 = vpop.eup %7480  ;;  %v1490_v23 = vmul.f32 %v7479_v30, %v8711_v2 }
 0x3b3   : > { %7492 = vrcp.f32 %v1389_v8  ;;  %v7483_v62 = vpop.eup %7482  ;;  %v1422_v46 = vpop.xlane.xlu1 %1421  ;;  %v1487_v51 = vmul.f32 %v7481_v33, %v8703_v0 }
 0x3b4   : > { %2954 = vrot.lane.b32.xlu1 %v8185_v4, %s8018_s22  ;;  %v1489_v41 = vmul.f32 %v7483_v62, %v8697_v12  ;;  %v11641_v62 = vld [vmem:[#allocation13_spill] sm:$0xff] }
 0x3b5   : > { %v7485_v42 = vpop.eup %7484  ;;  %2234 = vrot.lane.b32.xlu0 %v8221_v39, %s8017_s17  ;;  %s8020_s17 = smov 112  }
 0x3b6   : > { %v1407_v63 = vpop.xlane.xlu0 %1406  ;;  %v1488_v9 = vmul.f32 %v7485_v42, %v8723_v18  ;;  %v1516_v10 = vpack.c.bf16 %v1490_v23, %v1489_v41  ;;  %v11642_v41 = vld [vmem:[#allocation18_spill] sm:$0xff] }
 0x3b7   : > { %7494 = vrcp.f32 %v1407_v63  ;;  %v1416_v49 = vpop.xlane.xlu1 %1415 }
 0x3b8   : > { %2869 = vrot.lane.b32.xlu1 %v8173_v58, %s8018_s22  ;;  %v1515_v52 = vpack.c.bf16 %v1488_v9, %v1487_v51  ;;  %7496 = vrcp.f32 %v1404_v26 }
 0x3b9   : > { %2778 = vrot.lane.b32.xlu0 %v8131_v27, %s8018_s22  ;;  %v7487_v2 = vpop.eup %7486  ;;  %7498 = vrcp.f32 %v1410_v50 }
 0x3ba   : > { %6832 = vmatprep.mubr.msk.bf16.mxu0 %vm1158_vm2, %v1515_v52  ;;  %v1401_v0 = vpop.xlane.xlu0 %1400  ;;  %v7489_v44 = vpop.eup %7488  ;;  %v1493_v16 = vmul.f32 %v7487_v2, %v8733_v5  ;;  %v11640_v5 = vld [vmem:[#allocation21_spill] sm:$0xff]  ;;  %v11643_v52 = vld [vmem:[#allocation11_spill] sm:$0xff] }
 0x3bb   : > { %7500 = vrcp.f32 %v1401_v0  ;;  %6833 = vmatmul.mubr.msk.bf16.vlgmr.msra.gmra.mrb[56].mxu0 %vm1158_vm2, %v1516_v10  ;;  %v7491_v12 = vpop.eup %7490  ;;  %v1492_v50 = vmul.f32 %v7489_v44, %v8716_v61  ;;  %v1434_v40 = vpop.xlane.xlu1 %1433  ;;  %v1944_v10 = vsel %vm693_vm1, %v11643_v52, 0  ;;  %v11644_v0 = vld [vmem:[#allocation14_spill] sm:$0xff] }
 0x3bc   : > { %2958 = vrot.lane.b32.xlu1 %v8197_v14, %s8018_s22  ;;  %6857 = vmatpush3.bf16.msra.mxu0 %v11638_v53  ;;  %v1494_v22 = vmul.f32 %v7491_v12, %v8707_v55 }
 0x3bd   : > { %v7493_v18 = vpop.eup %7492  ;;  %2782 = vrot.lane.b32.xlu0 %v8145_v37, %s8018_s22  ;;  %6858 = vmatprep.subr.bf16.mxu0 %v11639_v43 }
 0x3be   : > { %v1419_v20 = vpop.xlane.xlu0 %1418  ;;  %v1491_v31 = vmul.f32 %v7493_v18, %v8743_v6  ;;  %v1518_v53 = vpack.c.bf16 %v1494_v22, %v1493_v16 }
 0x3bf   : > { %7502 = vrcp.f32 %v1419_v20 }
 0x3c0   : > { %3043 = vrot.lane.b32.xlu1 %v8209_v25, %s8018_s22  ;;  %6859 = vmatpush3.bf16.msra.mxu0 %v11639_v43  ;;  %v1517_v26 = vpack.c.bf16 %v1492_v50, %v1491_v31  ;;  %7504 = vrcp.f32 %v1416_v49 }
 0x3c1   : > { %2867 = vrot.lane.b32.xlu0 %v8157_v47, %s8018_s22  ;;  %6860 = vmatprep.subr.bf16.mxu0 %v11640_v5  ;;  %v7495_v6 = vpop.eup %7494  ;;  %7506 = vrcp.f32 %v1422_v46  ;;  %v1428_v46 = vpop.xlane.xlu1 %1427 }
 0x3c2   : > { %6836 = vmatprep.mubr.msk.bf16.mxu0 %vm1158_vm2, %v1517_v26  ;;  %v1413_v55 = vpop.xlane.xlu0 %1412  ;;  %v7497_v61 = vpop.eup %7496  ;;  %v1497_v33 = vmul.f32 %v7495_v6, %v8753_v1 }
 0x3c3   : > { %7508 = vrcp.f32 %v1413_v55  ;;  %6837 = vmatmul.mubr.msk.bf16.gmra.mrb[60].mxu0 %vm1158_vm2, %v1518_v53  ;;  %v7499_v30 = vpop.eup %7498  ;;  %v1496_v63 = vmul.f32 %v7497_v61, %v8736_v59  ;;  %v2049_v61 = vsel %vm693_vm1, %v11642_v41, 0 }
 0x3c4   : > { %3239 = vrot.lane.b32.xlu1 %v8131_v27, %s8019_s16  ;;  %6861 = vmatpush3.bf16.msra.mxu0 %v11640_v5  ;;  %v1498_v51 = vmul.f32 %v7499_v30, %v8726_v7 }
 0x3c5   : > { %v7501_v8 = vpop.eup %7500  ;;  %2956 = vrot.lane.b32.xlu0 %v8183_v3, %s8018_s22  ;;  %6862 = vmatprep.subr.bf16.mxu0 %v11641_v62 }
 0x3c6   : > { %v1431_v42 = vpop.xlane.xlu0 %1430  ;;  %v1495_v23 = vmul.f32 %v7501_v8, %v8762_v29  ;;  %v1520_v9 = vpack.c.bf16 %v1498_v51, %v1497_v33  ;;  %v11649_v33 = vld [vmem:[#allocation19_spill] sm:$0xff] }
 0x3c7   : > { %7510 = vrcp.f32 %v1431_v42 }
 0x3c8   : > { %3342 = vrot.lane.b32.xlu1 %v8159_v48, %s8019_s16  ;;  %6863 = vmatpush3.bf16.msra.mxu0 %v11641_v62  ;;  %v1519_v1 = vpack.c.bf16 %v1496_v63, %v1495_v23  ;;  %7512 = vrcp.f32 %v1428_v46  ;;  %v1918_v62 = vpop.permute.xlu1 %1917  ;;  %v2055_v46 = vsel %vm693_vm1, %v11649_v33, 0 }
 0x3c9   : > { %2871 = vrot.lane.b32.xlu0 %v8171_v57, %s8018_s22  ;;  %7312 = vmatprep.subr.msk.bf16.mxu0 %vm693_vm1, %v11642_v41  ;;  %v7503_v29 = vpop.eup %7502  ;;  %7514 = vrcp.f32 %v1434_v40  ;;  %v11646_v40 = vld [vmem:[#allocation15_spill] sm:$0xff] }
 0x3ca   : > { %6848 = vmatprep.mubr.msk.bf16.mxu1 %vm1158_vm2, %v1519_v1  ;;  %v1425_v7 = vpop.xlane.xlu0 %1424  ;;  %v7505_v59 = vpop.eup %7504  ;;  %v1501_v44 = vmul.f32 %v7503_v29, %v8770_v54  ;;  %v1947_v54 = vsel %vm693_vm1, %v11644_v0, 0 }
 0x3cb   : > { %7516 = vrcp.f32 %v1425_v7  ;;  %6849 = vmatmul.mubr.msk.bf16.vlgmr.msra.gmra.mrb[16].mxu1 %vm1158_vm2, %v1520_v9  ;;  %v7507_v2 = vpop.eup %7506  ;;  %v1500_v18 = vmul.f32 %v7505_v59, %v8755_v11 }
 0x3cc   : > { %3229 = vrot.lane.b32.xlu1 %v11635_v17, %s8020_s17  ;;  %6873 = vmatpush3.bf16.xpose.msra.mxu1 %v1944_v10  ;;  %v1502_v43 = vmul.f32 %v7507_v2, %v8746_v35  ;;  %v11645_v35 = vld [vmem:[#allocation20_spill] sm:$0xff] }
 0x3cd   : > { %v7509_v49 = vpop.eup %7508  ;;  %2960 = vrot.lane.b32.xlu0 %v8195_v13, %s8018_s22  ;;  %7309 = vmatprep.subr.msk.bf16.mxu1 %vm693_vm1, %v11644_v0 }
 0x3ce   : > { %v1499_v12 = vmul.f32 %v7509_v49, %v8778_v21  ;;  %v1522_v20 = vpack.c.bf16 %v1502_v43, %v1501_v44  ;;  %v2134_v8 = vpop.permute.xlu0 %2133 }
 0x3cf   : > { %v2154_v42 = vsel %vm693_vm1, %v2134_v8, 0 }
 0x3d0   : > { %3447 = vrot.lane.b32.xlu1 %v8185_v4, %s8019_s16  ;;  %v1521_v16 = vpack.c.bf16 %v1500_v18, %v1499_v12 }
 0x3d1   : > { %3045 = vrot.lane.b32.xlu0 %v8207_v24, %s8018_s22  ;;  %v7511_v31 = vpop.eup %7510 }
 0x3d2   : > { %6852 = vmatprep.mubr.msk.bf16.mxu1 %vm1158_vm2, %v1521_v16  ;;  %v7513_v50 = vpop.eup %7512  ;;  %v1505_v22 = vmul.f32 %v7511_v31, %v8782_v19  ;;  %v1950_v19 = vsel %vm693_vm1, %v11646_v40, 0 }
 0x3d3   : > { %6853 = vmatmul.mubr.msk.bf16.gmra.mrb[20].mxu1 %vm1158_vm2, %v1522_v20  ;;  %v7515_v11 = vpop.eup %7514  ;;  %v1504_v5 = vmul.f32 %v7513_v50, %v8772_v28  ;;  %v11648_v28 = vld [vmem:[#allocation17_spill] sm:$0xff] }
 0x3d4   : > { %6875 = vmatpush3.bf16.xpose.msra.mxu1 %v1947_v54  ;;  %6880 = vmatprep.mubr.msk.bf16.mxu1 %vm693_vm1, %v11645_v35  ;;  %v1506_v53 = vmul.f32 %v7515_v11, %v8764_v32  ;;  %v11647_v32 = vld [vmem:[#allocation16_spill] sm:$0xff]  ;;  %v2052_v30 = vsel %vm693_vm1, %v11648_v28, 0 }
 0x3d5   : > { %v7517_v21 = vpop.eup %7516  ;;  %3237 = vrot.lane.b32.xlu0 %v11635_v17, %s8019_s16  ;;  %7310 = vmatprep.subr.msk.bf16.mxu1 %vm693_vm1, %v11646_v40 }
 0x3d6   : > { %v1503_v26 = vmul.f32 %v7517_v21, %v8786_v15  ;;  %v1524_v55 = vpack.c.bf16 %v1506_v53, %v1505_v22  ;;  %v1953_v15 = vsel %vm693_vm1, %v11647_v32, 0 }
 0x3d8   : > { %v1523_v6 = vpack.c.bf16 %v1504_v5, %v1503_v26 }
 0x3d9   : > { %3047 = vrot.lane.b32.xlu0 %v8221_v39, %s8018_s22 }
 0x3da   : > { %6864 = vmatprep.mubr.msk.bf16.mxu0 %vm1158_vm2, %v1523_v6 }
 0x3db   : > { %6865 = vmatmul.mubr.msk.bf16.vlgmr.msra.gmra.mrb[64].mxu0 %vm1158_vm2, %v1524_v55 }
 0x3dc   : > { %6877 = vmatpush3.bf16.xpose.msra.mxu1 %v1950_v19  ;;  %6889 = vmatpush3.bf16.xpose.msra.mxu0 %v2049_v61 }
 0x3dd   : > { %3049 = vrot.lane.b32.xlu0 %v8219_v36, %s8018_s22  ;;  %7311 = vmatprep.subr.msk.bf16.mxu1 %vm693_vm1, %v11647_v32 }
 0x3de   : > { %7313 = vmatprep.subr.msk.bf16.mxu0 %vm693_vm1, %v11648_v28 }
 0x3e1   : > { %3241 = vrot.lane.b32.xlu0 %v8147_v38, %s8019_s16 }
 0x3e4   : > { %6879 = vmatpush3.bf16.xpose.msra.mxu1 %v1953_v15  ;;  %6891 = vmatpush3.bf16.xpose.msra.mxu0 %v2052_v30 }
 0x3e5   : > { %3243 = vrot.lane.b32.xlu0 %v8145_v37, %s8019_s16  ;;  %7314 = vmatprep.subr.msk.bf16.mxu0 %vm693_vm1, %v11649_v33 }
 0x3e6   : > { %7316 = vmatprep.subr.msk.bf16.mxu1 %vm693_vm1, %v2134_v8 }
 0x3e9   : > { %3344 = vrot.lane.b32.xlu0 %v8157_v47, %s8019_s16 }
 0x3eb   : > { %6881 = vmatmul.mubr.msk.bf16.vlgmr.msra.gmra.mrb[24].mxu1 %vm693_vm1, %v1918_v62 }
 0x3ec   : > { %6893 = vmatpush3.bf16.xpose.msra.mxu0 %v2055_v46  ;;  %6905 = vmatpush3.bf16.xpose.msra.mxu1 %v2154_v42 }
 0x3ed   : > { %3346 = vrot.lane.b32.xlu0 %v8173_v58, %s8019_s16 }
 0x3f4   : > { %v1443_v23 = vpop.xlane.xlu1 %1442 }
 0x3f8   : > { %v1437_v63 = vpop.xlane.xlu1 %1436 }
 0x3fc   : > { %v2136_v51 = vpop.permute.xlu1 %2135 }
 0x3fd   : > { %7317 = vmatprep.subr.msk.bf16.mxu1 %vm693_vm1, %v2136_v51  ;;  %v2157_v1 = vsel %vm693_vm1, %v2136_v51, 0 }
 0x3fe   : > { %6907 = vmatpush3.bf16.xpose.msra.mxu1 %v2157_v1 }
 0x3ff   : > { %v1446_v9 = vpop.xlane.xlu0 %1445 }
 0x400   : > { %v2138_v41 = vpop.permute.xlu1 %2137  ;;  %7518 = vrcp.f32 %v1446_v9 }
 0x401   : > { %7318 = vmatprep.subr.msk.bf16.mxu1 %vm693_vm1, %v2138_v41  ;;  %7520 = vrcp.f32 %v1437_v63  ;;  %v2160_v59 = vsel %vm693_vm1, %v2138_v41, 0 }
 0x402   : > { %7522 = vrcp.f32 %v1443_v23 }
 0x403   : > { %v1440_v29 = vpop.xlane.xlu0 %1439 }
 0x404   : > { %v2023_v7 = vpop.permute.xlu1 %2022  ;;  %7524 = vrcp.f32 %v1440_v29 }
 0x406   : > { %6909 = vmatpush3.bf16.xpose.msra.mxu1 %v2160_v59 }
 0x407   : > { %v2035_v52 = vpop.permute.xlu0 %2034 }
 0x408   : > { %v1922_v10 = vpop.permute.xlu1 %1921  ;;  %7315 = vmatprep.subr.msk.bf16.mxu0 %vm693_vm1, %v2035_v52  ;;  %v2058_v2 = vsel %vm693_vm1, %v2035_v52, 0 }
 0x409   : > { %6895 = vmatpush3.bf16.xpose.msra.mxu0 %v2058_v2 }
 0x40a   : > { %v7519_v49 = vpop.eup %7518 }
 0x40b   : > { %v2021_v0 = vpop.permute.xlu0 %2020  ;;  %v7521_v44 = vpop.eup %7520  ;;  %v1510_v16 = vmul.f32 %v7519_v49, %v8806_v45 }
 0x40c   : > { %v2241_v12 = vpop.permute.xlu1 %2240  ;;  %v7523_v18 = vpop.eup %7522  ;;  %v1507_v31 = vmul.f32 %v7521_v44, %v8802_v34 }
 0x40d   : > { %v1509_v11 = vmul.f32 %v7523_v18, %v8798_v60  ;;  %v2262_v61 = vsel %vm693_vm1, %v2241_v12, 0 }
 0x40e   : > { %v7525_v43 = vpop.eup %7524 }
 0x40f   : > { %v2239_v20 = vpop.permute.xlu0 %2238  ;;  %v1508_v50 = vmul.f32 %v7525_v43, %v8810_v56  ;;  %v1526_v21 = vpack.c.bf16 %v1510_v16, %v1509_v11 }
 0x410   : > { %v2128_v54 = vpop.permute.xlu1 %2127  ;;  %7320 = vmatprep.subr.msk.bf16.mxu0 %vm693_vm1, %v2239_v20  ;;  %v2259_v5 = vsel %vm693_vm1, %v2239_v20, 0 }
 0x411   : > { %v1525_v35 = vpack.c.bf16 %v1508_v50, %v1507_v31 }
 0x413   : > { %6868 = vmatprep.mubr.msk.bf16.mxu0 %vm1158_vm2, %v1525_v35  ;;  %v1920_v22 = vpop.permute.xlu0 %1919 }
 0x414   : > { %v2025_v40 = vpop.permute.xlu1 %2024  ;;  %6869 = vmatmul.mubr.msk.bf16.gmra.mrb[68].mxu0 %vm1158_vm2, %v1526_v21  ;;  %6884 = vmatprep.mubr.msk.bf16.mxu1 %vm693_vm1, %v1920_v22 }
 0x415   : > { %6885 = vmatmul.mubr.msk.bf16.gmra.mrb[28].mxu1 %vm693_vm1, %v1922_v10  ;;  %6896 = vmatprep.mubr.msk.bf16.mxu0 %vm693_vm1, %v2021_v0 }
 0x417   : > { %v2140_v34 = vpop.permute.xlu0 %2139 }
 0x418   : > { %v2245_v45 = vpop.permute.xlu1 %2244  ;;  %7319 = vmatprep.subr.msk.bf16.mxu1 %vm693_vm1, %v2140_v34  ;;  %v2163_v60 = vsel %vm693_vm1, %v2140_v34, 0 }
 0x419   : > { %6911 = vmatpush3.bf16.xpose.msra.mxu1 %v2163_v60  ;;  %v2268_v42 = vsel %vm693_vm1, %v2245_v45, 0 }
 0x41b   : > { %v2126_v56 = vpop.permute.xlu0 %2125 }
 0x41c   : > { %v2233_v26 = vpop.permute.xlu1 %2232  ;;  %6897 = vmatmul.mubr.msk.bf16.vlgmr.msra.gmra.mrb[72].mxu0 %vm693_vm1, %v2023_v7  ;;  %6912 = vmatprep.mubr.msk.bf16.mxu1 %vm693_vm1, %v2126_v56 }
 0x41d   : > { %6921 = vmatpush3.bf16.xpose.msra.mxu0 %v2259_v5  ;;  %6900 = vmatprep.mubr.msk.bf16.mxu0 %vm693_vm1, %v2025_v40 }
 0x41e   : > { %7321 = vmatprep.subr.msk.bf16.mxu0 %vm693_vm1, %v2241_v12 }
 0x41f   : > { %v2243_v53 = vpop.permute.xlu0 %2242 }
 0x420   : > { %v2132_v6 = vpop.permute.xlu1 %2131  ;;  %6913 = vmatmul.mubr.msk.bf16.vlgmr.msra.gmra.mrb[32].mxu1 %vm693_vm1, %v2128_v54  ;;  %v2265_v8 = vsel %vm693_vm1, %v2243_v53, 0 }
 0x423   : > { %v2027_v55 = vpop.permute.xlu0 %2026 }
 0x424   : > { %v2237_v19 = vpop.permute.xlu1 %2236  ;;  %6901 = vmatmul.mubr.msk.bf16.gmra.mrb[76].mxu0 %vm693_vm1, %v2027_v55 }
 0x425   : > { %6923 = vmatpush3.bf16.xpose.msra.mxu0 %v2262_v61 }
 0x426   : > { %7322 = vmatprep.subr.msk.bf16.mxu0 %vm693_vm1, %v2243_v53 }
 0x427   : > { %v2231_v32 = vpop.permute.xlu0 %2230 }
 0x428   : > { %v2777_v28 = vpop.permute.xlu1 %2776  ;;  %6928 = vmatprep.mubr.msk.bf16.mxu0 %vm693_vm1, %v2231_v32 }
 0x429   : > { %6936 = vmatprep.subr.bf16.mxu1 %v2777_v28 }
 0x42a   : > { %6937 = vmatpush3.bf16.msra.mxu1 %v2777_v28 }
 0x42b   : > { %v2130_v15 = vpop.permute.xlu0 %2129 }
 0x42c   : > { %v2781_v30 = vpop.permute.xlu1 %2780  ;;  %6916 = vmatprep.mubr.msk.bf16.mxu1 %vm693_vm1, %v2130_v15 }
 0x42d   : > { %6925 = vmatpush3.bf16.xpose.msra.mxu0 %v2265_v8  ;;  %6917 = vmatmul.mubr.msk.bf16.gmra.mrb[36].mxu1 %vm693_vm1, %v2132_v6 }
 0x42e   : > { %7323 = vmatprep.subr.msk.bf16.mxu0 %vm693_vm1, %v2245_v45 }
 0x42f   : > { %v2235_v33 = vpop.permute.xlu0 %2234 }
 0x430   : > { %v2866_v62 = vpop.permute.xlu1 %2865 }
 0x433   : > { %v2779_v46 = vpop.permute.xlu0 %2778 }
 0x434   : > { %6938 = vmatprep.subr.bf16.mxu1 %v2779_v46  ;;  %v9029_v23 = vpop.permute.xlu1 %2954 }
 0x435   : > { %6927 = vmatpush3.bf16.xpose.msra.mxu0 %v2268_v42  ;;  %6939 = vmatpush3.bf16.msra.mxu1 %v2779_v46 }
 0x436   : > { %6952 = vmatprep.subr.bf16.mxu0 %v2866_v62  ;;  %6940 = vmatprep.subr.bf16.mxu1 %v2781_v30 }
 0x437   : > { %v2783_v63 = vpop.permute.xlu0 %2782 }
 0x438   : > { %v2870_v1 = vpop.permute.xlu1 %2869 }
 0x439   : > { %6941 = vmatpush3.bf16.msra.mxu1 %v2781_v30 }
 0x43a   : > { %6942 = vmatprep.subr.bf16.mxu1 %v2783_v63 }
 0x43b   : > { %v2868_v51 = vpop.permute.xlu0 %2867 }
 0x43c   : > { %6929 = vmatmul.mubr.msk.bf16.vlgmr.msra.gmra.mrb[80].mxu0 %vm693_vm1, %v2233_v26  ;;  %v9036_v41 = vpop.permute.xlu1 %2958 }
 0x43d   : > { %6932 = vmatprep.mubr.msk.bf16.mxu0 %vm693_vm1, %v2235_v33  ;;  %6953 = vmatpush3.bf16.msra.mxu0 %v2866_v62 }
 0x43e   : > { %6943 = vmatpush3.bf16.msra.mxu1 %v2783_v63  ;;  %6954 = vmatprep.subr.bf16.mxu0 %v2868_v51 }
 0x43f   : > { %6968 = vmatprep.subr.bf16.mxu1 %v9029_v23  ;;  %v9034_v9 = vpop.permute.xlu0 %2956 }
 0x440   : > { %v9039_v7 = vpop.permute.xlu1 %3043 }
 0x441   : > { %6955 = vmatpush3.bf16.msra.mxu0 %v2868_v51  ;;  %11650 = vst [vmem:[#allocation8_spill] sm:$0xff] %v9039_v7 }
 0x442   : > { %6956 = vmatprep.subr.bf16.mxu0 %v2870_v1 }
 0x443   : > { %v2872_v29 = vpop.permute.xlu0 %2871 }
 0x444   : > { %6933 = vmatmul.mubr.msk.bf16.gmra.mrb[84].mxu0 %vm693_vm1, %v2237_v19 }
 0x445   : > { %6957 = vmatpush3.bf16.msra.mxu0 %v2870_v1  ;;  %v9059_v1 = vld [vmem:[%s11515_s5 + $0x50] sm:$0xff] }
 0x446   : > { %6958 = vmatprep.subr.bf16.mxu0 %v2872_v29 }
 0x449   : > { %6959 = vmatpush3.bf16.msra.mxu0 %v2872_v29  ;;  %v9064_v29 = vld [vmem:[%s11515_s5 + $0x40] sm:$0xff] }
 0x44a   : > { %6984 = vmatprep.subr.bf16.mxu0 %v9039_v7 }
 0x476   : > { %v6818_v59 = vpop.f32.mrb[48].mxu0 }
 0x477   : > { %v1585_v52 = vpop.f32.mrb[49].mxu0 }
 0x478   : > { %v6819_v10 = vpop.f32.mrb[50].mxu0 }
 0x479   : > { %v1884_v2 = vpack.c.bf16 %v6819_v10, %v6818_v59  ;;  %v1588_v49 = vpop.f32.mrb[51].mxu0  ;;  %v7910_v59 = vld [vmem:[%s11516_s6 + $0x10] sm:$0xff]  ;;  %v9073_v10 = vld [vmem:[%s11515_s5 + $0x48] sm:$0xff] }
 0x47a   : > { %v1883_v0 = vpack.c.bf16 %v1588_v49, %v1585_v52  ;;  %v2346_v52 = vadd.f32 %v7910_v59, %v9059_v1 }
 0x47b   : > { %1900 = vst.msk [vmem:[#allocation2 + $0x8] sm:$0xff] %vm693_vm1, %v1884_v2  ;;  %v7911_v2 = vld [vmem:[%s11516_s6] sm:$0xff] }
 0x47c   : > { %1899 = vst.msk [vmem:[#allocation2] sm:$0xff] %vm693_vm1, %v1883_v0  ;;  %v2344_v49 = vadd.f32 %v7911_v2, %v9064_v29 }
 0x47e   : > { %v6822_v44 = vpop.f32.mrb[52].mxu0 }
 0x47f   : > { %v1601_v12 = vpop.f32.mrb[53].mxu0 }
 0x480   : > { %v6823_v18 = vpop.f32.mrb[54].mxu0 }
 0x481   : > { %v1886_v43 = vpack.c.bf16 %v6823_v18, %v6822_v44  ;;  %v1604_v16 = vpop.f32.mrb[55].mxu0  ;;  %v9082_v44 = vld [vmem:[%s11515_s5 + $0x58] sm:$0xff] }
 0x482   : > { %v1885_v20 = vpack.c.bf16 %v1604_v16, %v1601_v12  ;;  %v7912_v12 = vld [vmem:[%s11516_s6 + $0x8] sm:$0xff] }
 0x483   : > { %1902 = vst.msk [vmem:[#allocation2 + $0x18] sm:$0xff] %vm693_vm1, %v1886_v43  ;;  %v2345_v18 = vadd.f32 %v7912_v12, %v9073_v10 }
 0x484   : > { %1901 = vst.msk [vmem:[#allocation2 + $0x10] sm:$0xff] %vm693_vm1, %v1885_v20 }
 0x48e   : > { %v6834_v31 = vpop.f32.mrb[56].mxu0 }
 0x48f   : > { %v1674_v50 = vpop.f32.mrb[57].mxu0 }
 0x490   : > { %v6835_v54 = vpop.f32.mrb[58].mxu0 }
 0x491   : > { %v1888_v11 = vpack.c.bf16 %v6835_v54, %v6834_v31  ;;  %v1677_v35 = vpop.f32.mrb[59].mxu0 }
 0x492   : > { %v1887_v21 = vpack.c.bf16 %v1677_v35, %v1674_v50  ;;  %v7913_v50 = vld [vmem:[%s11516_s6 + $0x18] sm:$0xff] }
 0x493   : > { %1904 = vst.msk [vmem:[#allocation2 + $0x28] sm:$0xff] %vm693_vm1, %v1888_v11  ;;  %v2347_v54 = vadd.f32 %v7913_v50, %v9082_v44 }
 0x494   : > { %1903 = vst.msk [vmem:[#allocation2 + $0x20] sm:$0xff] %vm693_vm1, %v1887_v21 }
 0x496   : > { %v6838_v22 = vpop.f32.mrb[60].mxu0 }
 0x497   : > { %v1690_v40 = vpop.f32.mrb[61].mxu0 }
 0x498   : > { %v6839_v34 = vpop.f32.mrb[62].mxu0 }
 0x499   : > { %v1890_v45 = vpack.c.bf16 %v6839_v34, %v6838_v22  ;;  %v1693_v60 = vpop.f32.mrb[63].mxu0 }
 0x49a   : > { %v1889_v56 = vpack.c.bf16 %v1693_v60, %v1690_v40  ;;  %v9111_v60 = vld [vmem:[%s11515_s5 + $0x70] sm:$0xff] }
 0x49b   : > { %1906 = vst.msk [vmem:[#allocation2 + $0x38] sm:$0xff] %vm693_vm1, %v1890_v45 }
 0x49c   : > { %1905 = vst.msk [vmem:[#allocation2 + $0x30] sm:$0xff] %vm693_vm1, %v1889_v56  ;;  %v9116_v56 = vld [vmem:[%s11515_s5 + $0x60] sm:$0xff] }
 0x49e   : > { %v6850_v26 = vpop.f32.mrb[16].mxu1 }
 0x49f   : > { %v1763_v5 = vpop.f32.mrb[17].mxu1 }
 0x4a0   : > { %v6851_v53 = vpop.f32.mrb[18].mxu1 }
 0x4a1   : > { %v1892_v6 = vpack.c.bf16 %v6851_v53, %v6850_v26  ;;  %v1766_v55 = vpop.f32.mrb[19].mxu1  ;;  %v9121_v26 = vld [vmem:[%s11515_s5 + $0x78] sm:$0xff] }
 0x4a2   : > { %v1891_v19 = vpack.c.bf16 %v1766_v55, %v1763_v5  ;;  %v7914_v5 = vld [vmem:[%s11516_s6 + $0x30] sm:$0xff] }
 0x4a3   : > { %1908 = vst.msk [vmem:[#allocation2 + $0x48] sm:$0xff] %vm693_vm1, %v1892_v6  ;;  %v2350_v53 = vadd.f32 %v7914_v5, %v9111_v60  ;;  %v9130_v6 = vld [vmem:[%s11515_s5 + $0x68] sm:$0xff] }
 0x4a4   : > { %1907 = vst.msk [vmem:[#allocation2 + $0x40] sm:$0xff] %vm693_vm1, %v1891_v19  ;;  %v7915_v19 = vld [vmem:[%s11516_s6 + $0x20] sm:$0xff] }
 0x4a6   : > { %v6854_v61 = vpop.f32.mrb[20].mxu1 }
 0x4a7   : > { %v1779_v32 = vpop.f32.mrb[21].mxu1 }
 0x4a8   : > { %v6855_v28 = vpop.f32.mrb[22].mxu1 }
 0x4a9   : > { %v1894_v15 = vpack.c.bf16 %v6855_v28, %v6854_v61  ;;  %v1782_v30 = vpop.f32.mrb[23].mxu1  ;;  %v2348_v61 = vadd.f32 %v7915_v19, %v9116_v56  ;;  %v7921_v19 = vld [vmem:[%s11516_s6 + $0x48] sm:$0xff] }
 0x4aa   : > { %v1893_v8 = vpack.c.bf16 %v1782_v30, %v1779_v32  ;;  %v7916_v32 = vld [vmem:[%s11516_s6 + $0x38] sm:$0xff] }
 0x4ab   : > { %1910 = vst.msk [vmem:[#allocation2 + $0x58] sm:$0xff] %vm693_vm1, %v1894_v15  ;;  %v2351_v28 = vadd.f32 %v7916_v32, %v9121_v26 }
 0x4ac   : > { %1909 = vst.msk [vmem:[#allocation2 + $0x50] sm:$0xff] %vm693_vm1, %v1893_v8 }
 0x4ae   : > { %v6866_v33 = vpop.f32.mrb[64].mxu0 }
 0x4af   : > { %v1852_v62 = vpop.f32.mrb[65].mxu0 }
 0x4b0   : > { %v6867_v46 = vpop.f32.mrb[66].mxu0 }
 0x4b1   : > { %v1896_v42 = vpack.c.bf16 %v6867_v46, %v6866_v33  ;;  %v1855_v63 = vpop.f32.mrb[67].mxu0  ;;  %v7917_v46 = vld [vmem:[%s11516_s6 + $0x28] sm:$0xff] }
 0x4b2   : > { %v1895_v51 = vpack.c.bf16 %v1855_v63, %v1852_v62 }
 0x4b3   : > { %1912 = vst.msk [vmem:[#allocation2 + $0x68] sm:$0xff] %vm693_vm1, %v1896_v42  ;;  %v2349_v42 = vadd.f32 %v7917_v46, %v9130_v6 }
 0x4b4   : > { %1911 = vst.msk [vmem:[#allocation2 + $0x60] sm:$0xff] %vm693_vm1, %v1895_v51 }
 0x4be   : > { %v6882_v0 = vpop.f32.mrb[24].mxu1 }
 0x4bf   : > { %v9088_v43 = vadd.f32 %v6882_v0, %v2346_v52  ;;  %v1989_v16 = vpop.f32.mrb[25].mxu1 }
 0x4c0   : > { %v6883_v20 = vpop.f32.mrb[26].mxu1  ;;  %v9090_v31 = vadd.f32 %v2344_v49, %v1989_v16 }
 0x4c1   : > { %v1992_v11 = vpop.f32.mrb[27].mxu1  ;;  %v2414_v35 = vsel %vm1158_vm2, %v9088_v43, -inf  ;;  %v9102_v40 = vadd.f32 %v6883_v20, %v2347_v54  ;;  %v7919_v54 = vld [vmem:[%s11516_s6 + $0x58] sm:$0xff] }
 0x4c2   : > { %v9098_v21 = vadd.f32 %v2345_v18, %v1992_v11  ;;  %2415 = vmax.xlane.f32.xlu0 %v2414_v35  ;;  %v2408_v34 = vsel %vm1158_vm2, %v9090_v31, -inf  ;;  %v7918_v18 = vld [vmem:[%s11516_s6 + $0x50] sm:$0xff]  ;;  %v2355_v11 = vadd.f32 %v7919_v54, %v9082_v44  ;;  %v7924_v54 = vld [vmem:[%s11516_s6 + $0x60] sm:$0xff] }
 0x4c3   : > { %v2417_v45 = vsel %vm1158_vm2, %v9102_v40, -inf  ;;  %v2354_v16 = vadd.f32 %v7918_v18, %v9059_v1 }
 0x4c4   : > { %v2411_v22 = vsel %vm1158_vm2, %v9098_v21, -inf }
 0x4c5   : > { %2412 = vmax.xlane.f32.xlu1 %v2411_v22  ;;  %v7920_v22 = vld [vmem:[%s11516_s6 + $0x40] sm:$0xff] }
 0x4c6   : > { %2409 = vmax.xlane.f32.xlu0 %v2408_v34  ;;  %v2352_v34 = vadd.f32 %v7920_v22, %v9064_v29 }
 0x4ca   : > { %2418 = vmax.xlane.f32.xlu0 %v2417_v45 }
 0x4e7   : > { %v6870_v55 = vpop.f32.mrb[68].mxu0 }
 0x4e8   : > { %v1868_v15 = vpop.f32.mrb[69].mxu0  ;;  %v6886_v30 = vpop.f32.mrb[28].mxu1 }
 0x4e9   : > { %v9140_v8 = vadd.f32 %v6886_v30, %v2350_v53  ;;  %v6871_v33 = vpop.f32.mrb[70].mxu0  ;;  %v2005_v62 = vpop.f32.mrb[29].mxu1 }
 0x4ea   : > { %v1898_v63 = vpack.c.bf16 %v6871_v33, %v6870_v55  ;;  %v1871_v51 = vpop.f32.mrb[71].mxu0  ;;  %v6887_v59 = vpop.f32.mrb[30].mxu1  ;;  %v9146_v52 = vadd.f32 %v2348_v61, %v2005_v62  ;;  %v2353_v61 = vadd.f32 %v7921_v19, %v9073_v10 }
 0x4eb   : > { %v1897_v2 = vpack.c.bf16 %v1871_v51, %v1868_v15  ;;  %v9148_v49 = vadd.f32 %v6887_v59, %v2351_v28  ;;  %v2008_v0 = vpop.f32.mrb[31].mxu1  ;;  %v2426_v12 = vsel %vm1158_vm2, %v9140_v8, -inf }
 0x4ec   : > { %1914 = vst.msk [vmem:[#allocation2 + $0x78] sm:$0xff] %vm693_vm1, %v1898_v63  ;;  %2427 = vmax.xlane.f32.xlu1 %v2426_v12  ;;  %v9158_v20 = vadd.f32 %v2349_v42, %v2008_v0  ;;  %v2420_v45 = vsel %vm1158_vm2, %v9146_v52, -inf  ;;  %v7922_v63 = vld [vmem:[%s11516_s6 + $0x70] sm:$0xff]  ;;  %v7923_v12 = vld [vmem:[%s11516_s6 + $0x78] sm:$0xff] }
 0x4ed   : > { %1913 = vst.msk [vmem:[#allocation2 + $0x70] sm:$0xff] %vm693_vm1, %v1897_v2  ;;  %v2429_v50 = vsel %vm1158_vm2, %v9148_v49, -inf  ;;  %v2358_v51 = vadd.f32 %v7922_v63, %v9111_v60  ;;  %v2359_v18 = vadd.f32 %v7923_v12, %v9121_v26 }
 0x4ee   : > { %2430 = vmax.xlane.f32.xlu0 %v2429_v50  ;;  %v2423_v32 = vsel %vm1158_vm2, %v9158_v20, -inf }
 0x4ef   : > { %v6898_v35 = vpop.f32.mrb[72].mxu0 }
 0x4f0   : > { %v9172_v5 = vadd.f32 %v6898_v35, %v2354_v16  ;;  %v2094_v53 = vpop.f32.mrb[73].mxu0  ;;  %2421 = vmax.xlane.f32.xlu1 %v2420_v45 }
 0x4f1   : > { %v6899_v55 = vpop.f32.mrb[74].mxu0  ;;  %v9184_v33 = vadd.f32 %v2352_v34, %v2094_v53  ;;  %v7925_v53 = vld [vmem:[%s11516_s6 + $0x68] sm:$0xff] }
 0x4f2   : > { %v9180_v28 = vadd.f32 %v6899_v55, %v2355_v11  ;;  %v2097_v15 = vpop.f32.mrb[75].mxu0  ;;  %2424 = vmax.xlane.f32.xlu0 %v2423_v32  ;;  %v2438_v30 = vsel %vm1158_vm2, %v9172_v5, -inf  ;;  %v2356_v11 = vadd.f32 %v7924_v54, %v9116_v56  ;;  %v2357_v55 = vadd.f32 %v7925_v53, %v9130_v6 }
 0x4f3   : > { %v6914_v62 = vpop.f32.mrb[32].mxu1  ;;  %v9192_v59 = vadd.f32 %v2353_v61, %v2097_v15  ;;  %v2432_v50 = vsel %vm1158_vm2, %v9184_v33, -inf  ;;  %v7926_v15 = vld [vmem:[%s11516_s6 + $0x90] sm:$0xff] }
 0x4f4   : > { %2439 = vmax.xlane.f32.xlu1 %v2438_v30  ;;  %v2199_v46 = vpop.f32.mrb[33].mxu1  ;;  %v2441_v42 = vsel %vm1158_vm2, %v9180_v28, -inf  ;;  %v2362_v30 = vadd.f32 %v7926_v15, %v9059_v1  ;;  %v7930_v15 = vld [vmem:[%s11516_s6 + $0xb0] sm:$0xff] }
 0x4f5   : > { %v6915_v2 = vpop.f32.mrb[34].mxu1  ;;  %v2435_v45 = vsel %vm1158_vm2, %v9192_v59, -inf }
 0x4f6   : > { %2442 = vmax.xlane.f32.xlu0 %v2441_v42  ;;  %v2202_v0 = vpop.f32.mrb[35].mxu1 }
 0x4f7   : > { %v6902_v16 = vpop.f32.mrb[76].mxu0 }
 0x4f8   : > { %v9204_v35 = vadd.f32 %v6902_v16, %v2358_v51  ;;  %2433 = vmax.xlane.f32.xlu1 %v2432_v50  ;;  %v2110_v22 = vpop.f32.mrb[77].mxu0  ;;  %v7927_v51 = vld [vmem:[%s11516_s6 + $0x98] sm:$0xff]  ;;  %v9230_v16 = vadd.f32 %v6914_v62, %v2362_v30  ;;  %v7928_v50 = vld [vmem:[%s11516_s6 + $0x80] sm:$0xff] }
 0x4f9   : > { %v6903_v34 = vpop.f32.mrb[78].mxu0  ;;  %v9220_v42 = vadd.f32 %v2356_v11, %v2110_v22  ;;  %v2363_v12 = vadd.f32 %v7927_v51, %v9082_v44  ;;  %v2360_v54 = vadd.f32 %v7928_v50, %v9064_v29 }
 0x4fa   : > { %v9212_v19 = vadd.f32 %v6903_v34, %v2359_v18  ;;  %2436 = vmax.xlane.f32.xlu0 %v2435_v45  ;;  %v2113_v61 = vpop.f32.mrb[79].mxu0  ;;  %v2450_v32 = vsel %vm1158_vm2, %v9204_v35, -inf  ;;  %v7929_v45 = vld [vmem:[%s11516_s6 + $0x88] sm:$0xff] }
 0x4fb   : > { %v9228_v18 = vadd.f32 %v2357_v55, %v2113_v61  ;;  %v2444_v11 = vsel %vm1158_vm2, %v9220_v42, -inf  ;;  %v9238_v34 = vadd.f32 %v6915_v2, %v2363_v12  ;;  %v2361_v62 = vadd.f32 %v7929_v45, %v9073_v10  ;;  %v7931_v12 = vld [vmem:[%s11516_s6 + $0xb8] sm:$0xff] }
 0x4fc   : > { %2451 = vmax.xlane.f32.xlu1 %v2450_v32  ;;  %v2453_v63 = vsel %vm1158_vm2, %v9212_v19, -inf  ;;  %v9246_v32 = vadd.f32 %v2360_v54, %v2199_v46  ;;  %v2366_v2 = vadd.f32 %v7930_v15, %v9111_v60  ;;  %v2367_v46 = vadd.f32 %v7931_v12, %v9121_v26 }
 0x4fd   : > { %v2447_v55 = vsel %vm1158_vm2, %v9228_v18, -inf  ;;  %v9254_v51 = vadd.f32 %v2361_v62, %v2202_v0  ;;  %v2465_v50 = vsel %vm1158_vm2, %v9238_v34, -inf }
 0x4fe   : > { %2454 = vmax.xlane.f32.xlu0 %v2453_v63  ;;  %v2462_v63 = vsel %vm1158_vm2, %v9230_v16, -inf  ;;  %v2456_v0 = vsel %vm1158_vm2, %v9246_v32, -inf }
 0x500   : > { %2445 = vmax.xlane.f32.xlu1 %v2444_v11  ;;  %v6918_v22 = vpop.f32.mrb[36].mxu1  ;;  %v7932_v11 = vld [vmem:[%s11516_s6 + $0xa0] sm:$0xff] }
 0x501   : > { %v2215_v53 = vpop.f32.mrb[37].mxu1  ;;  %v9262_v54 = vadd.f32 %v6918_v22, %v2366_v2  ;;  %v2364_v45 = vadd.f32 %v7932_v11, %v9116_v56  ;;  %v2459_v22 = vsel %vm1158_vm2, %v9254_v51, -inf }
 0x502   : > { %2448 = vmax.xlane.f32.xlu0 %v2447_v55  ;;  %v6919_v61 = vpop.f32.mrb[38].mxu1  ;;  %v7933_v55 = vld [vmem:[%s11516_s6 + $0xa8] sm:$0xff] }
 0x503   : > { %v2218_v30 = vpop.f32.mrb[39].mxu1  ;;  %v9270_v62 = vadd.f32 %v6919_v61, %v2367_v46  ;;  %v2365_v15 = vadd.f32 %v7933_v55, %v9130_v6  ;;  %v9278_v2 = vadd.f32 %v2364_v45, %v2215_v53  ;;  %v7934_v61 = vld [vmem:[%s11516_s6 + $0xd0] sm:$0xff]  ;;  %v7935_v53 = vld [vmem:[%s11516_s6 + $0xd8] sm:$0xff] }
 0x504   : > { %2463 = vmax.xlane.f32.xlu1 %v2462_v63  ;;  %v2474_v63 = vsel %vm1158_vm2, %v9262_v54, -inf  ;;  %v2370_v12 = vadd.f32 %v7934_v61, %v9059_v1  ;;  %v2371_v11 = vadd.f32 %v7935_v53, %v9082_v44 }
 0x505   : > { %v9286_v46 = vadd.f32 %v2365_v15, %v2218_v30  ;;  %v2468_v1 = vsel %vm1158_vm2, %v9278_v2, -inf }
 0x506   : > { %2466 = vmax.xlane.f32.xlu0 %v2465_v50  ;;  %v2477_v50 = vsel %vm1158_vm2, %v9270_v62, -inf }
 0x507   : > { %v2471_v61 = vsel %vm1158_vm2, %v9286_v46, -inf }
 0x508   : > { %2457 = vmax.xlane.f32.xlu1 %v2456_v0  ;;  %v7936_v0 = vld [vmem:[%s11516_s6 + $0xc0] sm:$0xff] }
 0x509   : > { %v2368_v55 = vadd.f32 %v7936_v0, %v9064_v29 }
 0x50a   : > { %2460 = vmax.xlane.f32.xlu0 %v2459_v22 }
 0x50c   : > { %2475 = vmax.xlane.f32.xlu1 %v2474_v63  ;;  %v7937_v63 = vld [vmem:[%s11516_s6 + $0xc8] sm:$0xff] }
 0x50d   : > { %v2369_v44 = vadd.f32 %v7937_v63, %v9073_v10 }
 0x50e   : > { %2478 = vmax.xlane.f32.xlu0 %v2477_v50 }
 0x50f   : > { %v6930_v45 = vpop.f32.mrb[80].mxu0 }
 0x510   : > { %v9300_v30 = vadd.f32 %v6930_v45, %v2370_v12  ;;  %v2304_v15 = vpop.f32.mrb[81].mxu0  ;;  %2469 = vmax.xlane.f32.xlu1 %v2468_v1  ;;  %v7938_v45 = vld [vmem:[%s11516_s6 + $0xf0] sm:$0xff] }
 0x511   : > { %v6931_v22 = vpop.f32.mrb[82].mxu0  ;;  %v9310_v53 = vadd.f32 %v2368_v55, %v2304_v15  ;;  %v2374_v0 = vadd.f32 %v7938_v45, %v9111_v60  ;;  %v7939_v55 = vld [vmem:[%s11516_s6 + $0xf8] sm:$0xff] }
 0x512   : > { %v9308_v50 = vadd.f32 %v6931_v22, %v2371_v11  ;;  %v2307_v29 = vpop.f32.mrb[83].mxu0  ;;  %2472 = vmax.xlane.f32.xlu0 %v2471_v61  ;;  %v2486_v12 = vsel %vm1158_vm2, %v9300_v30, -inf  ;;  %v2375_v1 = vadd.f32 %v7939_v55, %v9121_v26  ;;  %v7940_v22 = vld [vmem:[%s11516_s6 + $0xe0] sm:$0xff]  ;;  %v9342_v55 = vpop.permute.xlu0 %2960 }
 0x513   : > { %v9318_v10 = vadd.f32 %v2369_v44, %v2307_v29  ;;  %v2372_v63 = vadd.f32 %v7940_v22, %v9116_v56  ;;  %v2480_v60 = vsel %vm1158_vm2, %v9310_v53, -inf }
 0x514   : > { %2487 = vmax.xlane.f32.xlu1 %v2486_v12  ;;  %v2489_v11 = vsel %vm1158_vm2, %v9308_v50, -inf  ;;  %v7941_v12 = vld [vmem:[%s11516_s6 + $0xe8] sm:$0xff] }
 0x515   : > { %v2373_v26 = vadd.f32 %v7941_v12, %v9130_v6  ;;  %v2483_v45 = vsel %vm1158_vm2, %v9318_v10, -inf }
 0x516   : > { %2490 = vmax.xlane.f32.xlu0 %v2489_v11 }
 0x517   : > { %v6934_v15 = vpop.f32.mrb[84].mxu0 }
 0x518   : > { %v9332_v44 = vadd.f32 %v6934_v15, %v2374_v0  ;;  %v2320_v61 = vpop.f32.mrb[85].mxu0  ;;  %2481 = vmax.xlane.f32.xlu1 %v2480_v60  ;;  %v9354_v60 = vpop.permute.xlu0 %3045 }
 0x519   : > { %v6935_v29 = vpop.f32.mrb[86].mxu0  ;;  %v9344_v0 = vadd.f32 %v2372_v63, %v2320_v61  ;;  %11651 = vst [vmem:[#allocation9_spill] sm:$0xff] %v9354_v60 }
 0x51a   : > { %v9340_v11 = vadd.f32 %v6935_v29, %v2375_v1  ;;  %v2323_v56 = vpop.f32.mrb[87].mxu0  ;;  %2484 = vmax.xlane.f32.xlu0 %v2483_v45  ;;  %v2498_v15 = vsel %vm1158_vm2, %v9332_v44, -inf  ;;  %v9366_v45 = vpop.permute.xlu1 %3239 }
 0x51b   : > { %v9348_v22 = vadd.f32 %v2373_v26, %v2323_v56  ;;  %v2492_v1 = vsel %vm1158_vm2, %v9344_v0, -inf  ;;  %11655 = vst [vmem:[#allocation13_spill] sm:$0xff] %v9366_v45 }
 0x51c   : > { %2499 = vmax.xlane.f32.xlu1 %v2498_v15  ;;  %v2501_v6 = vsel %vm1158_vm2, %v9340_v11, -inf  ;;  %v9358_v61 = vpop.permute.xlu0 %3237 }
 0x51d   : > { %v2495_v63 = vsel %vm1158_vm2, %v9348_v22, -inf }
 0x51e   : > { %2502 = vmax.xlane.f32.xlu0 %v2501_v6  ;;  %v9370_v15 = vpop.permute.xlu1 %3342 }
 0x51f   : > { %11657 = vst [vmem:[#allocation11_spill] sm:$0xff] %v9370_v15 }
 0x520   : > { %2493 = vmax.xlane.f32.xlu1 %v2492_v1  ;;  %v9360_v29 = vpop.permute.xlu0 %3047 }
 0x521   : > { %11652 = vst [vmem:[#allocation10_spill] sm:$0xff] %v9360_v29 }
 0x522   : > { %2496 = vmax.xlane.f32.xlu0 %v2495_v63  ;;  %v9374_v1 = vpop.permute.xlu1 %3229 }
 0x523   : > { %11659 = vst [vmem:[#allocation20_spill] sm:$0xff] %v9374_v1 }
 0x524   : > { %v9362_v12 = vpop.permute.xlu0 %3049 }
 0x525   : > { %11653 = vst [vmem:[#allocation12_spill] sm:$0xff] %v9362_v12 }
 0x526   : > { %v9378_v63 = vpop.permute.xlu1 %3447 }
 0x527   : > { %11661 = vst [vmem:[#allocation16_spill] sm:$0xff] %v9378_v63 }
 0x528   : > { %v9364_v26 = vpop.permute.xlu0 %3241 }
 0x529   : > { %11654 = vst [vmem:[#allocation21_spill] sm:$0xff] %v9364_v26 }
 0x52c   : > { %v9368_v56 = vpop.permute.xlu0 %3243 }
 0x52d   : > { %11656 = vst [vmem:[#allocation18_spill] sm:$0xff] %v9368_v56 }
 0x530   : > { %v9372_v6 = vpop.permute.xlu0 %3344 }
 0x531   : > { %11658 = vst [vmem:[#allocation14_spill] sm:$0xff] %v9372_v6 }
 0x534   : > { %v9376_v60 = vpop.permute.xlu0 %3346 }
 0x535   : > { %11660 = vst [vmem:[#allocation15_spill] sm:$0xff] %v9376_v60 }
 0x54f   : > { %v2416_v17 = vpop.xlane.xlu0 %2415 }
 0x550   : > { %v2506_v29 = vsub.f32 %v9088_v43, %v2416_v17 }
 0x552   : > { %v2540_v12 = vmul.f32 1.442695, %v2506_v29  ;;  %v2413_v7 = vpop.xlane.xlu1 %2412 }
 0x553   : > { %v2410_v26 = vpop.xlane.xlu0 %2409  ;;  %v2505_v56 = vsub.f32 %v9098_v21, %v2413_v7 }
 0x554   : > { %7526 = vpow2.f32 %v2540_v12  ;;  %v2504_v45 = vsub.f32 %v9090_v31, %v2410_v26 }
 0x555   : > { %v2538_v1 = vmul.f32 1.442695, %v2505_v56 }
 0x556   : > { %v2536_v15 = vmul.f32 1.442695, %v2504_v45 }
 0x557   : > { %v2419_v36 = vpop.xlane.xlu0 %2418 }
 0x558   : > { %7528 = vpow2.f32 %v2536_v15  ;;  %v2507_v6 = vsub.f32 %v9102_v40, %v2419_v36 }
 0x55a   : > { %v2542_v60 = vmul.f32 1.442695, %v2507_v6 }
 0x55c   : > { %7530 = vpow2.f32 %v2542_v60 }
 0x55d   : > { %7532 = vpow2.f32 %v2538_v1 }
 0x55e   : > { %v9384_v63 = vpop.eup %7526 }
 0x55f   : > { %v2606_v17 = vsel %vm1158_vm2, %v9384_v63, 0.0 }
 0x560   : > { %2607 = vadd.xlane.f32.xlu1 %v2606_v17 }
 0x562   : > { %v9388_v43 = vpop.eup %7528 }
 0x563   : > { %v2600_v7 = vsel %vm1158_vm2, %v9388_v43, 0.0 }
 0x564   : > { %2601 = vadd.xlane.f32.xlu1 %v2600_v7 }
 0x566   : > { %v9392_v31 = vpop.eup %7530 }
 0x567   : > { %v2609_v36 = vsel %vm1158_vm2, %v9392_v31, 0.0  ;;  %v9396_v21 = vpop.eup %7532 }
 0x568   : > { %2610 = vadd.xlane.f32.xlu0 %v2609_v36  ;;  %v2603_v40 = vsel %vm1158_vm2, %v9396_v21, 0.0 }
 0x56c   : > { %2604 = vadd.xlane.f32.xlu0 %v2603_v40 }
 0x579   : > { %v2428_v60 = vpop.xlane.xlu1 %2427 }
 0x57a   : > { %v2510_v29 = vsub.f32 %v9140_v8, %v2428_v60 }
 0x57b   : > { %v2431_v12 = vpop.xlane.xlu0 %2430 }
 0x57c   : > { %v2548_v26 = vmul.f32 1.442695, %v2510_v29  ;;  %v2511_v45 = vsub.f32 %v9148_v49, %v2431_v12 }
 0x57d   : > { %v2422_v56 = vpop.xlane.xlu1 %2421 }
 0x57e   : > { %7534 = vpow2.f32 %v2548_v26  ;;  %v2550_v15 = vmul.f32 1.442695, %v2511_v45  ;;  %v2508_v6 = vsub.f32 %v9146_v52, %v2422_v56 }
 0x57f   : > { %v2425_v1 = vpop.xlane.xlu0 %2424 }
 0x580   : > { %7536 = vpow2.f32 %v2550_v15  ;;  %v2544_v17 = vmul.f32 1.442695, %v2508_v6  ;;  %v2509_v7 = vsub.f32 %v9158_v20, %v2425_v1 }
 0x581   : > { %v2440_v36 = vpop.xlane.xlu1 %2439 }
 0x582   : > { %7538 = vpow2.f32 %v2544_v17  ;;  %v2546_v40 = vmul.f32 1.442695, %v2509_v7  ;;  %v2514_v58 = vsub.f32 %v9172_v5, %v2440_v36 }
 0x583   : > { %v2443_v8 = vpop.xlane.xlu0 %2442 }
 0x584   : > { %7540 = vpow2.f32 %v2546_v40  ;;  %v2556_v60 = vmul.f32 1.442695, %v2514_v58  ;;  %v2515_v49 = vsub.f32 %v9180_v28, %v2443_v8 }
 0x585   : > { %v2434_v29 = vpop.xlane.xlu1 %2433 }
 0x586   : > { %7542 = vpow2.f32 %v2556_v60  ;;  %v2512_v12 = vsub.f32 %v9184_v33, %v2434_v29  ;;  %v2558_v45 = vmul.f32 1.442695, %v2515_v49 }
 0x587   : > { %v2437_v52 = vpop.xlane.xlu0 %2436 }
 0x588   : > { %v9407_v26 = vpop.eup %7534  ;;  %v2552_v56 = vmul.f32 1.442695, %v2512_v12  ;;  %v2513_v20 = vsub.f32 %v9192_v59, %v2437_v52 }
 0x589   : > { %v2452_v15 = vpop.xlane.xlu1 %2451  ;;  %v2618_v5 = vsel %vm1158_vm2, %v9407_v26, 0.0 }
 0x58a   : > { %v9412_v6 = vpop.eup %7536  ;;  %7544 = vpow2.f32 %v2552_v56  ;;  %2619 = vadd.xlane.f32.xlu0 %v2618_v5  ;;  %v2554_v58 = vmul.f32 1.442695, %v2513_v20  ;;  %v2518_v28 = vsub.f32 %v9204_v35, %v2452_v15 }
 0x58b   : > { %v2455_v1 = vpop.xlane.xlu0 %2454  ;;  %7546 = vpow2.f32 %v2558_v45  ;;  %v2621_v36 = vsel %vm1158_vm2, %v9412_v6, 0.0 }
 0x58c   : > { %v9415_v33 = vpop.eup %7538  ;;  %v2519_v17 = vsub.f32 %v9212_v19, %v2455_v1  ;;  %7548 = vpow2.f32 %v2554_v58  ;;  %v2564_v35 = vmul.f32 1.442695, %v2518_v28 }
 0x58d   : > { %v2446_v7 = vpop.xlane.xlu1 %2445  ;;  %v2612_v59 = vsel %vm1158_vm2, %v9415_v33, 0.0 }
 0x58e   : > { %v9422_v40 = vpop.eup %7540  ;;  %v2566_v8 = vmul.f32 1.442695, %v2519_v17  ;;  %2613 = vadd.xlane.f32.xlu1 %v2612_v59  ;;  %2622 = vadd.xlane.f32.xlu0 %v2621_v36  ;;  %v2516_v19 = vsub.f32 %v9220_v42, %v2446_v7 }
 0x58f   : > { %v2449_v60 = vpop.xlane.xlu0 %2448  ;;  %v2615_v45 = vsel %vm1158_vm2, %v9422_v40, 0.0 }
 0x590   : > { %v9424_v49 = vpop.eup %7542  ;;  %7550 = vpow2.f32 %v2566_v8  ;;  %v2517_v29 = vsub.f32 %v9228_v18, %v2449_v60  ;;  %v2560_v58 = vmul.f32 1.442695, %v2516_v19 }
 0x591   : > { %v2464_v12 = vpop.xlane.xlu1 %2463  ;;  %v2630_v52 = vsel %vm1158_vm2, %v9424_v49, 0.0  ;;  %7552 = vpow2.f32 %v2564_v35 }
 0x592   : > { %v2562_v56 = vmul.f32 1.442695, %v2517_v29  ;;  %v2522_v20 = vsub.f32 %v9230_v16, %v2464_v12  ;;  %2631 = vadd.xlane.f32.xlu1 %v2630_v52  ;;  %2616 = vadd.xlane.f32.xlu0 %v2615_v45 }
 0x593   : > { %v2467_v15 = vpop.xlane.xlu0 %2466 }
 0x594   : > { %v9433_v5 = vpop.eup %7544  ;;  %7554 = vpow2.f32 %v2562_v56  ;;  %v2572_v42 = vmul.f32 1.442695, %v2522_v20  ;;  %v2523_v7 = vsub.f32 %v9238_v34, %v2467_v15 }
 0x595   : > { %v2458_v18 = vpop.xlane.xlu1 %2457  ;;  %v2624_v28 = vsel %vm1158_vm2, %v9433_v5, 0.0  ;;  %v9437_v1 = vpop.eup %7546 }
 0x596   : > { %7556 = vpow2.f32 %v2572_v42  ;;  %v2520_v17 = vsub.f32 %v9246_v32, %v2458_v18  ;;  %2625 = vadd.xlane.f32.xlu0 %v2624_v28  ;;  %v9442_v8 = vpop.eup %7548  ;;  %v2633_v60 = vsel %vm1158_vm2, %v9437_v1, 0.0  ;;  %v2574_v52 = vmul.f32 1.442695, %v2523_v7 }
 0x597   : > { %v2461_v16 = vpop.xlane.xlu0 %2460  ;;  %7558 = vpow2.f32 %v2560_v58  ;;  %v2627_v20 = vsel %vm1158_vm2, %v9442_v8, 0.0 }
 0x598   : > { %v2568_v59 = vmul.f32 1.442695, %v2520_v17  ;;  %v2521_v36 = vsub.f32 %v9254_v51, %v2461_v16 }
 0x599   : > { %v2476_v35 = vpop.xlane.xlu1 %2475 }
 0x59a   : > { %v9446_v19 = vpop.eup %7550  ;;  %v2570_v29 = vmul.f32 1.442695, %v2521_v36  ;;  %v2526_v12 = vsub.f32 %v9262_v54, %v2476_v35  ;;  %2634 = vadd.xlane.f32.xlu0 %v2633_v60  ;;  %7560 = vpow2.f32 %v2568_v59 }
 0x59b   : > { %v2479_v32 = vpop.xlane.xlu0 %2478  ;;  %v2645_v34 = vsel %vm1158_vm2, %v9446_v19, 0.0  ;;  %v9451_v45 = vpop.eup %7552 }
 0x59c   : > { %7562 = vpow2.f32 %v2570_v29  ;;  %v2580_v51 = vmul.f32 1.442695, %v2526_v12  ;;  %2646 = vadd.xlane.f32.xlu1 %v2645_v34  ;;  %v2527_v58 = vsub.f32 %v9270_v62, %v2479_v32  ;;  %v2642_v59 = vsel %vm1158_vm2, %v9451_v45, 0.0 }
 0x59d   : > { %v2470_v56 = vpop.xlane.xlu1 %2469 }
 0x59e   : > { %v9455_v15 = vpop.eup %7554  ;;  %7564 = vpow2.f32 %v2580_v51  ;;  %v2524_v54 = vsub.f32 %v9278_v2, %v2470_v56  ;;  %2628 = vadd.xlane.f32.xlu0 %v2627_v20  ;;  %v2582_v62 = vmul.f32 1.442695, %v2527_v58 }
 0x59f   : > { %v2473_v42 = vpop.xlane.xlu0 %2472  ;;  %v2639_v18 = vsel %vm1158_vm2, %v9455_v15, 0.0  ;;  %7566 = vpow2.f32 %v2574_v52 }
 0x5a0   : > { %v9461_v28 = vpop.eup %7556  ;;  %v2576_v17 = vmul.f32 1.442695, %v2524_v54  ;;  %v2525_v16 = vsub.f32 %v9286_v46, %v2473_v42  ;;  %2640 = vadd.xlane.f32.xlu1 %v2639_v18 }
 0x5a1   : > { %v2488_v7 = vpop.xlane.xlu1 %2487  ;;  %v9466_v36 = vpop.eup %7558  ;;  %v2654_v29 = vsel %vm1158_vm2, %v9461_v28, 0.0 }
 0x5a2   : > { %v2578_v2 = vmul.f32 1.442695, %v2525_v16  ;;  %2643 = vadd.xlane.f32.xlu0 %v2642_v59  ;;  %7568 = vpow2.f32 %v2576_v17  ;;  %v2530_v35 = vsub.f32 %v9300_v30, %v2488_v7  ;;  %v2636_v34 = vsel %vm1158_vm2, %v9466_v36, 0.0 }
 0x5a3   : > { %v2491_v60 = vpop.xlane.xlu0 %2490 }
 0x5a4   : > { %7570 = vpow2.f32 %v2578_v2  ;;  %v2531_v46 = vsub.f32 %v9308_v50, %v2491_v60  ;;  %2655 = vadd.xlane.f32.xlu1 %v2654_v29  ;;  %v9472_v12 = vpop.eup %7560  ;;  %v2588_v30 = vmul.f32 1.442695, %v2530_v35 }
 0x5a5   : > { %v2482_v32 = vpop.xlane.xlu1 %2481  ;;  %7572 = vpow2.f32 %v2582_v62  ;;  %v2648_v42 = vsel %vm1158_vm2, %v9472_v12, 0.0 }
 0x5a6   : > { %v9476_v52 = vpop.eup %7562  ;;  %v2590_v51 = vmul.f32 1.442695, %v2531_v46  ;;  %2637 = vadd.xlane.f32.xlu0 %v2636_v34  ;;  %v2528_v50 = vsub.f32 %v9310_v53, %v2482_v32 }
 0x5a7   : > { %v2485_v56 = vpop.xlane.xlu0 %2484  ;;  %v2651_v20 = vsel %vm1158_vm2, %v9476_v52, 0.0 }
 0x5a8   : > { %v9480_v54 = vpop.eup %7564  ;;  %7574 = vpow2.f32 %v2590_v51  ;;  %v2529_v58 = vsub.f32 %v9318_v10, %v2485_v56  ;;  %2652 = vadd.xlane.f32.xlu1 %v2651_v20  ;;  %v2584_v7 = vmul.f32 1.442695, %v2528_v50 }
 0x5a9   : > { %v9486_v18 = vpop.eup %7566  ;;  %7576 = vpow2.f32 %v2588_v30  ;;  %v2666_v16 = vsel %vm1158_vm2, %v9480_v54, 0.0 }
 0x5aa   : > { %v2586_v17 = vmul.f32 1.442695, %v2529_v58  ;;  %2649 = vadd.xlane.f32.xlu0 %v2648_v42  ;;  %v2657_v53 = vsel %vm1158_vm2, %v9486_v18, 0.0 }
 0x5ab   : > { %v2503_v50 = vpop.xlane.xlu0 %2502 }
 0x5ac   : > { %7578 = vpow2.f32 %v2586_v17  ;;  %2667 = vadd.xlane.f32.xlu1 %v2666_v16  ;;  %v9490_v59 = vpop.eup %7568  ;;  %v2500_v17 = vpop.xlane.xlu1 %2499 }
 0x5ad   : > { %7580 = vpow2.f32 %v2584_v7  ;;  %v2660_v35 = vsel %vm1158_vm2, %v9490_v59, 0.0  ;;  %v2534_v7 = vsub.f32 %v9332_v44, %v2500_v17 }
 0x5ae   : > { %v9494_v10 = vpop.eup %7570  ;;  %2658 = vadd.xlane.f32.xlu0 %v2657_v53 }
 0x5af   : > { %v2663_v2 = vsel %vm1158_vm2, %v9494_v10, 0.0  ;;  %v9498_v62 = vpop.eup %7572  ;;  %v2497_v58 = vpop.xlane.xlu0 %2496 }
 0x5b0   : > { %2664 = vadd.xlane.f32.xlu1 %v2663_v2  ;;  %v2669_v32 = vsel %vm1158_vm2, %v9498_v62, 0.0  ;;  %v2533_v42 = vsub.f32 %v9348_v22, %v2497_v58  ;;  %v2494_v53 = vpop.xlane.xlu1 %2493  ;;  %v2596_v2 = vmul.f32 1.442695, %v2534_v7 }
 0x5b2   : > { %v9502_v60 = vpop.eup %7574  ;;  %2661 = vadd.xlane.f32.xlu0 %v2660_v35  ;;  %v2594_v16 = vmul.f32 1.442695, %v2533_v42  ;;  %v2532_v35 = vsub.f32 %v9344_v0, %v2494_v53 }
 0x5b3   : > { %v2681_v29 = vsel %vm1158_vm2, %v9502_v60, 0.0  ;;  %v9506_v46 = vpop.eup %7576 }
 0x5b4   : > { %2682 = vadd.xlane.f32.xlu1 %v2681_v29  ;;  %v2678_v30 = vsel %vm1158_vm2, %v9506_v46, 0.0  ;;  %7582 = vpow2.f32 %v2594_v16  ;;  %v2535_v29 = vsub.f32 %v9340_v11, %v2503_v50 }
 0x5b5   : > { %7584 = vpow2.f32 %v2596_v2 }
 0x5b6   : > { %v9510_v34 = vpop.eup %7578  ;;  %2670 = vadd.xlane.f32.xlu0 %v2669_v32  ;;  %v2592_v32 = vmul.f32 1.442695, %v2532_v35 }
 0x5b7   : > { %v2675_v51 = vsel %vm1158_vm2, %v9510_v34, 0.0  ;;  %v9516_v56 = vpop.eup %7580 }
 0x5b8   : > { %2676 = vadd.xlane.f32.xlu1 %v2675_v51  ;;  %v2672_v20 = vsel %vm1158_vm2, %v9516_v56, 0.0  ;;  %7586 = vpow2.f32 %v2592_v32 }
 0x5ba   : > { %2679 = vadd.xlane.f32.xlu0 %v2678_v30  ;;  %v2598_v30 = vmul.f32 1.442695, %v2535_v29 }
 0x5bc   : > { %7588 = vpow2.f32 %v2598_v30 }
 0x5be   : > { %2673 = vadd.xlane.f32.xlu0 %v2672_v20  ;;  %v9528_v51 = vpop.eup %7582 }
 0x5bf   : > { %v2687_v22 = vsel %vm1158_vm2, %v9528_v51, 0.0  ;;  %v9532_v20 = vpop.eup %7584 }
 0x5c0   : > { %v2690_v58 = vsel %vm1158_vm2, %v9532_v20, 0.0 }
 0x5c2   : > { %v9536_v0 = vpop.eup %7586 }
 0x5c3   : > { %v2684_v42 = vsel %vm1158_vm2, %v9536_v0, 0.0 }
 0x5c6   : > { %v9540_v17 = vpop.eup %7588 }
 0x5c7   : > { %v2693_v7 = vsel %vm1158_vm2, %v9540_v17, 0.0 }
 0x5c9   : > { %3348 = vrot.lane.b32.xlu1 %v8171_v57, %s8019_s16 }
 0x5d4   : > { %3231 = vrot.lane.b32.xlu0 %v8131_v27, %s8020_s17 }
 0x5ed   : > { %2688 = vadd.xlane.f32.xlu1 %v2687_v22  ;;  %v2608_v44 = vpop.xlane.xlu1 %2607 }
 0x5f1   : > { %v2602_v11 = vpop.xlane.xlu1 %2601 }
 0x5f3   : > { %2691 = vadd.xlane.f32.xlu0 %v2690_v58 }
 0x5f5   : > { %v2611_v50 = vpop.xlane.xlu0 %2610 }
 0x5f6   : > { %7590 = vrcp.f32 %v2611_v50 }
 0x5f7   : > { %2685 = vadd.xlane.f32.xlu0 %v2684_v42  ;;  %7592 = vrcp.f32 %v2602_v11 }
 0x5f8   : > { %7594 = vrcp.f32 %v2608_v44 }
 0x5f9   : > { %v2605_v16 = vpop.xlane.xlu0 %2604 }
 0x5fa   : > { %7596 = vrcp.f32 %v2605_v16  ;;  %v11662_v16 = vld [vmem:[#allocation6_spill] sm:$0xff] }
 0x5fb   : > { %2694 = vadd.xlane.f32.xlu0 %v2693_v7 }
 0x5fe   : > { %3334 = vrot.lane.b32.xlu1 %v8159_v48, %s8020_s17 }
 0x600   : > { %v7591_v53 = vpop.eup %7590 }
 0x601   : > { %v7593_v2 = vpop.eup %7592  ;;  %v2731_v32 = vmul.f32 %v7591_v53, %v9392_v31 }
 0x602   : > { %3552 = vrot.lane.b32.xlu1 %v8209_v25, %s8019_s16  ;;  %v7595_v35 = vpop.eup %7594  ;;  %v2728_v30 = vmul.f32 %v7593_v2, %v9388_v43 }
 0x603   : > { %v2730_v44 = vmul.f32 %v7595_v35, %v9384_v63 }
 0x604   : > { %v7597_v29 = vpop.eup %7596 }
 0x605   : > { %v2729_v22 = vmul.f32 %v7597_v29, %v9396_v21  ;;  %v2761_v11 = vpack.c.bf16 %v2731_v32, %v2730_v44 }
 0x606   : > { %3233 = vrot.lane.b32.xlu1 %v8147_v38, %s8020_s17 }
 0x607   : > { %v2760_v58 = vpack.c.bf16 %v2729_v22, %v2728_v30  ;;  %v11663_v22 = vld [vmem:[#allocation7_spill] sm:$0xff] }
 0x609   : > { %6944 = vmatprep.mubr.msk.bf16.mxu1 %vm1158_vm2, %v2760_v58 }
 0x60a   : > { %6945 = vmatmul.mubr.msk.bf16.vlgmr.msra.gmra.mrb[40].mxu1 %vm1158_vm2, %v2761_v11  ;;  %3453 = vrot.lane.b32.xlu1 %v8195_v13, %s8019_s16 }
 0x60b   : > { %6969 = vmatpush3.bf16.msra.mxu1 %v9029_v23 }
 0x60c   : > { %6970 = vmatprep.subr.bf16.mxu1 %v9034_v9 }
 0x60e   : > { %3439 = vrot.lane.b32.xlu1 %v8185_v4, %s8020_s17 }
 0x60f   : > { %6971 = vmatpush3.bf16.msra.mxu1 %v9034_v9 }
 0x610   : > { %6972 = vmatprep.subr.bf16.mxu1 %v9036_v41 }
 0x611   : > { %3449 = vrot.lane.b32.xlu0 %v8183_v3, %s8019_s16 }
 0x612   : > { %3556 = vrot.lane.b32.xlu1 %v8221_v39, %s8019_s16 }
 0x613   : > { %6973 = vmatpush3.bf16.msra.mxu1 %v9036_v41 }
 0x614   : > { %6974 = vmatprep.subr.bf16.mxu1 %v9342_v55 }
 0x615   : > { %3451 = vrot.lane.b32.xlu0 %v8197_v14, %s8019_s16 }
 0x616   : > { %3340 = vrot.lane.b32.xlu1 %v8171_v57, %s8020_s17 }
 0x617   : > { %6975 = vmatpush3.bf16.msra.mxu1 %v9342_v55  ;;  %v2620_v23 = vpop.xlane.xlu0 %2619 }
 0x618   : > { %7324 = vmatprep.subr.msk.bf16.mxu1 %vm693_vm1, %v9358_v61 }
 0x619   : > { %3336 = vrot.lane.b32.xlu0 %v8157_v47, %s8020_s17 }
 0x61a   : > { %3544 = vrot.lane.b32.xlu1 %v8209_v25, %s8020_s17 }
 0x61b   : > { %v2623_v9 = vpop.xlane.xlu0 %2622  ;;  %v2614_v41 = vpop.xlane.xlu1 %2613 }
 0x61c   : > { %7598 = vrcp.f32 %v2623_v9 }
 0x61d   : > { %3235 = vrot.lane.b32.xlu0 %v8145_v37, %s8020_s17  ;;  %7600 = vrcp.f32 %v2614_v41 }
 0x61e   : > { %3443 = vrot.lane.b32.xlu1 %v8197_v14, %s8020_s17  ;;  %7602 = vrcp.f32 %v2620_v23 }
 0x61f   : > { %v2617_v55 = vpop.xlane.xlu0 %2616  ;;  %v2632_v43 = vpop.xlane.xlu1 %2631 }
 0x620   : > { %7604 = vrcp.f32 %v2617_v55 }
 0x621   : > { %3554 = vrot.lane.b32.xlu0 %v8207_v24, %s8019_s16 }
 0x622   : > { %3548 = vrot.lane.b32.xlu1 %v8221_v39, %s8020_s17 }
 0x623   : > { %v2626_v63 = vpop.xlane.xlu0 %2625 }
 0x625   : > { %3441 = vrot.lane.b32.xlu0 %v8183_v3, %s8020_s17 }
 0x626   : > { %4092 = vrot.lane.b32.xlu1 %v8131_v27, %s8021_s29  ;;  %v7599_v21 = vpop.eup %7598 }
 0x627   : > { %v2635_v31 = vpop.xlane.xlu0 %2634  ;;  %v7601_v50 = vpop.eup %7600  ;;  %v2735_v35 = vmul.f32 %v7599_v21, %v9412_v6 }
 0x628   : > { %7606 = vrcp.f32 %v2635_v31  ;;  %v7603_v7 = vpop.eup %7602  ;;  %v2732_v29 = vmul.f32 %v7601_v50, %v9415_v33 }
 0x629   : > { %v2647_v42 = vpop.xlane.xlu1 %2646  ;;  %3338 = vrot.lane.b32.xlu0 %v11662_v16, %s8020_s17  ;;  %7608 = vrcp.f32 %v2626_v63  ;;  %v2734_v44 = vmul.f32 %v7603_v7, %v9407_v26 }
 0x62a   : > { %4096 = vrot.lane.b32.xlu1 %v8145_v37, %s8021_s29  ;;  %v7605_v53 = vpop.eup %7604  ;;  %7610 = vrcp.f32 %v2632_v43 }
 0x62b   : > { %v2629_v2 = vpop.xlane.xlu0 %2628  ;;  %v2733_v32 = vmul.f32 %v7605_v53, %v9422_v40  ;;  %v2763_v23 = vpack.c.bf16 %v2735_v35, %v2734_v44 }
 0x62c   : > { %7612 = vrcp.f32 %v2629_v2 }
 0x62d   : > { %v2641_v30 = vpop.xlane.xlu1 %2640  ;;  %3558 = vrot.lane.b32.xlu0 %v11663_v22, %s8019_s16  ;;  %v2762_v58 = vpack.c.bf16 %v2733_v32, %v2732_v29  ;;  %v11665_v29 = vld [vmem:[#allocation4_spill] sm:$0xff]  ;;  %s8022_s16 = smov 72  }
 0x62e   : > { %4268 = vrot.lane.b32.xlu1 %v8185_v4, %s8021_s29 }
 0x62f   : > { %v2644_v11 = vpop.xlane.xlu0 %2643  ;;  %6948 = vmatprep.mubr.msk.bf16.mxu1 %vm1158_vm2, %v2762_v58 }
 0x630   : > { %7614 = vrcp.f32 %v2644_v11  ;;  %6949 = vmatmul.mubr.msk.bf16.gmra.mrb[44].mxu1 %vm1158_vm2, %v2763_v23 }
 0x631   : > { %v2656_v6 = vpop.xlane.xlu1 %2655  ;;  %3546 = vrot.lane.b32.xlu0 %v8207_v24, %s8020_s17  ;;  %7616 = vrcp.f32 %v2641_v30  ;;  %v11666_v30 = vld [vmem:[#allocation9_spill] sm:$0xff] }
 0x632   : > { %4270 = vrot.lane.b32.xlu1 %v8183_v3, %s8021_s29  ;;  %v7607_v26 = vpop.eup %7606  ;;  %7618 = vrcp.f32 %v2647_v42 }
 0x633   : > { %v2638_v33 = vpop.xlane.xlu0 %2637  ;;  %v7609_v40 = vpop.eup %7608  ;;  %v2739_v63 = vmul.f32 %v7607_v26, %v9437_v1 }
 0x634   : > { %7620 = vrcp.f32 %v2638_v33  ;;  %v7611_v9 = vpop.eup %7610  ;;  %v2736_v31 = vmul.f32 %v7609_v40, %v9433_v5 }
 0x635   : > { %v2653_v41 = vpop.xlane.xlu1 %2652  ;;  %3445 = vrot.lane.b32.xlu0 %v8195_v13, %s8020_s17  ;;  %v2738_v50 = vmul.f32 %v7611_v9, %v9424_v49 }
 0x636   : > { %v7613_v55 = vpop.eup %7612  ;;  %7622 = vrcp.f32 %v2653_v41  ;;  %4272 = vrot.lane.b32.xlu1 %v8197_v14, %s8021_s29  ;;  %v11667_v41 = vld [vmem:[#allocation10_spill] sm:$0xff] }
 0x637   : > { %v2650_v43 = vpop.xlane.xlu0 %2649  ;;  %v2737_v21 = vmul.f32 %v7613_v55, %v9442_v8  ;;  %v2765_v53 = vpack.c.bf16 %v2739_v63, %v2738_v50  ;;  %v11664_v8 = vld [vmem:[#allocation8_spill] sm:$0xff] }
 0x638   : > { %7624 = vrcp.f32 %v2650_v43 }
 0x639   : > { %v2668_v42 = vpop.xlane.xlu1 %2667  ;;  %3550 = vrot.lane.b32.xlu0 %v11663_v22, %s8020_s17  ;;  %v2764_v7 = vpack.c.bf16 %v2737_v21, %v2736_v31  ;;  %7626 = vrcp.f32 %v2656_v6  ;;  %v11668_v31 = vld [vmem:[#allocation12_spill] sm:$0xff]  ;;  %s8023_s17 = smov 104  }
 0x63a   : > { %4274 = vrot.lane.b32.xlu1 %v8195_v13, %s8021_s29  ;;  %v7615_v1 = vpop.eup %7614 }
 0x63b   : > { %6960 = vmatprep.mubr.msk.bf16.mxu0 %vm1158_vm2, %v2764_v7  ;;  %v2659_v2 = vpop.xlane.xlu0 %2658  ;;  %v7617_v5 = vpop.eup %7616  ;;  %v2742_v44 = vmul.f32 %v7615_v1, %v9451_v45  ;;  %v11669_v1 = vld [vmem:[#allocation11_spill] sm:$0xff] }
 0x63c   : > { %7628 = vrcp.f32 %v2659_v2  ;;  %6961 = vmatmul.mubr.msk.bf16.vlgmr.msra.gmra.mrb[88].mxu0 %vm1158_vm2, %v2765_v53  ;;  %v7619_v49 = vpop.eup %7618  ;;  %v2741_v23 = vmul.f32 %v7617_v5, %v9455_v15 }
 0x63d   : > { %6985 = vmatpush3.bf16.msra.mxu0 %v11664_v8  ;;  %v2665_v35 = vpop.xlane.xlu1 %2664  ;;  %4090 = vrot.lane.b32.xlu0 %v11665_v29, %s8021_s29  ;;  %v2743_v26 = vmul.f32 %v7619_v49, %v9446_v19  ;;  %v11670_v8 = vld [vmem:[#allocation13_spill] sm:$0xff] }
 0x63e   : > { %v7621_v32 = vpop.eup %7620  ;;  %7630 = vrcp.f32 %v2665_v35  ;;  %6986 = vmatprep.subr.bf16.mxu0 %v11666_v30  ;;  %4359 = vrot.lane.b32.xlu1 %v8207_v24, %s8021_s29 }
 0x63f   : > { %v2662_v58 = vpop.xlane.xlu0 %2661  ;;  %v2740_v11 = vmul.f32 %v7621_v32, %v9466_v36  ;;  %v2767_v45 = vpack.c.bf16 %v2743_v26, %v2742_v44  ;;  %v3261_v44 = vsel %vm693_vm1, %v11670_v8, 0 }
 0x640   : > { %v7623_v6 = vpop.eup %7622  ;;  %7632 = vrcp.f32 %v2662_v58 }
 0x641   : > { %6987 = vmatpush3.bf16.msra.mxu0 %v11666_v30  ;;  %v2683_v33 = vpop.xlane.xlu1 %2682  ;;  %4094 = vrot.lane.b32.xlu0 %v8147_v38, %s8021_s29  ;;  %v2766_v40 = vpack.c.bf16 %v2741_v23, %v2740_v11  ;;  %7634 = vrcp.f32 %v2668_v42  ;;  %v2745_v36 = vmul.f32 %v7623_v6, %v9476_v52  ;;  %v11671_v11 = vld [vmem:[#allocation20_spill] sm:$0xff] }
 0x642   : > { %v7625_v9 = vpop.eup %7624  ;;  %6988 = vmatprep.subr.bf16.mxu0 %v11667_v41  ;;  %4363 = vrot.lane.b32.xlu1 %v11663_v22, %s8021_s29 }
 0x643   : > { %6964 = vmatprep.mubr.msk.bf16.mxu0 %vm1158_vm2, %v2766_v40  ;;  %v2671_v15 = vpop.xlane.xlu0 %2670  ;;  %v2744_v19 = vmul.f32 %v7625_v9, %v9472_v12  ;;  %v7627_v55 = vpop.eup %7626 }
 0x644   : > { %7636 = vrcp.f32 %v2671_v15  ;;  %6965 = vmatmul.mubr.msk.bf16.gmra.mrb[92].mxu0 %vm1158_vm2, %v2767_v45  ;;  %v2746_v12 = vmul.f32 %v7627_v55, %v9461_v28  ;;  %v3258_v28 = vsel %vm693_vm1, %v9358_v61, 0 }
 0x645   : > { %6989 = vmatpush3.bf16.msra.mxu0 %v11667_v41  ;;  %4179 = vrot.lane.b32.xlu0 %v8159_v48, %s8021_s29  ;;  %v2768_v63 = vpack.c.bf16 %v2745_v36, %v2744_v19  ;;  %v2677_v21 = vpop.xlane.xlu1 %2676  ;;  %v11675_v19 = vld [vmem:[#allocation16_spill] sm:$0xff]  ;;  %v11676_v36 = vld [vmem:[#allocation15_spill] sm:$0xff] }
 0x646   : > { %v7629_v43 = vpop.eup %7628  ;;  %6990 = vmatprep.subr.bf16.mxu0 %v11668_v31  ;;  %4656 = vrot.lane.b32.xlu1 %v8159_v48, %s8022_s16 }
 0x647   : > { %v2747_v52 = vmul.f32 %v7629_v43, %v9486_v18  ;;  %6976 = vmatprep.mubr.msk.bf16.mxu1 %vm1158_vm2, %v2768_v63  ;;  %v2680_v50 = vpop.xlane.xlu0 %2679  ;;  %v3468_v63 = vsel %vm693_vm1, %v11675_v19, 0  ;;  %v3369_v43 = vsel %vm693_vm1, %v11676_v36, 0 }
 0x648   : > { %v7631_v42 = vpop.eup %7630  ;;  %7638 = vrcp.f32 %v2680_v50 }
 0x649   : > { %v2769_v7 = vpack.c.bf16 %v2747_v52, %v2746_v12  ;;  %6991 = vmatpush3.bf16.msra.mxu0 %v11668_v31  ;;  %4181 = vrot.lane.b32.xlu0 %v8157_v47, %s8021_s29  ;;  %7640 = vrcp.f32 %v2677_v21  ;;  %v2749_v5 = vmul.f32 %v7631_v42, %v9494_v10  ;;  %v3349_v31 = vpop.permute.xlu1 %3348 }
 0x64a   : > { %v7633_v53 = vpop.eup %7632  ;;  %7328 = vmatprep.subr.msk.bf16.mxu0 %vm693_vm1, %v11669_v1  ;;  %4557 = vrot.lane.b32.xlu1 %v8145_v37, %s8022_s16  ;;  %7642 = vrcp.f32 %v2683_v33  ;;  %v3372_v12 = vsel %vm693_vm1, %v3349_v31, 0 }
 0x64b   : > { %6977 = vmatmul.mubr.msk.bf16.vlgmr.msra.gmra.mrb[48].mxu1 %vm1158_vm2, %v2769_v7  ;;  %v2674_v18 = vpop.xlane.xlu0 %2673  ;;  %v2748_v2 = vmul.f32 %v7633_v53, %v9490_v59  ;;  %v7635_v49 = vpop.eup %7634 }
 0x64c   : > { %7001 = vmatpush3.bf16.xpose.msra.mxu1 %v3258_v28  ;;  %7644 = vrcp.f32 %v2674_v18  ;;  %v2750_v61 = vmul.f32 %v7635_v49, %v9480_v54 }
 0x64d   : > { %7325 = vmatprep.subr.msk.bf16.mxu1 %vm693_vm1, %v11670_v8  ;;  %4183 = vrot.lane.b32.xlu0 %v11662_v16, %s8021_s29  ;;  %v2770_v35 = vpack.c.bf16 %v2749_v5, %v2748_v2 }
 0x64e   : > { %v7637_v32 = vpop.eup %7636  ;;  %4543 = vrot.lane.b32.xlu1 %v11665_v29, %s8023_s17 }
 0x64f   : > { %6980 = vmatprep.mubr.msk.bf16.mxu1 %vm1158_vm2, %v2770_v35  ;;  %v2751_v59 = vmul.f32 %v7637_v32, %v9498_v62  ;;  %v11672_v62 = vld [vmem:[#allocation21_spill] sm:$0xff]  ;;  %v3232_v55 = vpop.permute.xlu0 %3231 }
 0x650   : > { %v3264_v45 = vsel %vm693_vm1, %v11672_v62, 0 }
 0x651   : > { %4185 = vrot.lane.b32.xlu0 %v8171_v57, %s8021_s29  ;;  %v2771_v10 = vpack.c.bf16 %v2751_v59, %v2750_v61 }
 0x652   : > { %4660 = vrot.lane.b32.xlu1 %v11662_v16, %s8022_s16  ;;  %v7639_v30 = vpop.eup %7638 }
 0x653   : > { %6981 = vmatmul.mubr.msk.bf16.gmra.mrb[52].mxu1 %vm1158_vm2, %v2771_v10  ;;  %v7641_v58 = vpop.eup %7640  ;;  %v2754_v6 = vmul.f32 %v7639_v30, %v9506_v46  ;;  %v3363_v46 = vsel %vm693_vm1, %v11669_v1, 0 }
 0x654   : > { %7003 = vmatpush3.bf16.xpose.msra.mxu1 %v3261_v44  ;;  %7008 = vmatprep.mubr.msk.bf16.mxu1 %vm693_vm1, %v11671_v11  ;;  %v7643_v54 = vpop.eup %7642  ;;  %v2753_v33 = vmul.f32 %v7641_v58, %v9510_v34 }
 0x655   : > { %7326 = vmatprep.subr.msk.bf16.mxu1 %vm693_vm1, %v11672_v62  ;;  %4357 = vrot.lane.b32.xlu0 %v8209_v25, %s8021_s29  ;;  %v2755_v40 = vmul.f32 %v7643_v54, %v9502_v60  ;;  %v11674_v60 = vld [vmem:[#allocation14_spill] sm:$0xff] }
 0x656   : > { %v7645_v23 = vpop.eup %7644  ;;  %4547 = vrot.lane.b32.xlu1 %v8147_v38, %s8023_s17  ;;  %v3366_v15 = vsel %vm693_vm1, %v11674_v60, 0 }
 0x657   : > { %v2752_v26 = vmul.f32 %v7645_v23, %v9516_v56  ;;  %v2773_v41 = vpack.c.bf16 %v2755_v40, %v2754_v6  ;;  %v11673_v56 = vld [vmem:[#allocation18_spill] sm:$0xff] }
 0x658   : > { %v3267_v34 = vsel %vm693_vm1, %v11673_v56, 0 }
 0x659   : > { %4551 = vrot.lane.b32.xlu0 %v11665_v29, %s8022_s16  ;;  %v2772_v9 = vpack.c.bf16 %v2753_v33, %v2752_v26 }
 0x65b   : > { %6992 = vmatprep.mubr.msk.bf16.mxu0 %vm1158_vm2, %v2772_v9 }
 0x65c   : > { %7005 = vmatpush3.bf16.xpose.msra.mxu1 %v3264_v45  ;;  %6993 = vmatmul.mubr.msk.bf16.vlgmr.msra.gmra.mrb[96].mxu0 %vm1158_vm2, %v2773_v41 }
 0x65d   : > { %7327 = vmatprep.subr.msk.bf16.mxu1 %vm693_vm1, %v11673_v56  ;;  %7017 = vmatpush3.bf16.xpose.msra.mxu0 %v3363_v46 }
 0x65e   : > { %4361 = vrot.lane.b32.xlu0 %v8221_v39, %s8021_s29  ;;  %7329 = vmatprep.subr.msk.bf16.mxu0 %vm693_vm1, %v11674_v60 }
 0x662   : > { %4553 = vrot.lane.b32.xlu0 %v8131_v27, %s8022_s16 }
 0x664   : > { %7007 = vmatpush3.bf16.xpose.msra.mxu1 %v3267_v34 }
 0x665   : > { %7019 = vmatpush3.bf16.xpose.msra.mxu0 %v3366_v15  ;;  %7332 = vmatprep.subr.msk.bf16.mxu1 %vm693_vm1, %v11675_v19 }
 0x666   : > { %4555 = vrot.lane.b32.xlu0 %v8147_v38, %s8022_s16  ;;  %7330 = vmatprep.subr.msk.bf16.mxu0 %vm693_vm1, %v11676_v36 }
 0x66a   : > { %4658 = vrot.lane.b32.xlu0 %v8157_v47, %s8022_s16 }
 0x66b   : > { %7009 = vmatmul.mubr.msk.bf16.vlgmr.msra.gmra.mrb[56].mxu1 %vm693_vm1, %v3232_v55 }
 0x66c   : > { %7033 = vmatpush3.bf16.xpose.msra.mxu1 %v3468_v63 }
 0x66d   : > { %7021 = vmatpush3.bf16.xpose.msra.mxu0 %v3369_v43 }
 0x66e   : > { %4545 = vrot.lane.b32.xlu0 %v8131_v27, %s8023_s17  ;;  %7331 = vmatprep.subr.msk.bf16.mxu0 %vm693_vm1, %v3349_v31 }
 0x672   : > { %4761 = vrot.lane.b32.xlu0 %v8185_v4, %s8022_s16 }
 0x675   : > { %7023 = vmatpush3.bf16.xpose.msra.mxu0 %v3372_v12 }
 0x67a   : > { %v2689_v52 = vpop.xlane.xlu1 %2688 }
 0x67b   : > { %7646 = vrcp.f32 %v2689_v52 }
 0x67e   : > { %v3335_v21 = vpop.permute.xlu1 %3334 }
 0x680   : > { %v2692_v50 = vpop.xlane.xlu0 %2691 }
 0x682   : > { %v3553_v42 = vpop.permute.xlu1 %3552 }
 0x683   : > { %7336 = vmatprep.subr.msk.bf16.mxu0 %vm693_vm1, %v3553_v42  ;;  %v3573_v26 = vsel %vm693_vm1, %v3553_v42, 0 }
 0x684   : > { %v2686_v7 = vpop.xlane.xlu0 %2685 }
 0x685   : > { %7648 = vrcp.f32 %v2686_v7  ;;  %v7647_v2 = vpop.eup %7646 }
 0x686   : > { %v3234_v53 = vpop.permute.xlu1 %3233  ;;  %7650 = vrcp.f32 %v2692_v50  ;;  %v2757_v61 = vmul.f32 %v7647_v2, %v9528_v51 }
 0x687   : > { %7012 = vmatprep.mubr.msk.bf16.mxu1 %vm693_vm1, %v3234_v53 }
 0x688   : > { %v2695_v1 = vpop.xlane.xlu0 %2694 }
 0x689   : > { %7652 = vrcp.f32 %v2695_v1 }
 0x68a   : > { %v3454_v28 = vpop.permute.xlu1 %3453 }
 0x68c   : > { %v3450_v18 = vpop.permute.xlu0 %3449 }
 0x68d   : > { %7333 = vmatprep.subr.msk.bf16.mxu1 %vm693_vm1, %v3450_v18  ;;  %v3471_v5 = vsel %vm693_vm1, %v3450_v18, 0 }
 0x68e   : > { %v3440_v49 = vpop.permute.xlu1 %3439  ;;  %7035 = vmatpush3.bf16.xpose.msra.mxu1 %v3471_v5 }
 0x68f   : > { %v7649_v8 = vpop.eup %7648 }
 0x690   : > { %v3452_v35 = vpop.permute.xlu0 %3451  ;;  %v2756_v32 = vmul.f32 %v7649_v8, %v9536_v0  ;;  %v7651_v59 = vpop.eup %7650 }
 0x691   : > { %7334 = vmatprep.subr.msk.bf16.mxu1 %vm693_vm1, %v3452_v35  ;;  %v2758_v11 = vmul.f32 %v7651_v59, %v9532_v20  ;;  %v3474_v62 = vsel %vm693_vm1, %v3452_v35, 0  ;;  %v3477_v20 = vsel %vm693_vm1, %v3454_v28, 0 }
 0x692   : > { %v2774_v10 = vpack.c.bf16 %v2757_v61, %v2756_v32  ;;  %v3557_v44 = vpop.permute.xlu1 %3556 }
 0x693   : > { %v7653_v30 = vpop.eup %7652  ;;  %v3579_v56 = vsel %vm693_vm1, %v3557_v44, 0 }
 0x694   : > { %6996 = vmatprep.mubr.msk.bf16.mxu0 %vm1158_vm2, %v2774_v10  ;;  %v3337_v58 = vpop.permute.xlu0 %3336  ;;  %v2759_v54 = vmul.f32 %v7653_v30, %v9540_v17 }
 0x696   : > { %7037 = vmatpush3.bf16.xpose.msra.mxu1 %v3474_v62  ;;  %v2775_v23 = vpack.c.bf16 %v2759_v54, %v2758_v11  ;;  %v3341_v0 = vpop.permute.xlu1 %3340 }
 0x697   : > { %7335 = vmatprep.subr.msk.bf16.mxu1 %vm693_vm1, %v3454_v28 }
 0x698   : > { %6997 = vmatmul.mubr.msk.bf16.gmra.mrb[100].mxu0 %vm1158_vm2, %v2775_v23  ;;  %v3236_v51 = vpop.permute.xlu0 %3235 }
 0x699   : > { %7013 = vmatmul.mubr.msk.bf16.gmra.mrb[60].mxu1 %vm693_vm1, %v3236_v51  ;;  %7024 = vmatprep.mubr.msk.bf16.mxu0 %vm693_vm1, %v3335_v21 }
 0x69a   : > { %7040 = vmatprep.mubr.msk.bf16.mxu1 %vm693_vm1, %v3440_v49  ;;  %v3545_v17 = vpop.permute.xlu1 %3544 }
 0x69c   : > { %v3555_v6 = vpop.permute.xlu0 %3554 }
 0x69d   : > { %v3576_v41 = vsel %vm693_vm1, %v3555_v6, 0 }
 0x69e   : > { %7039 = vmatpush3.bf16.xpose.msra.mxu1 %v3477_v20  ;;  %v3444_v9 = vpop.permute.xlu1 %3443 }
 0x6a0   : > { %7025 = vmatmul.mubr.msk.bf16.vlgmr.msra.gmra.mrb[104].mxu0 %vm693_vm1, %v3337_v58  ;;  %v3442_v33 = vpop.permute.xlu0 %3441 }
 0x6a1   : > { %7049 = vmatpush3.bf16.xpose.msra.mxu0 %v3573_v26 }
 0x6a2   : > { %7337 = vmatprep.subr.msk.bf16.mxu0 %vm693_vm1, %v3555_v6  ;;  %v3549_v34 = vpop.permute.xlu1 %3548 }
 0x6a4   : > { %v3339_v40 = vpop.permute.xlu0 %3338 }
 0x6a5   : > { %7028 = vmatprep.mubr.msk.bf16.mxu0 %vm693_vm1, %v3339_v40  ;;  %7041 = vmatmul.mubr.msk.bf16.vlgmr.msra.gmra.mrb[64].mxu1 %vm693_vm1, %v3442_v33 }
 0x6a6   : > { %7044 = vmatprep.mubr.msk.bf16.mxu1 %vm693_vm1, %v3444_v9  ;;  %v4093_v55 = vpop.permute.xlu1 %4092  ;;  %v7945_v9 = vld [vmem:[%s11516_s6 + $0x8] sm:$0xff] }
 0x6a8   : > { %7029 = vmatmul.mubr.msk.bf16.gmra.mrb[108].mxu0 %vm693_vm1, %v3341_v0  ;;  %v3559_v45 = vpop.permute.xlu0 %3558 }
 0x6a9   : > { %7051 = vmatpush3.bf16.xpose.msra.mxu0 %v3576_v41  ;;  %7056 = vmatprep.mubr.msk.bf16.mxu0 %vm693_vm1, %v3545_v17  ;;  %v3582_v19 = vsel %vm693_vm1, %v3559_v45, 0 }
 0x6aa   : > { %7338 = vmatprep.subr.msk.bf16.mxu0 %vm693_vm1, %v3557_v44  ;;  %v4097_v43 = vpop.permute.xlu1 %4096 }
 0x6ac   : > { %v3547_v46 = vpop.permute.xlu0 %3546 }
 0x6ae   : > { %v9766_v52 = vpop.permute.xlu1 %4268 }
 0x6b0   : > { %v3446_v60 = vpop.permute.xlu0 %3445 }
 0x6b1   : > { %7053 = vmatpush3.bf16.xpose.msra.mxu0 %v3579_v56  ;;  %7045 = vmatmul.mubr.msk.bf16.gmra.mrb[68].mxu1 %vm693_vm1, %v3446_v60 }
 0x6b2   : > { %7339 = vmatprep.subr.msk.bf16.mxu0 %vm693_vm1, %v3559_v45 }
 0x6b4   : > { %v3551_v15 = vpop.permute.xlu0 %3550 }
 0x6b8   : > { %v4091_v36 = vpop.permute.xlu0 %4090 }
 0x6b9   : > { %7055 = vmatpush3.bf16.xpose.msra.mxu0 %v3582_v19  ;;  %7064 = vmatprep.subr.bf16.mxu1 %v4091_v36 }
 0x6ba   : > { %7065 = vmatpush3.bf16.msra.mxu1 %v4091_v36 }
 0x6bb   : > { %7066 = vmatprep.subr.bf16.mxu1 %v4093_v55 }
 0x6bc   : > { %v4095_v63 = vpop.permute.xlu0 %4094 }
 0x6be   : > { %7067 = vmatpush3.bf16.msra.mxu1 %v4093_v55  ;;  %v9879_v55 = vld [vmem:[%s11515_s5 + $0x88] sm:$0xff] }
 0x6bf   : > { %7068 = vmatprep.subr.bf16.mxu1 %v4095_v63  ;;  %v3659_v44 = vadd.f32 %v7945_v9, %v9879_v55 }
 0x6c0   : > { %7057 = vmatmul.mubr.msk.bf16.vlgmr.msra.gmra.mrb[112].mxu0 %vm693_vm1, %v3547_v46  ;;  %v4180_v31 = vpop.permute.xlu0 %4179 }
 0x6c1   : > { %7060 = vmatprep.mubr.msk.bf16.mxu0 %vm693_vm1, %v3549_v34  ;;  %7080 = vmatprep.subr.bf16.mxu0 %v4180_v31  ;;  %v7943_v34 = vld [vmem:[%s11516_s6] sm:$0xff] }
 0x6c2   : > { %7069 = vmatpush3.bf16.msra.mxu1 %v4095_v63  ;;  %7081 = vmatpush3.bf16.msra.mxu0 %v4180_v31  ;;  %v9860_v31 = vld [vmem:[%s11515_s5 + $0x90] sm:$0xff] }
 0x6c3   : > { %7070 = vmatprep.subr.bf16.mxu1 %v4097_v43 }
 0x6c4   : > { %v4182_v12 = vpop.permute.xlu0 %4181 }
 0x6c5   : > { %7082 = vmatprep.subr.bf16.mxu0 %v4182_v12 }
 0x6c6   : > { %7071 = vmatpush3.bf16.msra.mxu1 %v4097_v43  ;;  %7083 = vmatpush3.bf16.msra.mxu0 %v4182_v12  ;;  %v9865_v12 = vld [vmem:[%s11515_s5 + $0x80] sm:$0xff]  ;;  %v9874_v43 = vld [vmem:[%s11515_s5 + $0x98] sm:$0xff] }
 0x6c7   : > { %7096 = vmatprep.subr.bf16.mxu1 %v9766_v52  ;;  %v3658_v56 = vadd.f32 %v7943_v34, %v9865_v12 }
 0x6c8   : > { %7061 = vmatmul.mubr.msk.bf16.gmra.mrb[116].mxu0 %vm693_vm1, %v3551_v15  ;;  %v4184_v21 = vpop.permute.xlu0 %4183 }
 0x6c9   : > { %7084 = vmatprep.subr.bf16.mxu0 %v4184_v21 }
 0x6ca   : > { %7085 = vmatpush3.bf16.msra.mxu0 %v4184_v21  ;;  %v7942_v21 = vld [vmem:[%s11516_s6 + $0x10] sm:$0xff] }
 0x6cc   : > { %v4186_v50 = vpop.permute.xlu0 %4185 }
 0x6cd   : > { %7086 = vmatprep.subr.bf16.mxu0 %v4186_v50 }
 0x6ce   : > { %7087 = vmatpush3.bf16.msra.mxu0 %v4186_v50  ;;  %v3660_v50 = vadd.f32 %v7942_v21, %v9860_v31  ;;  %v7944_v21 = vld [vmem:[%s11516_s6 + $0x18] sm:$0xff] }
 0x6cf   : > { %v3661_v51 = vadd.f32 %v7944_v21, %v9874_v43 }
 0x6d0   : > { %v9770_v42 = vpop.permute.xlu0 %4357 }
 0x6d1   : > { %11677 = vst [vmem:[#allocation17_spill] sm:$0xff] %v9770_v42  ;;  %7112 = vmatprep.subr.bf16.mxu0 %v9770_v42 }
 0x6dd   : > { %v9773_v7 = vpop.f32.mrb[40].mxu1 }
 0x6de   : > { %11678 = vst [vmem:[#allocation19_spill] sm:$0xff] %v9773_v7  ;;  %v9775_v53 = vpop.f32.mrb[41].mxu1 }
 0x6df   : > { %11679 = vst [vmem:[#allocation6_spill] sm:$0xff] %v9775_v53  ;;  %v9777_v1 = vpop.f32.mrb[42].mxu1 }
 0x6e0   : > { %11680 = vst [vmem:[#allocation7_spill] sm:$0xff] %v9777_v1  ;;  %v9781_v18 = vpop.f32.mrb[43].mxu1 }
 0x6e1   : > { %11681 = vst [vmem:[#allocation8_spill] sm:$0xff] %v9781_v18 }
 0x703   : > { %v9785_v5 = vpop.f32.mrb[44].mxu1 }
 0x704   : > { %11682 = vst [vmem:[#allocation9_spill] sm:$0xff] %v9785_v5  ;;  %v9787_v49 = vpop.f32.mrb[45].mxu1 }
 0x705   : > { %11683 = vst [vmem:[#allocation10_spill] sm:$0xff] %v9787_v49  ;;  %v9789_v8 = vpop.f32.mrb[46].mxu1  ;;  %v10119_v49 = vpop.permute.xlu1 %4270 }
 0x706   : > { %11684 = vst [vmem:[#allocation12_spill] sm:$0xff] %v9789_v8  ;;  %v9793_v32 = vpop.f32.mrb[47].mxu1 }
 0x707   : > { %11685 = vst [vmem:[#allocation11_spill] sm:$0xff] %v9793_v32 }
 0x70f   : > { %v9797_v59 = vpop.f32.mrb[88].mxu0 }
 0x710   : > { %11686 = vst [vmem:[#allocation13_spill] sm:$0xff] %v9797_v59  ;;  %v9799_v10 = vpop.f32.mrb[89].mxu0 }
 0x711   : > { %11687 = vst [vmem:[#allocation20_spill] sm:$0xff] %v9799_v10  ;;  %v9801_v30 = vpop.f32.mrb[90].mxu0 }
 0x712   : > { %11688 = vst [vmem:[#allocation21_spill] sm:$0xff] %v9801_v30  ;;  %v9805_v58 = vpop.f32.mrb[91].mxu0 }
 0x713   : > { %11689 = vst [vmem:[#allocation18_spill] sm:$0xff] %v9805_v58 }
 0x717   : > { %v9809_v54 = vpop.f32.mrb[92].mxu0 }
 0x718   : > { %11690 = vst [vmem:[#allocation14_spill] sm:$0xff] %v9809_v54  ;;  %v9811_v62 = vpop.f32.mrb[93].mxu0 }
 0x719   : > { %11691 = vst [vmem:[#allocation16_spill] sm:$0xff] %v9811_v62  ;;  %v9813_v23 = vpop.f32.mrb[94].mxu0 }
 0x71a   : > { %11692 = vst [vmem:[#allocation15_spill] sm:$0xff] %v9813_v23  ;;  %v9817_v0 = vpop.f32.mrb[95].mxu0 }
 0x71b   : > { %11693 = vst [vmem:[#allocation22_spill] sm:$0xff] %v9817_v0 }
 0x71e   : > { %v9821_v20 = vpop.f32.mrb[48].mxu1 }
 0x71f   : > { %11694 = vst [vmem:[#allocation23_spill] sm:$0xff] %v9821_v20  ;;  %v9823_v17 = vpop.f32.mrb[49].mxu1 }
 0x720   : > { %11695 = vst [vmem:[#allocation24_spill] sm:$0xff] %v9823_v17  ;;  %v9825_v26 = vpop.f32.mrb[50].mxu1 }
 0x721   : > { %11696 = vst [vmem:[#allocation25_spill] sm:$0xff] %v9825_v26  ;;  %v9829_v40 = vpop.f32.mrb[51].mxu1 }
 0x722   : > { %11697 = vst [vmem:[#allocation26_spill] sm:$0xff] %v9829_v40 }
 0x726   : > { %v9833_v41 = vpop.f32.mrb[52].mxu1 }
 0x727   : > { %11698 = vst [vmem:[#allocation27_spill] sm:$0xff] %v9833_v41  ;;  %v9835_v45 = vpop.f32.mrb[53].mxu1 }
 0x728   : > { %11699 = vst [vmem:[#allocation28_spill] sm:$0xff] %v9835_v45  ;;  %v9837_v46 = vpop.f32.mrb[54].mxu1 }
 0x729   : > { %11700 = vst [vmem:[#allocation29_spill] sm:$0xff] %v9837_v46  ;;  %v9841_v60 = vpop.f32.mrb[55].mxu1 }
 0x72a   : > { %11701 = vst [vmem:[#allocation30_spill] sm:$0xff] %v9841_v60  ;;  %v7949_v60 = vld [vmem:[%s11516_s6 + $0x28] sm:$0xff] }
 0x72f   : > { %v9845_v15 = vpop.f32.mrb[96].mxu0 }
 0x730   : > { %11702 = vst [vmem:[#allocation31_spill] sm:$0xff] %v9845_v15  ;;  %v9847_v19 = vpop.f32.mrb[97].mxu0 }
 0x731   : > { %11703 = vst [vmem:[#allocation32_spill] sm:$0xff] %v9847_v19  ;;  %v9849_v36 = vpop.f32.mrb[98].mxu0 }
 0x732   : > { %11704 = vst [vmem:[#allocation33_spill] sm:$0xff] %v9849_v36  ;;  %v9853_v63 = vpop.f32.mrb[99].mxu0 }
 0x733   : > { %11705 = vst [vmem:[#allocation34_spill] sm:$0xff] %v9853_v63 }
 0x73e   : > { %v7010_v33 = vpop.f32.mrb[56].mxu1 }
 0x73f   : > { %v9893_v6 = vadd.f32 %v7010_v33, %v3660_v50  ;;  %v3303_v35 = vpop.f32.mrb[57].mxu1 }
 0x740   : > { %v9895_v11 = vadd.f32 %v3658_v56, %v3303_v35  ;;  %v7011_v28 = vpop.f32.mrb[58].mxu1  ;;  %v9931_v56 = vld [vmem:[%s11515_s5 + $0xa8] sm:$0xff] }
 0x741   : > { %v3306_v34 = vpop.f32.mrb[59].mxu1  ;;  %v3728_v61 = vsel %vm1158_vm2, %v9893_v6, -inf  ;;  %v9899_v2 = vadd.f32 %v7011_v28, %v3661_v51  ;;  %v9912_v28 = vld [vmem:[%s11515_s5 + $0xb0] sm:$0xff] }
 0x742   : > { %v9901_v19 = vadd.f32 %v3659_v44, %v3306_v34  ;;  %3729 = vmax.xlane.f32.xlu0 %v3728_v61  ;;  %v3722_v21 = vsel %vm1158_vm2, %v9895_v11, -inf  ;;  %v9917_v61 = vld [vmem:[%s11515_s5 + $0xa0] sm:$0xff]  ;;  %v9922_v44 = vld [vmem:[%s11515_s5 + $0xb8] sm:$0xff]  ;;  %v7946_v51 = vld [vmem:[%s11516_s6 + $0x30] sm:$0xff] }
 0x743   : > { %3723 = vmax.xlane.f32.xlu1 %v3722_v21  ;;  %v3731_v35 = vsel %vm1158_vm2, %v9899_v2, -inf  ;;  %v3664_v9 = vadd.f32 %v7946_v51, %v9912_v28  ;;  %v7947_v34 = vld [vmem:[%s11516_s6 + $0x20] sm:$0xff] }
 0x744   : > { %v3725_v33 = vsel %vm1158_vm2, %v9901_v19, -inf  ;;  %v3662_v21 = vadd.f32 %v7947_v34, %v9917_v61  ;;  %v3663_v34 = vadd.f32 %v7949_v60, %v9931_v56  ;;  %v7950_v60 = vld [vmem:[%s11516_s6 + $0x50] sm:$0xff] }
 0x745   : > { %v3668_v41 = vadd.f32 %v7950_v60, %v9860_v31 }
 0x746   : > { %3726 = vmax.xlane.f32.xlu0 %v3725_v33  ;;  %v7948_v33 = vld [vmem:[%s11516_s6 + $0x38] sm:$0xff] }
 0x747   : > { %3732 = vmax.xlane.f32.xlu1 %v3731_v35  ;;  %v3665_v35 = vadd.f32 %v7948_v33, %v9922_v44 }
 0x76b   : > { %v9933_v50 = vpop.f32.mrb[100].mxu0 }
 0x76c   : > { %11706 = vst [vmem:[#allocation35_spill] sm:$0xff] %v9933_v50  ;;  %v9943_v51 = vpop.f32.mrb[101].mxu0  ;;  %v7014_v63 = vpop.f32.mrb[60].mxu1 }
 0x76d   : > { %11707 = vst [vmem:[#allocation36_spill] sm:$0xff] %v9943_v51  ;;  %v9945_v15 = vadd.f32 %v7014_v63, %v3664_v9  ;;  %v9947_v36 = vpop.f32.mrb[102].mxu0  ;;  %v3319_v45 = vpop.f32.mrb[61].mxu1  ;;  %v7953_v51 = vld [vmem:[%s11516_s6 + $0x48] sm:$0xff] }
 0x76e   : > { %11708 = vst [vmem:[#allocation37_spill] sm:$0xff] %v9947_v36  ;;  %v9955_v46 = vpop.f32.mrb[103].mxu0  ;;  %v7015_v33 = vpop.f32.mrb[62].mxu1  ;;  %v9957_v20 = vadd.f32 %v3662_v21, %v3319_v45  ;;  %v7951_v21 = vld [vmem:[%s11516_s6 + $0x58] sm:$0xff] }
 0x76f   : > { %11709 = vst [vmem:[#allocation38_spill] sm:$0xff] %v9955_v46  ;;  %v9961_v9 = vadd.f32 %v7015_v33, %v3665_v35  ;;  %v3322_v26 = vpop.f32.mrb[63].mxu1  ;;  %v3740_v54 = vsel %vm1158_vm2, %v9945_v15, -inf  ;;  %v3669_v35 = vadd.f32 %v7951_v21, %v9874_v43  ;;  %v3667_v21 = vadd.f32 %v7953_v51, %v9879_v55  ;;  %v7954_v51 = vld [vmem:[%s11516_s6 + $0x70] sm:$0xff] }
 0x770   : > { %3741 = vmax.xlane.f32.xlu0 %v3740_v54  ;;  %v9969_v50 = vadd.f32 %v3663_v34, %v3322_v26  ;;  %v7952_v54 = vld [vmem:[%s11516_s6 + $0x40] sm:$0xff]  ;;  %v3734_v26 = vsel %vm1158_vm2, %v9957_v20, -inf  ;;  %v3672_v17 = vadd.f32 %v7954_v51, %v9912_v28 }
 0x771   : > { %v3743_v45 = vsel %vm1158_vm2, %v9961_v9, -inf  ;;  %v3666_v63 = vadd.f32 %v7952_v54, %v9865_v12  ;;  %v7956_v51 = vld [vmem:[%s11516_s6 + $0x60] sm:$0xff] }
 0x772   : > { %3744 = vmax.xlane.f32.xlu1 %v3743_v45  ;;  %v3737_v46 = vsel %vm1158_vm2, %v9969_v50, -inf }
 0x773   : > { %v7026_v33 = vpop.f32.mrb[104].mxu0 }
 0x774   : > { %v9983_v34 = vadd.f32 %v7026_v33, %v3668_v41  ;;  %v3408_v60 = vpop.f32.mrb[105].mxu0  ;;  %3735 = vmax.xlane.f32.xlu0 %v3734_v26 }
 0x775   : > { %v7027_v45 = vpop.f32.mrb[106].mxu0  ;;  %v9995_v33 = vadd.f32 %v3666_v63, %v3408_v60  ;;  %v7955_v63 = vld [vmem:[%s11516_s6 + $0x78] sm:$0xff] }
 0x776   : > { %v9991_v36 = vadd.f32 %v7027_v45, %v3669_v35  ;;  %v3411_v54 = vpop.f32.mrb[107].mxu0  ;;  %3738 = vmax.xlane.f32.xlu1 %v3737_v46  ;;  %v3752_v41 = vsel %vm1158_vm2, %v9983_v34, -inf  ;;  %v3673_v60 = vadd.f32 %v7955_v63, %v9922_v44  ;;  %v7957_v63 = vld [vmem:[%s11516_s6 + $0x68] sm:$0xff] }
 0x777   : > { %v10003_v35 = vadd.f32 %v3667_v21, %v3411_v54  ;;  %v3746_v59 = vsel %vm1158_vm2, %v9995_v33, -inf  ;;  %v3670_v21 = vadd.f32 %v7956_v51, %v9917_v61  ;;  %v3671_v0 = vadd.f32 %v7957_v63, %v9931_v56 }
 0x778   : > { %3753 = vmax.xlane.f32.xlu0 %v3752_v41  ;;  %v7042_v26 = vpop.f32.mrb[64].mxu1  ;;  %v3755_v23 = vsel %vm1158_vm2, %v9991_v36, -inf }
 0x779   : > { %v3513_v45 = vpop.f32.mrb[65].mxu1  ;;  %v3749_v62 = vsel %vm1158_vm2, %v10003_v35, -inf }
 0x77a   : > { %3756 = vmax.xlane.f32.xlu1 %v3755_v23  ;;  %v7043_v46 = vpop.f32.mrb[66].mxu1 }
 0x77b   : > { %v7030_v41 = vpop.f32.mrb[108].mxu0  ;;  %v3516_v40 = vpop.f32.mrb[67].mxu1 }
 0x77c   : > { %v10015_v54 = vadd.f32 %v7030_v41, %v3672_v17  ;;  %3747 = vmax.xlane.f32.xlu0 %v3746_v59  ;;  %v3424_v23 = vpop.f32.mrb[109].mxu0  ;;  %v7958_v59 = vld [vmem:[%s11516_s6 + $0x90] sm:$0xff] }
 0x77d   : > { %v7031_v30 = vpop.f32.mrb[110].mxu0  ;;  %v3676_v41 = vadd.f32 %v7958_v59, %v9860_v31  ;;  %v10031_v51 = vadd.f32 %v3670_v21, %v3424_v23  ;;  %v7960_v21 = vld [vmem:[%s11516_s6 + $0x80] sm:$0xff] }
 0x77e   : > { %v10023_v5 = vadd.f32 %v7031_v30, %v3673_v60  ;;  %3750 = vmax.xlane.f32.xlu1 %v3749_v62  ;;  %v3427_v8 = vpop.f32.mrb[111].mxu0  ;;  %v3764_v17 = vsel %vm1158_vm2, %v10015_v54, -inf  ;;  %v7959_v30 = vld [vmem:[%s11516_s6 + $0x98] sm:$0xff]  ;;  %v3674_v23 = vadd.f32 %v7960_v21, %v9865_v12  ;;  %v7962_v21 = vld [vmem:[%s11516_s6 + $0xb0] sm:$0xff] }
 0x77f   : > { %v3677_v62 = vadd.f32 %v7959_v30, %v9874_v43  ;;  %v10039_v60 = vadd.f32 %v3671_v0, %v3427_v8  ;;  %v10041_v63 = vadd.f32 %v7042_v26, %v3676_v41  ;;  %v7961_v8 = vld [vmem:[%s11516_s6 + $0x88] sm:$0xff] }
 0x780   : > { %3765 = vmax.xlane.f32.xlu0 %v3764_v17  ;;  %v3767_v10 = vsel %vm1158_vm2, %v10023_v5, -inf  ;;  %v3758_v17 = vsel %vm1158_vm2, %v10031_v51, -inf  ;;  %v10057_v30 = vadd.f32 %v3674_v23, %v3513_v45 }
 0x781   : > { %v10049_v58 = vadd.f32 %v7043_v46, %v3677_v62  ;;  %v3761_v26 = vsel %vm1158_vm2, %v10039_v60, -inf  ;;  %v3680_v46 = vadd.f32 %v7962_v21, %v9912_v28  ;;  %v7964_v21 = vld [vmem:[%s11516_s6 + $0xa0] sm:$0xff] }
 0x782   : > { %3768 = vmax.xlane.f32.xlu1 %v3767_v10  ;;  %v3675_v10 = vadd.f32 %v7961_v8, %v9879_v55 }
 0x783   : > { %v3779_v23 = vsel %vm1158_vm2, %v10049_v58, -inf }
 0x784   : > { %3759 = vmax.xlane.f32.xlu0 %v3758_v17  ;;  %v7046_v59 = vpop.f32.mrb[68].mxu1  ;;  %v3776_v17 = vsel %vm1158_vm2, %v10041_v63, -inf  ;;  %v10065_v8 = vadd.f32 %v3675_v10, %v3516_v40  ;;  %v3770_v40 = vsel %vm1158_vm2, %v10057_v30, -inf }
 0x785   : > { %v3529_v0 = vpop.f32.mrb[69].mxu1  ;;  %v10073_v7 = vadd.f32 %v7046_v59, %v3680_v46 }
 0x786   : > { %3762 = vmax.xlane.f32.xlu1 %v3761_v26  ;;  %v7047_v41 = vpop.f32.mrb[70].mxu1  ;;  %v7963_v26 = vld [vmem:[%s11516_s6 + $0xb8] sm:$0xff]  ;;  %v3773_v59 = vsel %vm1158_vm2, %v10065_v8, -inf }
 0x787   : > { %v3532_v62 = vpop.f32.mrb[71].mxu1  ;;  %v3681_v45 = vadd.f32 %v7963_v26, %v9922_v44  ;;  %v7965_v26 = vld [vmem:[%s11516_s6 + $0xa8] sm:$0xff] }
 0x788   : > { %3777 = vmax.xlane.f32.xlu0 %v3776_v17  ;;  %v3678_v17 = vadd.f32 %v7964_v21, %v9917_v61  ;;  %v3788_v21 = vsel %vm1158_vm2, %v10073_v7, -inf }
 0x789   : > { %v10081_v10 = vadd.f32 %v7047_v41, %v3681_v45  ;;  %v7966_v41 = vld [vmem:[%s11516_s6 + $0xd0] sm:$0xff] }
 0x78a   : > { %3780 = vmax.xlane.f32.xlu1 %v3779_v23  ;;  %v3679_v23 = vadd.f32 %v7965_v26, %v9931_v56  ;;  %v10089_v46 = vadd.f32 %v3678_v17, %v3529_v0  ;;  %v3684_v45 = vadd.f32 %v7966_v41, %v9860_v31  ;;  %v7967_v0 = vld [vmem:[%s11516_s6 + $0xd8] sm:$0xff] }
 0x78b   : > { %v3791_v26 = vsel %vm1158_vm2, %v10081_v10, -inf  ;;  %v3685_v17 = vadd.f32 %v7967_v0, %v9874_v43 }
 0x78c   : > { %3771 = vmax.xlane.f32.xlu0 %v3770_v40  ;;  %v10097_v40 = vadd.f32 %v3679_v23, %v3532_v62  ;;  %v3782_v31 = vsel %vm1158_vm2, %v10089_v46, -inf }
 0x78e   : > { %3774 = vmax.xlane.f32.xlu1 %v3773_v59  ;;  %v3785_v0 = vsel %vm1158_vm2, %v10097_v40, -inf }
 0x790   : > { %3789 = vmax.xlane.f32.xlu0 %v3788_v21  ;;  %v7968_v21 = vld [vmem:[%s11516_s6 + $0xc0] sm:$0xff] }
 0x791   : > { %v3682_v1 = vadd.f32 %v7968_v21, %v9865_v12 }
 0x792   : > { %3792 = vmax.xlane.f32.xlu1 %v3791_v26  ;;  %v7969_v26 = vld [vmem:[%s11516_s6 + $0xc8] sm:$0xff] }
 0x793   : > { %v7058_v59 = vpop.f32.mrb[112].mxu0  ;;  %v3683_v43 = vadd.f32 %v7969_v26, %v9879_v55 }
 0x794   : > { %v10111_v62 = vadd.f32 %v7058_v59, %v3684_v45  ;;  %v3618_v23 = vpop.f32.mrb[113].mxu0  ;;  %3783 = vmax.xlane.f32.xlu0 %v3782_v31  ;;  %v7970_v31 = vld [vmem:[%s11516_s6 + $0xf0] sm:$0xff] }
 0x795   : > { %v7059_v41 = vpop.f32.mrb[114].mxu0  ;;  %v10123_v45 = vadd.f32 %v3682_v1, %v3618_v23  ;;  %v3688_v55 = vadd.f32 %v7970_v31, %v9912_v28  ;;  %v7971_v1 = vld [vmem:[%s11516_s6 + $0xf8] sm:$0xff] }
 0x796   : > { %v10121_v12 = vadd.f32 %v7059_v41, %v3685_v17  ;;  %v3621_v21 = vpop.f32.mrb[115].mxu0  ;;  %3786 = vmax.xlane.f32.xlu1 %v3785_v0  ;;  %v3800_v59 = vsel %vm1158_vm2, %v10111_v62, -inf  ;;  %v3689_v23 = vadd.f32 %v7971_v1, %v9922_v44  ;;  %v7972_v0 = vld [vmem:[%s11516_s6 + $0xe0] sm:$0xff]  ;;  %v7973_v44 = vld [vmem:[%s11516_s6 + $0xe8] sm:$0xff] }
 0x797   : > { %v10131_v26 = vadd.f32 %v3683_v43, %v3621_v21  ;;  %v3794_v28 = vsel %vm1158_vm2, %v10123_v45, -inf  ;;  %v10145_v43 = vpop.permute.xlu1 %4272  ;;  %v3687_v1 = vadd.f32 %v7973_v44, %v9931_v56 }
 0x798   : > { %3801 = vmax.xlane.f32.xlu0 %v3800_v59  ;;  %v3803_v17 = vsel %vm1158_vm2, %v10121_v12, -inf  ;;  %v3686_v59 = vadd.f32 %v7972_v0, %v9917_v61 }
 0x799   : > { %v3797_v32 = vsel %vm1158_vm2, %v10131_v26, -inf }
 0x79a   : > { %3804 = vmax.xlane.f32.xlu1 %v3803_v17 }
 0x79b   : > { %v7062_v41 = vpop.f32.mrb[116].mxu0  ;;  %v10165_v18 = vpop.permute.xlu1 %4274 }
 0x79c   : > { %v10147_v21 = vadd.f32 %v7062_v41, %v3688_v55  ;;  %v3634_v31 = vpop.f32.mrb[117].mxu0  ;;  %3795 = vmax.xlane.f32.xlu0 %v3794_v28 }
 0x79d   : > { %v7063_v17 = vpop.f32.mrb[118].mxu0  ;;  %v10157_v53 = vadd.f32 %v3686_v59, %v3634_v31 }
 0x79e   : > { %v10155_v61 = vadd.f32 %v7063_v17, %v3689_v23  ;;  %v3637_v0 = vpop.f32.mrb[119].mxu0  ;;  %3798 = vmax.xlane.f32.xlu1 %v3797_v32  ;;  %v3812_v55 = vsel %vm1158_vm2, %v10147_v21, -inf  ;;  %v10171_v23 = vpop.permute.xlu0 %4551 }
 0x79f   : > { %v10161_v41 = vadd.f32 %v3687_v1, %v3637_v0  ;;  %v3806_v56 = vsel %vm1158_vm2, %v10157_v53, -inf  ;;  %v10173_v59 = vpop.permute.xlu1 %4359 }
 0x7a0   : > { %3813 = vmax.xlane.f32.xlu0 %v3812_v55  ;;  %v3815_v28 = vsel %vm1158_vm2, %v10155_v61, -inf  ;;  %11710 = vst [vmem:[#allocation39_spill] sm:$0xff] %v10173_v59 }
 0x7a1   : > { %v3809_v32 = vsel %vm1158_vm2, %v10161_v41, -inf }
 0x7a2   : > { %3816 = vmax.xlane.f32.xlu1 %v3815_v28  ;;  %v10175_v31 = vpop.permute.xlu0 %4361 }
 0x7a3   : > { %11711 = vst [vmem:[#allocation40_spill] sm:$0xff] %v10175_v31  ;;  %v10177_v17 = vpop.permute.xlu1 %4363 }
 0x7a4   : > { %3807 = vmax.xlane.f32.xlu0 %v3806_v56  ;;  %11712 = vst [vmem:[#allocation41_spill] sm:$0xff] %v10177_v17 }
 0x7a6   : > { %3810 = vmax.xlane.f32.xlu1 %v3809_v32  ;;  %v10179_v44 = vpop.permute.xlu0 %4553 }
 0x7a7   : > { %11713 = vst [vmem:[#allocation42_spill] sm:$0xff] %v10179_v44  ;;  %v10181_v1 = vpop.permute.xlu1 %4656 }
 0x7a8   : > { %11714 = vst [vmem:[#allocation43_spill] sm:$0xff] %v10181_v1 }
 0x7aa   : > { %v10183_v0 = vpop.permute.xlu0 %4555 }
 0x7ab   : > { %11715 = vst [vmem:[#allocation44_spill] sm:$0xff] %v10183_v0  ;;  %v10185_v55 = vpop.permute.xlu1 %4557 }
 0x7ac   : > { %11716 = vst [vmem:[#allocation45_spill] sm:$0xff] %v10185_v55 }
 0x7ae   : > { %v10187_v28 = vpop.permute.xlu0 %4658 }
 0x7af   : > { %11717 = vst [vmem:[#allocation46_spill] sm:$0xff] %v10187_v28  ;;  %v10189_v56 = vpop.permute.xlu1 %4543 }
 0x7b0   : > { %11718 = vst [vmem:[#allocation47_spill] sm:$0xff] %v10189_v56 }
 0x7b2   : > { %v10191_v32 = vpop.permute.xlu0 %4545 }
 0x7b3   : > { %11719 = vst [vmem:[#allocation48_spill] sm:$0xff] %v10191_v32  ;;  %v10193_v42 = vpop.permute.xlu1 %4660 }
 0x7b4   : > { %11720 = vst [vmem:[#allocation49_spill] sm:$0xff] %v10193_v42 }
 0x7b6   : > { %v10195_v59 = vpop.permute.xlu0 %4761 }
 0x7b7   : > { %11721 = vst [vmem:[#allocation50_spill] sm:$0xff] %v10195_v59  ;;  %v10197_v31 = vpop.permute.xlu1 %4547 }
 0x7b8   : > { %11722 = vst [vmem:[#allocation51_spill] sm:$0xff] %v10197_v31 }
 0x7cf   : > { %v3730_v17 = vpop.xlane.xlu0 %3729 }
 0x7d0   : > { %v3820_v44 = vsub.f32 %v9893_v6, %v3730_v17  ;;  %v3724_v1 = vpop.xlane.xlu1 %3723 }
 0x7d1   : > { %v3818_v0 = vsub.f32 %v9895_v11, %v3724_v1 }
 0x7d2   : > { %v3854_v38 = vmul.f32 1.442695, %v3820_v44 }
 0x7d3   : > { %v3850_v55 = vmul.f32 1.442695, %v3818_v0  ;;  %v3727_v29 = vpop.xlane.xlu0 %3726 }
 0x7d4   : > { %7654 = vpow2.f32 %v3854_v38  ;;  %v3819_v28 = vsub.f32 %v9901_v19, %v3727_v29  ;;  %v3733_v56 = vpop.xlane.xlu1 %3732 }
 0x7d5   : > { %v3821_v32 = vsub.f32 %v9899_v2, %v3733_v56  ;;  %7656 = vpow2.f32 %v3850_v55 }
 0x7d6   : > { %v3852_v42 = vmul.f32 1.442695, %v3819_v28 }
 0x7d7   : > { %v3856_v59 = vmul.f32 1.442695, %v3821_v32 }
 0x7d9   : > { %7658 = vpow2.f32 %v3856_v59 }
 0x7da   : > { %7660 = vpow2.f32 %v3852_v42 }
 0x7de   : > { %v10203_v31 = vpop.eup %7654 }
 0x7df   : > { %v3920_v6 = vsel %vm1158_vm2, %v10203_v31, 0.0  ;;  %v10207_v11 = vpop.eup %7656 }
 0x7e0   : > { %3921 = vadd.xlane.f32.xlu0 %v3920_v6  ;;  %v3914_v38 = vsel %vm1158_vm2, %v10207_v11, 0.0 }
 0x7e3   : > { %v10209_v17 = vpop.eup %7658 }
 0x7e4   : > { %3915 = vadd.xlane.f32.xlu0 %v3914_v38  ;;  %v3923_v29 = vsel %vm1158_vm2, %v10209_v17, 0.0  ;;  %v10215_v2 = vpop.eup %7660 }
 0x7e5   : > { %3924 = vadd.xlane.f32.xlu1 %v3923_v29  ;;  %v3917_v42 = vsel %vm1158_vm2, %v10215_v2, 0.0 }
 0x7e9   : > { %3918 = vadd.xlane.f32.xlu1 %v3917_v42 }
 0x7fd   : > { %v3742_v19 = vpop.xlane.xlu0 %3741 }
 0x7fe   : > { %v3824_v59 = vsub.f32 %v9945_v15, %v3742_v19 }
 0x7ff   : > { %v3745_v44 = vpop.xlane.xlu1 %3744 }
 0x800   : > { %v3862_v1 = vmul.f32 1.442695, %v3824_v59  ;;  %v3825_v0 = vsub.f32 %v9961_v9, %v3745_v44 }
 0x801   : > { %v3736_v55 = vpop.xlane.xlu0 %3735 }
 0x802   : > { %7662 = vpow2.f32 %v3862_v1  ;;  %v3864_v28 = vmul.f32 1.442695, %v3825_v0  ;;  %v3822_v56 = vsub.f32 %v9957_v20, %v3736_v55 }
 0x803   : > { %v3739_v32 = vpop.xlane.xlu1 %3738 }
 0x804   : > { %7664 = vpow2.f32 %v3864_v28  ;;  %v3858_v6 = vmul.f32 1.442695, %v3822_v56  ;;  %v3823_v38 = vsub.f32 %v9969_v50, %v3739_v32 }
 0x805   : > { %v3754_v29 = vpop.xlane.xlu0 %3753 }
 0x806   : > { %7666 = vpow2.f32 %v3858_v6  ;;  %v3860_v42 = vmul.f32 1.442695, %v3823_v38  ;;  %v3828_v27 = vsub.f32 %v9983_v34, %v3754_v29 }
 0x807   : > { %v3757_v15 = vpop.xlane.xlu1 %3756 }
 0x808   : > { %7668 = vpow2.f32 %v3860_v42  ;;  %v3870_v19 = vmul.f32 1.442695, %v3828_v27  ;;  %v3829_v9 = vsub.f32 %v9991_v36, %v3757_v15 }
 0x809   : > { %v3748_v59 = vpop.xlane.xlu0 %3747 }
 0x80a   : > { %v3872_v44 = vmul.f32 1.442695, %v3829_v9  ;;  %v3826_v1 = vsub.f32 %v9995_v33, %v3748_v59  ;;  %7670 = vpow2.f32 %v3870_v19 }
 0x80b   : > { %v3751_v20 = vpop.xlane.xlu1 %3750 }
 0x80c   : > { %v10226_v0 = vpop.eup %7662  ;;  %7672 = vpow2.f32 %v3872_v44  ;;  %v3866_v50 = vmul.f32 1.442695, %v3826_v1  ;;  %v3827_v55 = vsub.f32 %v10003_v35, %v3751_v20 }
 0x80d   : > { %v3766_v28 = vpop.xlane.xlu0 %3765  ;;  %v3932_v34 = vsel %vm1158_vm2, %v10226_v0, 0.0 }
 0x80e   : > { %v10231_v56 = vpop.eup %7664  ;;  %v3832_v27 = vsub.f32 %v10015_v54, %v3766_v28  ;;  %3933 = vadd.xlane.f32.xlu1 %v3932_v34  ;;  %7674 = vpow2.f32 %v3866_v50  ;;  %v3868_v33 = vmul.f32 1.442695, %v3827_v55 }
 0x80f   : > { %v3769_v36 = vpop.xlane.xlu1 %3768  ;;  %v3935_v29 = vsel %vm1158_vm2, %v10231_v56, 0.0 }
 0x810   : > { %v10234_v32 = vpop.eup %7666  ;;  %v3878_v6 = vmul.f32 1.442695, %v3832_v27  ;;  %v3833_v54 = vsub.f32 %v10023_v5, %v3769_v36 }
 0x811   : > { %v3760_v38 = vpop.xlane.xlu0 %3759  ;;  %v3926_v35 = vsel %vm1158_vm2, %v10234_v32, 0.0 }
 0x812   : > { %v10240_v42 = vpop.eup %7668  ;;  %7676 = vpow2.f32 %v3878_v6  ;;  %v3830_v15 = vsub.f32 %v10031_v51, %v3760_v38  ;;  %3936 = vadd.xlane.f32.xlu1 %v3935_v29  ;;  %3927 = vadd.xlane.f32.xlu0 %v3926_v35  ;;  %v3880_v51 = vmul.f32 1.442695, %v3833_v54 }
 0x813   : > { %v3763_v19 = vpop.xlane.xlu1 %3762  ;;  %7678 = vpow2.f32 %v3868_v33  ;;  %v3929_v20 = vsel %vm1158_vm2, %v10240_v42, 0.0 }
 0x814   : > { %v3874_v9 = vmul.f32 1.442695, %v3830_v15  ;;  %v3831_v59 = vsub.f32 %v10039_v60, %v3763_v19  ;;  %v10245_v44 = vpop.eup %7670 }
 0x815   : > { %v3778_v1 = vpop.xlane.xlu0 %3777  ;;  %v3944_v36 = vsel %vm1158_vm2, %v10245_v44, 0.0 }
 0x816   : > { %v10249_v50 = vpop.eup %7672  ;;  %v3876_v55 = vmul.f32 1.442695, %v3831_v59  ;;  %3930 = vadd.xlane.f32.xlu1 %v3929_v20  ;;  %7680 = vpow2.f32 %v3874_v9  ;;  %v3836_v28 = vsub.f32 %v10041_v63, %v3778_v1 }
 0x817   : > { %v3781_v5 = vpop.xlane.xlu1 %3780  ;;  %v3947_v34 = vsel %vm1158_vm2, %v10249_v50, 0.0 }
 0x818   : > { %7682 = vpow2.f32 %v3876_v55  ;;  %v3837_v60 = vsub.f32 %v10049_v58, %v3781_v5  ;;  %3948 = vadd.xlane.f32.xlu0 %v3947_v34  ;;  %v10257_v33 = vpop.eup %7674  ;;  %v3886_v38 = vmul.f32 1.442695, %v3836_v28 }
 0x819   : > { %v3772_v27 = vpop.xlane.xlu0 %3771  ;;  %7684 = vpow2.f32 %v3880_v51  ;;  %v3938_v54 = vsel %vm1158_vm2, %v10257_v33, 0.0 }
 0x81a   : > { %v3888_v6 = vmul.f32 1.442695, %v3837_v60  ;;  %3945 = vadd.xlane.f32.xlu1 %v3944_v36  ;;  %v3834_v35 = vsub.f32 %v10057_v30, %v3772_v27 }
 0x81b   : > { %v3775_v29 = vpop.xlane.xlu1 %3774 }
 0x81c   : > { %v10259_v63 = vpop.eup %7676  ;;  %7686 = vpow2.f32 %v3888_v6  ;;  %v3835_v15 = vsub.f32 %v10065_v8, %v3775_v29  ;;  %v3882_v55 = vmul.f32 1.442695, %v3834_v35 }
 0x81d   : > { %v3790_v58 = vpop.xlane.xlu0 %3789  ;;  %v3956_v19 = vsel %vm1158_vm2, %v10259_v63, 0.0  ;;  %v10267_v9 = vpop.eup %7678  ;;  %7688 = vpow2.f32 %v3886_v38 }
 0x81e   : > { %v3884_v59 = vmul.f32 1.442695, %v3835_v15  ;;  %v3840_v1 = vsub.f32 %v10073_v7, %v3790_v58  ;;  %3939 = vadd.xlane.f32.xlu1 %v3938_v54  ;;  %3957 = vadd.xlane.f32.xlu0 %v3956_v19  ;;  %v3941_v28 = vsel %vm1158_vm2, %v10267_v9, 0.0 }
 0x81f   : > { %v3793_v20 = vpop.xlane.xlu1 %3792 }
 0x820   : > { %7690 = vpow2.f32 %v3884_v59  ;;  %v3894_v30 = vmul.f32 1.442695, %v3840_v1  ;;  %v10270_v8 = vpop.eup %7680  ;;  %v3841_v34 = vsub.f32 %v10081_v10, %v3793_v20 }
 0x821   : > { %v3784_v51 = vpop.xlane.xlu0 %3783  ;;  %v3950_v35 = vsel %vm1158_vm2, %v10270_v8, 0.0 }
 0x822   : > { %v10274_v5 = vpop.eup %7682  ;;  %7692 = vpow2.f32 %v3894_v30  ;;  %v3838_v7 = vsub.f32 %v10089_v46, %v3784_v51  ;;  %3942 = vadd.xlane.f32.xlu1 %v3941_v28  ;;  %v3896_v10 = vmul.f32 1.442695, %v3841_v34 }
 0x823   : > { %v3787_v60 = vpop.xlane.xlu1 %3786  ;;  %v3953_v27 = vsel %vm1158_vm2, %v10274_v5, 0.0  ;;  %7694 = vpow2.f32 %v3882_v55  ;;  %v10281_v38 = vpop.eup %7684 }
 0x824   : > { %v3890_v36 = vmul.f32 1.442695, %v3838_v7  ;;  %v3839_v6 = vsub.f32 %v10097_v40, %v3787_v60  ;;  %3954 = vadd.xlane.f32.xlu0 %v3953_v27  ;;  %v3959_v20 = vsel %vm1158_vm2, %v10281_v38, 0.0 }
 0x825   : > { %v3802_v29 = vpop.xlane.xlu0 %3801 }
 0x826   : > { %v10285_v15 = vpop.eup %7686  ;;  %7696 = vpow2.f32 %v3890_v36  ;;  %v3892_v46 = vmul.f32 1.442695, %v3839_v6  ;;  %v3844_v58 = vsub.f32 %v10111_v62, %v3802_v29  ;;  %3951 = vadd.xlane.f32.xlu1 %v3950_v35 }
 0x827   : > { %v3805_v54 = vpop.xlane.xlu1 %3804  ;;  %v3971_v19 = vsel %vm1158_vm2, %v10285_v15, 0.0  ;;  %v10291_v59 = vpop.eup %7688 }
 0x828   : > { %7698 = vpow2.f32 %v3892_v46  ;;  %v3845_v40 = vsub.f32 %v10121_v12, %v3805_v54  ;;  %3972 = vadd.xlane.f32.xlu0 %v3971_v19  ;;  %v3902_v30 = vmul.f32 1.442695, %v3844_v58  ;;  %v3968_v60 = vsel %vm1158_vm2, %v10291_v59, 0.0 }
 0x829   : > { %v3796_v1 = vpop.xlane.xlu0 %3795  ;;  %7700 = vpow2.f32 %v3896_v10 }
 0x82a   : > { %v10295_v55 = vpop.eup %7690  ;;  %v3904_v62 = vmul.f32 1.442695, %v3845_v40  ;;  %v3842_v51 = vsub.f32 %v10123_v45, %v3796_v1  ;;  %3960 = vadd.xlane.f32.xlu1 %v3959_v20 }
 0x82b   : > { %v3799_v28 = vpop.xlane.xlu1 %3798  ;;  %v3965_v34 = vsel %vm1158_vm2, %v10295_v55, 0.0 }
 0x82c   : > { %v10300_v12 = vpop.eup %7692  ;;  %7702 = vpow2.f32 %v3904_v62  ;;  %v3843_v7 = vsub.f32 %v10131_v26, %v3799_v28  ;;  %3966 = vadd.xlane.f32.xlu0 %v3965_v34  ;;  %v3898_v36 = vmul.f32 1.442695, %v3842_v51 }
 0x82d   : > { %v10305_v27 = vpop.eup %7694  ;;  %7704 = vpow2.f32 %v3902_v30  ;;  %v3980_v45 = vsel %vm1158_vm2, %v10300_v12, 0.0  ;;  %v3814_v34 = vpop.xlane.xlu0 %3813 }
 0x82e   : > { %v3900_v6 = vmul.f32 1.442695, %v3843_v7  ;;  %3969 = vadd.xlane.f32.xlu1 %v3968_v60  ;;  %v3962_v26 = vsel %vm1158_vm2, %v10305_v27, 0.0 }
 0x82f   : > { %v3817_v7 = vpop.xlane.xlu1 %3816 }
 0x830   : > { %v10309_v29 = vpop.eup %7696  ;;  %7706 = vpow2.f32 %v3900_v6  ;;  %3981 = vadd.xlane.f32.xlu0 %v3980_v45  ;;  %v3848_v6 = vsub.f32 %v10147_v21, %v3814_v34 }
 0x831   : > { %7708 = vpow2.f32 %v3898_v36  ;;  %v3974_v10 = vsel %vm1158_vm2, %v10309_v29, 0.0  ;;  %v3808_v60 = vpop.xlane.xlu0 %3807 }
 0x832   : > { %v10313_v35 = vpop.eup %7698  ;;  %3963 = vadd.xlane.f32.xlu1 %v3962_v26  ;;  %v3846_v36 = vsub.f32 %v10157_v53, %v3808_v60  ;;  %v3849_v26 = vsub.f32 %v10155_v61, %v3817_v7 }
 0x833   : > { %v10317_v46 = vpop.eup %7700  ;;  %v3977_v58 = vsel %vm1158_vm2, %v10313_v35, 0.0  ;;  %v3811_v45 = vpop.xlane.xlu1 %3810 }
 0x834   : > { %3975 = vadd.xlane.f32.xlu0 %v3974_v10  ;;  %v3983_v19 = vsel %vm1158_vm2, %v10317_v46, 0.0  ;;  %v3906_v10 = vmul.f32 1.442695, %v3846_v36 }
 0x836   : > { %v10321_v54 = vpop.eup %7702  ;;  %3978 = vadd.xlane.f32.xlu1 %v3977_v58  ;;  %v3910_v58 = vmul.f32 1.442695, %v3848_v6  ;;  %7710 = vpow2.f32 %v3906_v10 }
 0x837   : > { %11723 = vst [vmem:[#allocation52_spill] sm:$0xff] %v10321_v54  ;;  %v10325_v40 = vpop.eup %7704  ;;  %v3995_v1 = vsel %vm1158_vm2, %v10321_v54, 0.0 }
 0x838   : > { %3984 = vadd.xlane.f32.xlu0 %v3983_v19  ;;  %v3992_v30 = vsel %vm1158_vm2, %v10325_v40, 0.0  ;;  %v3847_v19 = vsub.f32 %v10161_v41, %v3811_v45  ;;  %7712 = vpow2.f32 %v3910_v58 }
 0x83a   : > { %v10329_v20 = vpop.eup %7706  ;;  %3996 = vadd.xlane.f32.xlu1 %v3995_v1  ;;  %v3912_v1 = vmul.f32 1.442695, %v3849_v26 }
 0x83b   : > { %v10333_v62 = vpop.eup %7708  ;;  %v3989_v51 = vsel %vm1158_vm2, %v10329_v20, 0.0 }
 0x83c   : > { %3993 = vadd.xlane.f32.xlu0 %v3992_v30  ;;  %v3986_v28 = vsel %vm1158_vm2, %v10333_v62, 0.0  ;;  %v3908_v30 = vmul.f32 1.442695, %v3847_v19  ;;  %7714 = vpow2.f32 %v3912_v1 }
 0x83e   : > { %3990 = vadd.xlane.f32.xlu1 %v3989_v51  ;;  %7716 = vpow2.f32 %v3908_v30 }
 0x840   : > { %3987 = vadd.xlane.f32.xlu0 %v3986_v28  ;;  %v10347_v28 = vpop.eup %7710 }
 0x841   : > { %v3998_v61 = vsel %vm1158_vm2, %v10347_v28, 0.0 }
 0x842   : > { %v10349_v54 = vpop.eup %7712 }
 0x843   : > { %v4004_v41 = vsel %vm1158_vm2, %v10349_v54, 0.0 }
 0x846   : > { %v10353_v34 = vpop.eup %7714 }
 0x847   : > { %v4007_v36 = vsel %vm1158_vm2, %v10353_v34, 0.0 }
 0x848   : > { %v10357_v7 = vpop.eup %7716 }
 0x849   : > { %v4001_v6 = vsel %vm1158_vm2, %v10357_v7, 0.0 }
 0x84f   : > { %4662 = vrot.lane.b32.xlu1 %v8171_v57, %s8022_s16 }
 0x856   : > { %4549 = vrot.lane.b32.xlu0 %v8145_v37, %s8023_s17 }
 0x86d   : > { %v3922_v51 = vpop.xlane.xlu0 %3921 }
 0x871   : > { %v3916_v53 = vpop.xlane.xlu0 %3915 }
 0x872   : > { %v3925_v21 = vpop.xlane.xlu1 %3924 }
 0x873   : > { %3999 = vadd.xlane.f32.xlu1 %v3998_v61  ;;  %7718 = vrcp.f32 %v3925_v21 }
 0x874   : > { %7720 = vrcp.f32 %v3916_v53 }
 0x875   : > { %4005 = vadd.xlane.f32.xlu0 %v4004_v41  ;;  %7722 = vrcp.f32 %v3922_v51  ;;  %v11724_v41 = vld [vmem:[#allocation3_spill] sm:$0xff] }
 0x876   : > { %v3919_v60 = vpop.xlane.xlu1 %3918 }
 0x877   : > { %7724 = vrcp.f32 %v3919_v60  ;;  %4008 = vadd.xlane.f32.xlu1 %v4007_v36 }
 0x879   : > { %4002 = vadd.xlane.f32.xlu0 %v4001_v6 }
 0x87d   : > { %v7719_v45 = vpop.eup %7718 }
 0x87e   : > { %v7721_v26 = vpop.eup %7720  ;;  %v4045_v19 = vmul.f32 %v7719_v45, %v10209_v17 }
 0x87f   : > { %v7723_v10 = vpop.eup %7722  ;;  %v4042_v1 = vmul.f32 %v7721_v26, %v10207_v11 }
 0x880   : > { %v4044_v51 = vmul.f32 %v7723_v10, %v10203_v31 }
 0x881   : > { %v7725_v58 = vpop.eup %7724 }
 0x882   : > { %v4043_v30 = vmul.f32 %v7725_v58, %v10215_v2  ;;  %v4075_v21 = vpack.c.bf16 %v4045_v19, %v4044_v51 }
 0x884   : > { %v4074_v53 = vpack.c.bf16 %v4043_v30, %v4042_v1 }
 0x886   : > { %7072 = vmatprep.mubr.msk.bf16.mxu1 %vm1158_vm2, %v4074_v53 }
 0x887   : > { %7073 = vmatmul.mubr.msk.bf16.vlgmr.msra.gmra.mrb[72].mxu1 %vm1158_vm2, %v4075_v21 }
 0x888   : > { %7097 = vmatpush3.bf16.msra.mxu1 %v9766_v52  ;;  %4648 = vrot.lane.b32.xlu1 %v8159_v48, %s8023_s17 }
 0x889   : > { %7098 = vmatprep.subr.bf16.mxu1 %v10119_v49 }
 0x88c   : > { %7099 = vmatpush3.bf16.msra.mxu1 %v10119_v49  ;;  %4765 = vrot.lane.b32.xlu1 %v8197_v14, %s8022_s16 }
 0x88d   : > { %7100 = vmatprep.subr.bf16.mxu1 %v10145_v43 }
 0x88f   : > { %4763 = vrot.lane.b32.xlu0 %v8183_v3, %s8022_s16 }
 0x890   : > { %7101 = vmatpush3.bf16.msra.mxu1 %v10145_v43  ;;  %4652 = vrot.lane.b32.xlu1 %v11662_v16, %s8023_s17 }
 0x891   : > { %7102 = vmatprep.subr.bf16.mxu1 %v10165_v18 }
 0x893   : > { %4650 = vrot.lane.b32.xlu0 %v8157_v47, %s8023_s17 }
 0x894   : > { %7103 = vmatpush3.bf16.msra.mxu1 %v10165_v18  ;;  %4767 = vrot.lane.b32.xlu1 %v8195_v13, %s8022_s16 }
 0x895   : > { %7340 = vmatprep.subr.msk.bf16.mxu1 %vm693_vm1, %v10171_v23 }
 0x897   : > { %4866 = vrot.lane.b32.xlu0 %v8209_v25, %s8022_s16 }
 0x898   : > { %4753 = vrot.lane.b32.xlu1 %v8185_v4, %s8023_s17 }
 0x89b   : > { %v3934_v52 = vpop.xlane.xlu1 %3933  ;;  %4654 = vrot.lane.b32.xlu0 %v8171_v57, %s8023_s17 }
 0x89c   : > { %4870 = vrot.lane.b32.xlu1 %v8221_v39, %s8022_s16 }
 0x89f   : > { %v3937_v18 = vpop.xlane.xlu1 %3936  ;;  %4868 = vrot.lane.b32.xlu0 %v8207_v24, %s8022_s16  ;;  %v3928_v49 = vpop.xlane.xlu0 %3927 }
 0x8a0   : > { %4759 = vrot.lane.b32.xlu1 %v8195_v13, %s8023_s17  ;;  %7726 = vrcp.f32 %v3937_v18 }
 0x8a1   : > { %7728 = vrcp.f32 %v3928_v49 }
 0x8a2   : > { %7730 = vrcp.f32 %v3934_v52 }
 0x8a3   : > { %v3931_v43 = vpop.xlane.xlu1 %3930  ;;  %4755 = vrot.lane.b32.xlu0 %v8183_v3, %s8023_s17 }
 0x8a4   : > { %7732 = vrcp.f32 %v3931_v43  ;;  %4858 = vrot.lane.b32.xlu1 %v8209_v25, %s8023_s17  ;;  %v11726_v43 = vld [vmem:[#allocation5_spill] sm:$0xff] }
 0x8a5   : > { %v3949_v11 = vpop.xlane.xlu0 %3948 }
 0x8a7   : > { %v3946_v31 = vpop.xlane.xlu1 %3945  ;;  %4757 = vrot.lane.b32.xlu0 %v8197_v14, %s8023_s17 }
 0x8a8   : > { %4862 = vrot.lane.b32.xlu1 %v8221_v39, %s8023_s17  ;;  %7734 = vrcp.f32 %v3946_v31 }
 0x8aa   : > { %v7727_v17 = vpop.eup %7726 }
 0x8ab   : > { %v3940_v2 = vpop.xlane.xlu1 %3939  ;;  %4872 = vrot.lane.b32.xlu0 %v11663_v22, %s8022_s16  ;;  %v7729_v61 = vpop.eup %7728  ;;  %v4049_v45 = vmul.f32 %v7727_v17, %v10231_v56  ;;  %s8025_s16 = smov 8  }
 0x8ac   : > { %5406 = vrot.lane.b32.xlu1 %v11724_v41, %s8024_s11  ;;  %v7731_v60 = vpop.eup %7730  ;;  %v3958_v36 = vpop.xlane.xlu0 %3957  ;;  %7736 = vrcp.f32 %v3940_v2  ;;  %v4046_v10 = vmul.f32 %v7729_v61, %v10234_v32 }
 0x8ad   : > { %7738 = vrcp.f32 %v3949_v11  ;;  %v4048_v19 = vmul.f32 %v7731_v60, %v10226_v0 }
 0x8ae   : > { %v7733_v6 = vpop.eup %7732 }
 0x8af   : > { %v3943_v26 = vpop.xlane.xlu1 %3942  ;;  %4860 = vrot.lane.b32.xlu0 %v8207_v24, %s8023_s17  ;;  %v4047_v58 = vmul.f32 %v7733_v6, %v10240_v42  ;;  %v4077_v51 = vpack.c.bf16 %v4049_v45, %v4048_v19  ;;  %v11725_v42 = vld [vmem:[#allocation4_spill] sm:$0xff] }
 0x8b0   : > { %7740 = vrcp.f32 %v3943_v26  ;;  %5493 = vrot.lane.b32.xlu1 %v8159_v48, %s8024_s11  ;;  %v11728_v26 = vld [vmem:[#allocation39_spill] sm:$0xff] }
 0x8b1   : > { %v3955_v1 = vpop.xlane.xlu0 %3954  ;;  %v4076_v30 = vpack.c.bf16 %v4047_v58, %v4046_v10  ;;  %v11729_v58 = vld [vmem:[#allocation40_spill] sm:$0xff] }
 0x8b2   : > { %7742 = vrcp.f32 %v3955_v1  ;;  %v7735_v48 = vpop.eup %7734 }
 0x8b3   : > { %v3952_v56 = vpop.xlane.xlu1 %3951  ;;  %4864 = vrot.lane.b32.xlu0 %v11663_v22, %s8023_s17  ;;  %7076 = vmatprep.mubr.msk.bf16.mxu1 %vm1158_vm2, %v4076_v30  ;;  %v4052_v49 = vmul.f32 %v7735_v48, %v10245_v44  ;;  %s8026_s17 = smov 16  }
 0x8b4   : > { %7744 = vrcp.f32 %v3952_v56  ;;  %5495 = vrot.lane.b32.xlu1 %v8157_v47, %s8024_s11  ;;  %7077 = vmatmul.mubr.msk.bf16.gmra.mrb[76].mxu1 %vm1158_vm2, %v4077_v51  ;;  %v11730_v56 = vld [vmem:[#allocation41_spill] sm:$0xff] }
 0x8b5   : > { %v3973_v32 = vpop.xlane.xlu0 %3972  ;;  %7746 = vrcp.f32 %v3958_v36 }
 0x8b6   : > { %v7737_v53 = vpop.eup %7736 }
 0x8b7   : > { %v3961_v0 = vpop.xlane.xlu1 %3960  ;;  %5404 = vrot.lane.b32.xlu0 %v11725_v42, %s8024_s11  ;;  %v7739_v21 = vpop.eup %7738  ;;  %v4050_v31 = vmul.f32 %v7737_v53, %v10257_v33 }
 0x8b8   : > { %7748 = vrcp.f32 %v3961_v0  ;;  %5499 = vrot.lane.b32.xlu1 %v8171_v57, %s8024_s11  ;;  %v4053_v2 = vmul.f32 %v7739_v21, %v10249_v50 }
 0x8b9   : > { %v3967_v52 = vpop.xlane.xlu0 %3966 }
 0x8ba   : > { %v7741_v18 = vpop.eup %7740  ;;  %v4079_v60 = vpack.c.bf16 %v4053_v2, %v4052_v49 }
 0x8bb   : > { %v3970_v47 = vpop.xlane.xlu1 %3969  ;;  %5408 = vrot.lane.b32.xlu0 %v11726_v43, %s8024_s11  ;;  %v4051_v11 = vmul.f32 %v7741_v18, %v10267_v9  ;;  %v11731_v18 = vld [vmem:[#allocation43_spill] sm:$0xff]  ;;  %v11732_v43 = vld [vmem:[#allocation42_spill] sm:$0xff] }
 0x8bc   : > { %v7743_v17 = vpop.eup %7742  ;;  %5584 = vrot.lane.b32.xlu1 %v8183_v3, %s8024_s11  ;;  %7750 = vrcp.f32 %v3970_v47  ;;  %v11727_v3 = vld [vmem:[#allocation17_spill] sm:$0xff] }
 0x8bd   : > { %v3982_v57 = vpop.xlane.xlu0 %3981  ;;  %v4078_v61 = vpack.c.bf16 %v4051_v11, %v4050_v31  ;;  %7752 = vrcp.f32 %v3967_v52  ;;  %v4055_v50 = vmul.f32 %v7743_v17, %v10274_v5 }
 0x8be   : > { %v7745_v41 = vpop.eup %7744  ;;  %7754 = vrcp.f32 %v3973_v32 }
 0x8bf   : > { %7088 = vmatprep.mubr.msk.bf16.mxu0 %vm1158_vm2, %v4078_v61  ;;  %v3964_v44 = vpop.xlane.xlu1 %3963  ;;  %5410 = vrot.lane.b32.xlu0 %v8145_v37, %s8024_s11  ;;  %v4054_v33 = vmul.f32 %v7745_v41, %v10270_v8  ;;  %v7747_v9 = vpop.eup %7746  ;;  %v11733_v41 = vld [vmem:[#allocation47_spill] sm:$0xff] }
 0x8c0   : > { %7756 = vrcp.f32 %v3964_v44  ;;  %5588 = vrot.lane.b32.xlu1 %v8195_v13, %s8024_s11  ;;  %7089 = vmatmul.mubr.msk.bf16.vlgmr.msra.gmra.mrb[120].mxu0 %vm1158_vm2, %v4079_v60  ;;  %v4056_v8 = vmul.f32 %v7747_v9, %v10259_v63  ;;  %v11734_v60 = vld [vmem:[#allocation52_spill] sm:$0xff]  ;;  %v4677_v9 = vsel %vm693_vm1, %v11731_v18, 0 }
 0x8c1   : > { %7113 = vmatpush3.bf16.msra.mxu0 %v11727_v3  ;;  %v3976_v36 = vpop.xlane.xlu0 %3975  ;;  %v4080_v6 = vpack.c.bf16 %v4055_v50, %v4054_v33  ;;  %v11735_v33 = vld [vmem:[#allocation44_spill] sm:$0xff]  ;;  %v11736_v3 = vld [vmem:[#allocation46_spill] sm:$0xff] }
 0x8c2   : > { %v7749_v45 = vpop.eup %7748  ;;  %7114 = vmatprep.subr.bf16.mxu0 %v11728_v26  ;;  %7758 = vrcp.f32 %v3976_v36  ;;  %v4680_v36 = vsel %vm693_vm1, %v11736_v3, 0 }
 0x8c3   : > { %v3979_v37 = vpop.xlane.xlu1 %3978  ;;  %5497 = vrot.lane.b32.xlu0 %v11662_v16, %s8024_s11  ;;  %7092 = vmatprep.mubr.msk.bf16.mxu0 %vm1158_vm2, %v4080_v6  ;;  %v4057_v13 = vmul.f32 %v7749_v45, %v10281_v38  ;;  %v11738_v6 = vld [vmem:[#allocation49_spill] sm:$0xff] }
 0x8c4   : > { %7760 = vrcp.f32 %v3979_v37  ;;  %v4683_v37 = vsel %vm693_vm1, %v11738_v6, 0 }
 0x8c5   : > { %7115 = vmatpush3.bf16.msra.mxu0 %v11728_v26  ;;  %v3985_v5 = vpop.xlane.xlu0 %3984  ;;  %v4081_v10 = vpack.c.bf16 %v4057_v13, %v4056_v8  ;;  %v11739_v26 = vld [vmem:[#allocation50_spill] sm:$0xff]  ;;  %v11740_v13 = vld [vmem:[#allocation48_spill] sm:$0xff] }
 0x8c6   : > { %7116 = vmatprep.subr.bf16.mxu0 %v11729_v58  ;;  %7762 = vrcp.f32 %v3985_v5  ;;  %v7751_v19 = vpop.eup %7750  ;;  %v4782_v5 = vsel %vm693_vm1, %v11739_v26, 0 }
 0x8c7   : > { %7764 = vrcp.f32 %v3982_v57  ;;  %v3997_v1 = vpop.xlane.xlu1 %3996  ;;  %5582 = vrot.lane.b32.xlu0 %v8185_v4, %s8024_s11  ;;  %v7753_v16 = vpop.eup %7752  ;;  %v4060_v51 = vmul.f32 %v7751_v19, %v10291_v59 }
 0x8c8   : > { %7093 = vmatmul.mubr.msk.bf16.gmra.mrb[124].mxu0 %vm1158_vm2, %v4081_v10  ;;  %v7755_v63 = vpop.eup %7754  ;;  %v4059_v4 = vmul.f32 %v7753_v16, %v10295_v55  ;;  %v11741_v10 = vld [vmem:[#allocation51_spill] sm:$0xff] }
 0x8c9   : > { %7117 = vmatpush3.bf16.msra.mxu0 %v11729_v58  ;;  %v3994_v38 = vpop.xlane.xlu0 %3993  ;;  %v4061_v42 = vmul.f32 %v7755_v63, %v10285_v15  ;;  %v4572_v15 = vsel %vm693_vm1, %v10171_v23, 0  ;;  %v4575_v23 = vsel %vm693_vm1, %v11732_v43, 0 }
 0x8ca   : > { %v7757_v30 = vpop.eup %7756  ;;  %7118 = vmatprep.subr.bf16.mxu0 %v11730_v56  ;;  %7766 = vrcp.f32 %v3994_v38 }
 0x8cb   : > { %v3991_v32 = vpop.xlane.xlu1 %3990  ;;  %5586 = vrot.lane.b32.xlu0 %v8197_v14, %s8024_s11  ;;  %v4058_v48 = vmul.f32 %v7757_v30, %v10305_v27  ;;  %v4083_v52 = vpack.c.bf16 %v4061_v42, %v4060_v51 }
 0x8cc   : > { %v7759_v0 = vpop.eup %7758  ;;  %7768 = vrcp.f32 %v3991_v32 }
 0x8cd   : > { %7770 = vrcp.f32 %v3997_v1  ;;  %7119 = vmatpush3.bf16.msra.mxu0 %v11730_v56  ;;  %v3988_v53 = vpop.xlane.xlu0 %3987  ;;  %v4082_v59 = vpack.c.bf16 %v4059_v4, %v4058_v48  ;;  %v4062_v14 = vmul.f32 %v7759_v0, %v10309_v29 }
 0x8ce   : > { %v7761_v21 = vpop.eup %7760  ;;  %7344 = vmatprep.subr.msk.bf16.mxu0 %vm693_vm1, %v11731_v18  ;;  %7772 = vrcp.f32 %v3988_v53 }
 0x8cf   : > { %7104 = vmatprep.mubr.msk.bf16.mxu1 %vm1158_vm2, %v4082_v59  ;;  %v4063_v55 = vmul.f32 %v7761_v21, %v10313_v35  ;;  %v4663_v8 = vpop.permute.xlu1 %4662 }
 0x8d0   : > { %v7763_v27 = vpop.eup %7762  ;;  %7105 = vmatmul.mubr.msk.bf16.vlgmr.msra.gmra.mrb[80].mxu1 %vm1158_vm2, %v4083_v52  ;;  %v4686_v58 = vsel %vm693_vm1, %v4663_v8, 0 }
 0x8d1   : > { %v7765_v49 = vpop.eup %7764  ;;  %7129 = vmatpush3.bf16.xpose.msra.mxu1 %v4572_v15  ;;  %v4084_v47 = vpack.c.bf16 %v4063_v55, %v4062_v14  ;;  %v4065_v31 = vmul.f32 %v7763_v27, %v10317_v46  ;;  %v4550_v19 = vpop.permute.xlu0 %4549 }
 0x8d2   : > { %7341 = vmatprep.subr.msk.bf16.mxu1 %vm693_vm1, %v11732_v43  ;;  %v4064_v29 = vmul.f32 %v7765_v49, %v10300_v12 }
 0x8d3   : > { %7108 = vmatprep.mubr.msk.bf16.mxu1 %vm1158_vm2, %v4084_v47 }
 0x8d4   : > { %v7767_v11 = vpop.eup %7766  ;;  %v4085_v17 = vpack.c.bf16 %v4065_v31, %v4064_v29 }
 0x8d5   : > { %v4068_v61 = vmul.f32 %v7767_v11, %v10325_v40 }
 0x8d6   : > { %v7769_v35 = vpop.eup %7768 }
 0x8d7   : > { %v7771_v2 = vpop.eup %7770  ;;  %v4067_v12 = vmul.f32 %v7769_v35, %v10329_v20  ;;  %v4578_v20 = vsel %vm693_vm1, %v11735_v33, 0 }
 0x8d8   : > { %v7773_v57 = vpop.eup %7772  ;;  %7109 = vmatmul.mubr.msk.bf16.gmra.mrb[84].mxu1 %vm1158_vm2, %v4085_v17  ;;  %v4069_v44 = vmul.f32 %v7771_v2, %v11734_v60 }
 0x8d9   : > { %7131 = vmatpush3.bf16.xpose.msra.mxu1 %v4575_v23  ;;  %7136 = vmatprep.mubr.msk.bf16.mxu1 %vm693_vm1, %v11733_v41  ;;  %v4066_v46 = vmul.f32 %v7773_v57, %v10333_v62  ;;  %v11737_v62 = vld [vmem:[#allocation45_spill] sm:$0xff] }
 0x8da   : > { %7342 = vmatprep.subr.msk.bf16.mxu1 %vm693_vm1, %v11735_v33  ;;  %v4087_v40 = vpack.c.bf16 %v4069_v44, %v4068_v61  ;;  %v4581_v45 = vsel %vm693_vm1, %v11737_v62, 0 }
 0x8db   : > { %v4086_v50 = vpack.c.bf16 %v4067_v12, %v4066_v46 }
 0x8dd   : > { %7120 = vmatprep.mubr.msk.bf16.mxu0 %vm1158_vm2, %v4086_v50 }
 0x8de   : > { %7121 = vmatmul.mubr.msk.bf16.vlgmr.msra.gmra.mrb[128].mxu0 %vm1158_vm2, %v4087_v40 }
 0x8df   : > { %7145 = vmatpush3.bf16.xpose.msra.mxu0 %v4677_v9 }
 0x8e0   : > { %7345 = vmatprep.subr.msk.bf16.mxu0 %vm693_vm1, %v11736_v3 }
 0x8e1   : > { %7133 = vmatpush3.bf16.xpose.msra.mxu1 %v4578_v20 }
 0x8e2   : > { %7343 = vmatprep.subr.msk.bf16.mxu1 %vm693_vm1, %v11737_v62 }
 0x8e7   : > { %7147 = vmatpush3.bf16.xpose.msra.mxu0 %v4680_v36 }
 0x8e8   : > { %7346 = vmatprep.subr.msk.bf16.mxu0 %vm693_vm1, %v11738_v6 }
 0x8e9   : > { %7135 = vmatpush3.bf16.xpose.msra.mxu1 %v4581_v45 }
 0x8ea   : > { %7348 = vmatprep.subr.msk.bf16.mxu1 %vm693_vm1, %v11739_v26 }
 0x8ef   : > { %7149 = vmatpush3.bf16.xpose.msra.mxu0 %v4683_v37 }
 0x8f0   : > { %7137 = vmatmul.mubr.msk.bf16.vlgmr.msra.gmra.mrb[88].mxu1 %vm693_vm1, %v11740_v13  ;;  %7347 = vmatprep.subr.msk.bf16.mxu0 %vm693_vm1, %v4663_v8 }
 0x8f1   : > { %7140 = vmatprep.mubr.msk.bf16.mxu1 %vm693_vm1, %v11741_v10  ;;  %7161 = vmatpush3.bf16.xpose.msra.mxu1 %v4782_v5 }
 0x8f7   : > { %7151 = vmatpush3.bf16.xpose.msra.mxu0 %v4686_v58 }
 0x8f8   : > { %7141 = vmatmul.mubr.msk.bf16.gmra.mrb[92].mxu1 %vm693_vm1, %v4550_v19 }
 0x900   : > { %v4000_v1 = vpop.xlane.xlu1 %3999 }
 0x901   : > { %7774 = vrcp.f32 %v4000_v1 }
 0x902   : > { %v4006_v16 = vpop.xlane.xlu0 %4005 }
 0x904   : > { %v4009_v63 = vpop.xlane.xlu1 %4008 }
 0x905   : > { %7776 = vrcp.f32 %v4009_v63 }
 0x906   : > { %7778 = vrcp.f32 %v4006_v16  ;;  %v4003_v38 = vpop.xlane.xlu0 %4002 }
 0x907   : > { %7780 = vrcp.f32 %v4003_v38 }
 0x908   : > { %v4649_v30 = vpop.permute.xlu1 %4648 }
 0x90a   : > { %v4764_v51 = vpop.permute.xlu0 %4763 }
 0x90b   : > { %7349 = vmatprep.subr.msk.bf16.mxu1 %vm693_vm1, %v4764_v51  ;;  %v4785_v56 = vsel %vm693_vm1, %v4764_v51, 0  ;;  %v7775_v48 = vpop.eup %7774 }
 0x90c   : > { %v4766_v32 = vpop.permute.xlu1 %4765  ;;  %7163 = vmatpush3.bf16.xpose.msra.mxu1 %v4785_v56  ;;  %v4070_v18 = vmul.f32 %v7775_v48, %v10347_v28 }
 0x90d   : > { %7350 = vmatprep.subr.msk.bf16.mxu1 %vm693_vm1, %v4766_v32  ;;  %v4788_v55 = vsel %vm693_vm1, %v4766_v32, 0 }
 0x90e   : > { %v4651_v4 = vpop.permute.xlu0 %4650 }
 0x90f   : > { %v7777_v0 = vpop.eup %7776 }
 0x910   : > { %v7779_v42 = vpop.eup %7778  ;;  %v4653_v53 = vpop.permute.xlu1 %4652  ;;  %v4073_v21 = vmul.f32 %v7777_v0, %v10353_v34 }
 0x911   : > { %v7781_v59 = vpop.eup %7780  ;;  %v4072_v27 = vmul.f32 %v7779_v42, %v10349_v54 }
 0x912   : > { %v4867_v52 = vpop.permute.xlu0 %4866  ;;  %v4071_v14 = vmul.f32 %v7781_v59, %v10357_v7 }
 0x913   : > { %7352 = vmatprep.subr.msk.bf16.mxu0 %vm693_vm1, %v4867_v52  ;;  %v4089_v47 = vpack.c.bf16 %v4073_v21, %v4072_v27  ;;  %v4887_v29 = vsel %vm693_vm1, %v4867_v52, 0 }
 0x914   : > { %v4768_v15 = vpop.permute.xlu1 %4767  ;;  %7165 = vmatpush3.bf16.xpose.msra.mxu1 %v4788_v55  ;;  %v4088_v49 = vpack.c.bf16 %v4071_v14, %v4070_v18  ;;  %v7981_v18 = vld [vmem:[%s11516_s6 + $0x28] sm:$0xff] }
 0x915   : > { %7351 = vmatprep.subr.msk.bf16.mxu1 %vm693_vm1, %v4768_v15  ;;  %v4791_v43 = vsel %vm693_vm1, %v4768_v15, 0 }
 0x916   : > { %7124 = vmatprep.mubr.msk.bf16.mxu0 %vm1158_vm2, %v4088_v49  ;;  %v4655_v34 = vpop.permute.xlu0 %4654 }
 0x917   : > { %7125 = vmatmul.mubr.msk.bf16.gmra.mrb[132].mxu0 %vm1158_vm2, %v4089_v47 }
 0x918   : > { %v4754_v28 = vpop.permute.xlu1 %4753  ;;  %7152 = vmatprep.mubr.msk.bf16.mxu0 %vm693_vm1, %v4649_v30 }
 0x919   : > { %7168 = vmatprep.mubr.msk.bf16.mxu1 %vm693_vm1, %v4754_v28 }
 0x91a   : > { %v4869_v7 = vpop.permute.xlu0 %4868 }
 0x91b   : > { %v4890_v57 = vsel %vm693_vm1, %v4869_v7, 0 }
 0x91c   : > { %v4871_v54 = vpop.permute.xlu1 %4870  ;;  %7167 = vmatpush3.bf16.xpose.msra.mxu1 %v4791_v43 }
 0x91d   : > { %v4893_v46 = vsel %vm693_vm1, %v4871_v54, 0 }
 0x91e   : > { %v4756_v31 = vpop.permute.xlu0 %4755 }
 0x91f   : > { %7153 = vmatmul.mubr.msk.bf16.vlgmr.msra.gmra.mrb[136].mxu0 %vm693_vm1, %v4651_v4 }
 0x920   : > { %7177 = vmatpush3.bf16.xpose.msra.mxu0 %v4887_v29  ;;  %v4760_v11 = vpop.permute.xlu1 %4759  ;;  %7156 = vmatprep.mubr.msk.bf16.mxu0 %vm693_vm1, %v4653_v53 }
 0x921   : > { %7353 = vmatprep.subr.msk.bf16.mxu0 %vm693_vm1, %v4869_v7 }
 0x922   : > { %v4758_v35 = vpop.permute.xlu0 %4757 }
 0x923   : > { %7169 = vmatmul.mubr.msk.bf16.vlgmr.msra.gmra.mrb[96].mxu1 %vm693_vm1, %v4756_v31 }
 0x924   : > { %7172 = vmatprep.mubr.msk.bf16.mxu1 %vm693_vm1, %v4758_v35  ;;  %v4859_v17 = vpop.permute.xlu1 %4858  ;;  %v10644_v35 = vld [vmem:[%s11515_s5 + $0xd0] sm:$0xff] }
 0x926   : > { %v4873_v2 = vpop.permute.xlu0 %4872 }
 0x927   : > { %7157 = vmatmul.mubr.msk.bf16.gmra.mrb[140].mxu0 %vm693_vm1, %v4655_v34  ;;  %v4896_v33 = vsel %vm693_vm1, %v4873_v2, 0 }
 0x928   : > { %7179 = vmatpush3.bf16.xpose.msra.mxu0 %v4890_v57  ;;  %7184 = vmatprep.mubr.msk.bf16.mxu0 %vm693_vm1, %v4859_v17  ;;  %v4863_v23 = vpop.permute.xlu1 %4862  ;;  %v10649_v17 = vld [vmem:[%s11515_s5 + $0xc0] sm:$0xff] }
 0x929   : > { %7354 = vmatprep.subr.msk.bf16.mxu0 %vm693_vm1, %v4871_v54 }
 0x92a   : > { %v4861_v61 = vpop.permute.xlu0 %4860 }
 0x92b   : > { %7173 = vmatmul.mubr.msk.bf16.gmra.mrb[100].mxu1 %vm693_vm1, %v4760_v11 }
 0x92c   : > { %v5407_v12 = vpop.permute.xlu1 %5406 }
 0x92e   : > { %v4865_v41 = vpop.permute.xlu0 %4864 }
 0x930   : > { %7181 = vmatpush3.bf16.xpose.msra.mxu0 %v4893_v46  ;;  %v5494_v50 = vpop.permute.xlu1 %5493 }
 0x931   : > { %7355 = vmatprep.subr.msk.bf16.mxu0 %vm693_vm1, %v4873_v2  ;;  %v7974_v2 = vld [vmem:[%s11516_s6 + $0x10] sm:$0xff] }
 0x932   : > { %v5405_v60 = vpop.permute.xlu0 %5404  ;;  %v4974_v57 = vadd.f32 %v7974_v2, %v10644_v35  ;;  %v10684_v2 = vld [vmem:[%s11515_s5 + $0xf0] sm:$0xff] }
 0x933   : > { %7192 = vmatprep.subr.bf16.mxu1 %v5405_v60 }
 0x934   : > { %7193 = vmatpush3.bf16.msra.mxu1 %v5405_v60  ;;  %v5496_v3 = vpop.permute.xlu1 %5495  ;;  %v7976_v60 = vld [vmem:[%s11516_s6 + $0x18] sm:$0xff] }
 0x935   : > { %7194 = vmatprep.subr.bf16.mxu1 %v5407_v12 }
 0x936   : > { %v5409_v44 = vpop.permute.xlu0 %5408 }
 0x938   : > { %7183 = vmatpush3.bf16.xpose.msra.mxu0 %v4896_v33  ;;  %7195 = vmatpush3.bf16.msra.mxu1 %v5407_v12  ;;  %v5500_v62 = vpop.permute.xlu1 %5499  ;;  %v7977_v33 = vld [vmem:[%s11516_s6 + $0x8] sm:$0xff] }
 0x939   : > { %7208 = vmatprep.subr.bf16.mxu0 %v5494_v50  ;;  %7196 = vmatprep.subr.bf16.mxu1 %v5409_v44 }
 0x93a   : > { %v5411_v40 = vpop.permute.xlu0 %5410 }
 0x93c   : > { %7197 = vmatpush3.bf16.msra.mxu1 %v5409_v44 }
 0x93d   : > { %7198 = vmatprep.subr.bf16.mxu1 %v5411_v40 }
 0x93e   : > { %v5498_v9 = vpop.permute.xlu0 %5497 }
 0x93f   : > { %7185 = vmatmul.mubr.msk.bf16.vlgmr.msra.gmra.mrb[144].mxu0 %vm693_vm1, %v4861_v61  ;;  %v10658_v61 = vld [vmem:[%s11515_s5 + $0xd8] sm:$0xff] }
 0x940   : > { %7188 = vmatprep.mubr.msk.bf16.mxu0 %vm693_vm1, %v4863_v23  ;;  %7209 = vmatpush3.bf16.msra.mxu0 %v5494_v50  ;;  %v10663_v23 = vld [vmem:[%s11515_s5 + $0xc8] sm:$0xff]  ;;  %v4975_v44 = vadd.f32 %v7976_v60, %v10658_v61 }
 0x941   : > { %7199 = vmatpush3.bf16.msra.mxu1 %v5411_v40  ;;  %7210 = vmatprep.subr.bf16.mxu0 %v5496_v3  ;;  %v4973_v50 = vadd.f32 %v7977_v33, %v10663_v23 }
 0x942   : > { %v10553_v20 = vpop.permute.xlu0 %5582 }
 0x943   : > { %11742 = vst [vmem:[#allocation3_spill] sm:$0xff] %v10553_v20  ;;  %7224 = vmatprep.subr.bf16.mxu1 %v10553_v20 }
 0x944   : > { %7211 = vmatpush3.bf16.msra.mxu0 %v5496_v3 }
 0x945   : > { %7212 = vmatprep.subr.bf16.mxu0 %v5498_v9 }
 0x947   : > { %7189 = vmatmul.mubr.msk.bf16.gmra.mrb[148].mxu0 %vm693_vm1, %v4865_v41  ;;  %v7975_v41 = vld [vmem:[%s11516_s6] sm:$0xff] }
 0x948   : > { %7213 = vmatpush3.bf16.msra.mxu0 %v5498_v9  ;;  %v4972_v46 = vadd.f32 %v7975_v41, %v10649_v17 }
 0x949   : > { %7214 = vmatprep.subr.bf16.mxu0 %v5500_v62 }
 0x94c   : > { %7215 = vmatpush3.bf16.msra.mxu0 %v5500_v62 }
 0x95a   : > { %v10557_v36 = vpop.f32.mrb[72].mxu1 }
 0x95b   : > { %v10559_v6 = vpop.f32.mrb[73].mxu1 }
 0x95c   : > { %v10561_v45 = vpop.f32.mrb[74].mxu1 }
 0x95d   : > { %v10565_v37 = vpop.f32.mrb[75].mxu1 }
 0x987   : > { %v10569_v13 = vpop.f32.mrb[76].mxu1 }
 0x988   : > { %v10571_v5 = vpop.f32.mrb[77].mxu1 }
 0x989   : > { %v10573_v10 = vpop.f32.mrb[78].mxu1 }
 0x98a   : > { %v10577_v19 = vpop.f32.mrb[79].mxu1 }
 0x993   : > { %v10581_v16 = vpop.f32.mrb[120].mxu0 }
 0x994   : > { %v10583_v63 = vpop.f32.mrb[121].mxu0 }
 0x995   : > { %v10585_v38 = vpop.f32.mrb[122].mxu0 }
 0x996   : > { %v10589_v51 = vpop.f32.mrb[123].mxu0 }
 0x99b   : > { %v10593_v32 = vpop.f32.mrb[124].mxu0 }
 0x99c   : > { %v10595_v48 = vpop.f32.mrb[125].mxu0 }
 0x99d   : > { %v10597_v4 = vpop.f32.mrb[126].mxu0 }
 0x99e   : > { %v10601_v42 = vpop.f32.mrb[127].mxu0 }
 0x9a3   : > { %v10605_v59 = vpop.f32.mrb[80].mxu1 }
 0x9a4   : > { %11743 = vst [vmem:[#allocation4_spill] sm:$0xff] %v10605_v59  ;;  %v10607_v21 = vpop.f32.mrb[81].mxu1 }
 0x9a5   : > { %11744 = vst [vmem:[#allocation5_spill] sm:$0xff] %v10607_v21  ;;  %v10609_v52 = vpop.f32.mrb[82].mxu1 }
 0x9a6   : > { %11745 = vst [vmem:[#allocation17_spill] sm:$0xff] %v10609_v52  ;;  %v10613_v14 = vpop.f32.mrb[83].mxu1 }
 0x9a7   : > { %11746 = vst [vmem:[#allocation39_spill] sm:$0xff] %v10613_v14 }
 0x9ab   : > { %v10617_v27 = vpop.f32.mrb[84].mxu1 }
 0x9ac   : > { %11747 = vst [vmem:[#allocation40_spill] sm:$0xff] %v10617_v27  ;;  %v10619_v15 = vpop.f32.mrb[85].mxu1 }
 0x9ad   : > { %11748 = vst [vmem:[#allocation41_spill] sm:$0xff] %v10619_v15  ;;  %v10621_v49 = vpop.f32.mrb[86].mxu1 }
 0x9ae   : > { %11749 = vst [vmem:[#allocation43_spill] sm:$0xff] %v10621_v49  ;;  %v10625_v34 = vpop.f32.mrb[87].mxu1 }
 0x9af   : > { %11750 = vst [vmem:[#allocation42_spill] sm:$0xff] %v10625_v34 }
 0x9b1   : > { %v10629_v7 = vpop.f32.mrb[128].mxu0 }
 0x9b2   : > { %11751 = vst [vmem:[#allocation47_spill] sm:$0xff] %v10629_v7  ;;  %v10631_v43 = vpop.f32.mrb[129].mxu0 }
 0x9b3   : > { %11752 = vst [vmem:[#allocation52_spill] sm:$0xff] %v10631_v43  ;;  %v10633_v54 = vpop.f32.mrb[130].mxu0 }
 0x9b4   : > { %11753 = vst [vmem:[#allocation44_spill] sm:$0xff] %v10633_v54  ;;  %v10637_v29 = vpop.f32.mrb[131].mxu0  ;;  %v7989_v54 = vld [vmem:[%s11516_s6 + $0x68] sm:$0xff] }
 0x9b5   : > { %11754 = vst [vmem:[#allocation46_spill] sm:$0xff] %v10637_v29 }
 0x9c3   : > { %v7138_v12 = vpop.f32.mrb[88].mxu1 }
 0x9c4   : > { %v10677_v40 = vadd.f32 %v7138_v12, %v4974_v57  ;;  %v4617_v9 = vpop.f32.mrb[89].mxu1  ;;  %v10702_v12 = vld [vmem:[%s11515_s5 + $0xf8] sm:$0xff] }
 0x9c5   : > { %v10679_v3 = vadd.f32 %v4972_v46, %v4617_v9  ;;  %v7139_v62 = vpop.f32.mrb[90].mxu1  ;;  %v10697_v46 = vld [vmem:[%s11515_s5 + $0xe0] sm:$0xff]  ;;  %v10713_v9 = vld [vmem:[%s11515_s5 + $0xe8] sm:$0xff] }
 0x9c6   : > { %v4620_v41 = vpop.f32.mrb[91].mxu1  ;;  %v5042_v60 = vsel %vm1158_vm2, %v10677_v40, -inf  ;;  %v10688_v11 = vadd.f32 %v7139_v62, %v4975_v44  ;;  %v7978_v44 = vld [vmem:[%s11516_s6 + $0x30] sm:$0xff]  ;;  %v7979_v62 = vld [vmem:[%s11516_s6 + $0x20] sm:$0xff] }
 0x9c7   : > { %v10690_v31 = vadd.f32 %v4973_v50, %v4620_v41  ;;  %5043 = vmax.xlane.f32.xlu0 %v5042_v60  ;;  %v5036_v57 = vsel %vm1158_vm2, %v10679_v3, -inf  ;;  %v4978_v33 = vadd.f32 %v7978_v44, %v10684_v2  ;;  %v4976_v41 = vadd.f32 %v7979_v62, %v10697_v46  ;;  %v7980_v60 = vld [vmem:[%s11516_s6 + $0x38] sm:$0xff] }
 0x9c8   : > { %5037 = vmax.xlane.f32.xlu1 %v5036_v57  ;;  %v4979_v57 = vadd.f32 %v7980_v60, %v10702_v12  ;;  %v5045_v28 = vsel %vm1158_vm2, %v10688_v11, -inf  ;;  %v4977_v62 = vadd.f32 %v7981_v18, %v10713_v9 }
 0x9c9   : > { %v5039_v50 = vsel %vm1158_vm2, %v10690_v31, -inf }
 0x9cb   : > { %5040 = vmax.xlane.f32.xlu0 %v5039_v50  ;;  %v7142_v44 = vpop.f32.mrb[92].mxu1 }
 0x9cc   : > { %v10725_v47 = vadd.f32 %v7142_v44, %v4978_v33  ;;  %5046 = vmax.xlane.f32.xlu1 %v5045_v28  ;;  %v4633_v55 = vpop.f32.mrb[93].mxu1 }
 0x9cd   : > { %v7143_v0 = vpop.f32.mrb[94].mxu1  ;;  %v10731_v30 = vadd.f32 %v4976_v41, %v4633_v55 }
 0x9ce   : > { %v10733_v53 = vadd.f32 %v7143_v0, %v4979_v57  ;;  %v4636_v50 = vpop.f32.mrb[95].mxu1  ;;  %v5054_v60 = vsel %vm1158_vm2, %v10725_v47, -inf  ;;  %v7984_v57 = vld [vmem:[%s11516_s6 + $0x58] sm:$0xff] }
 0x9cf   : > { %5055 = vmax.xlane.f32.xlu0 %v5054_v60  ;;  %v10737_v33 = vadd.f32 %v4977_v62, %v4636_v50  ;;  %v5048_v44 = vsel %vm1158_vm2, %v10731_v30, -inf  ;;  %v7982_v60 = vld [vmem:[%s11516_s6 + $0x50] sm:$0xff]  ;;  %v4983_v58 = vadd.f32 %v7984_v57, %v10658_v61 }
 0x9d0   : > { %v5057_v28 = vsel %vm1158_vm2, %v10733_v53, -inf }
 0x9d1   : > { %5058 = vmax.xlane.f32.xlu1 %v5057_v28  ;;  %v5051_v18 = vsel %vm1158_vm2, %v10737_v33, -inf  ;;  %v4982_v28 = vadd.f32 %v7982_v60, %v10644_v35  ;;  %v7985_v60 = vld [vmem:[%s11516_s6 + $0x48] sm:$0xff] }
 0x9d2   : > { %v4981_v1 = vadd.f32 %v7985_v60, %v10663_v23  ;;  %v7986_v60 = vld [vmem:[%s11516_s6 + $0x70] sm:$0xff] }
 0x9d3   : > { %5049 = vmax.xlane.f32.xlu0 %v5048_v44  ;;  %v7983_v44 = vld [vmem:[%s11516_s6 + $0x40] sm:$0xff] }
 0x9d5   : > { %5052 = vmax.xlane.f32.xlu1 %v5051_v18  ;;  %v4980_v18 = vadd.f32 %v7983_v44, %v10649_v17 }
 0x9ea   : > { %v10745_v0 = vpop.f32.mrb[132].mxu0 }
 0x9eb   : > { %11755 = vst [vmem:[#allocation45_spill] sm:$0xff] %v10745_v0  ;;  %v10747_v55 = vpop.f32.mrb[133].mxu0 }
 0x9ec   : > { %11756 = vst [vmem:[#allocation49_spill] sm:$0xff] %v10747_v55  ;;  %v10749_v41 = vpop.f32.mrb[134].mxu0 }
 0x9ed   : > { %11757 = vst [vmem:[#allocation50_spill] sm:$0xff] %v10749_v41  ;;  %v10753_v62 = vpop.f32.mrb[135].mxu0 }
 0x9ee   : > { %11758 = vst [vmem:[#allocation48_spill] sm:$0xff] %v10753_v62 }
 0x9f2   : > { %v7154_v56 = vpop.f32.mrb[136].mxu0 }
 0x9f3   : > { %v10769_v50 = vadd.f32 %v7154_v56, %v4982_v28  ;;  %v4722_v26 = vpop.f32.mrb[137].mxu0 }
 0x9f4   : > { %v7155_v8 = vpop.f32.mrb[138].mxu0  ;;  %v10775_v55 = vadd.f32 %v4980_v18, %v4722_v26  ;;  %v4986_v26 = vadd.f32 %v7986_v60, %v10684_v2 }
 0x9f5   : > { %v10777_v44 = vadd.f32 %v7155_v8, %v4983_v58  ;;  %v4725_v62 = vpop.f32.mrb[139].mxu0  ;;  %v5066_v0 = vsel %vm1158_vm2, %v10769_v50, -inf }
 0x9f6   : > { %5067 = vmax.xlane.f32.xlu0 %v5066_v0  ;;  %v7170_v57 = vpop.f32.mrb[96].mxu1  ;;  %v10781_v56 = vadd.f32 %v4981_v1, %v4725_v62  ;;  %v5060_v18 = vsel %vm1158_vm2, %v10775_v55, -inf  ;;  %v7987_v1 = vld [vmem:[%s11516_s6 + $0x60] sm:$0xff]  ;;  %v7988_v62 = vld [vmem:[%s11516_s6 + $0x78] sm:$0xff] }
 0x9f7   : > { %v4827_v28 = vpop.f32.mrb[97].mxu1  ;;  %v5069_v41 = vsel %vm1158_vm2, %v10777_v44, -inf  ;;  %v4984_v0 = vadd.f32 %v7987_v1, %v10697_v46  ;;  %v4987_v43 = vadd.f32 %v7988_v62, %v10702_v12  ;;  %v4985_v1 = vadd.f32 %v7989_v54, %v10713_v9  ;;  %v7990_v62 = vld [vmem:[%s11516_s6 + $0x90] sm:$0xff] }
 0x9f8   : > { %5070 = vmax.xlane.f32.xlu1 %v5069_v41  ;;  %v7171_v8 = vpop.f32.mrb[98].mxu1  ;;  %v5063_v7 = vsel %vm1158_vm2, %v10781_v56, -inf }
 0x9f9   : > { %v4830_v58 = vpop.f32.mrb[99].mxu1 }
 0x9fa   : > { %5061 = vmax.xlane.f32.xlu0 %v5060_v18  ;;  %v7158_v60 = vpop.f32.mrb[140].mxu0  ;;  %v4990_v18 = vadd.f32 %v7990_v62, %v10644_v35 }
 0x9fb   : > { %v10799_v41 = vadd.f32 %v7158_v60, %v4986_v26  ;;  %v4738_v29 = vpop.f32.mrb[141].mxu0 }
 0x9fc   : > { %5064 = vmax.xlane.f32.xlu1 %v5063_v7  ;;  %v7159_v15 = vpop.f32.mrb[142].mxu0  ;;  %v10811_v26 = vadd.f32 %v4984_v0, %v4738_v29  ;;  %v7991_v7 = vld [vmem:[%s11516_s6 + $0x98] sm:$0xff] }
 0x9fd   : > { %v10813_v60 = vadd.f32 %v7159_v15, %v4987_v43  ;;  %v4741_v34 = vpop.f32.mrb[143].mxu0  ;;  %v5078_v27 = vsel %vm1158_vm2, %v10799_v41, -inf  ;;  %v4991_v54 = vadd.f32 %v7991_v7, %v10658_v61  ;;  %v10825_v43 = vadd.f32 %v7170_v57, %v4990_v18 }
 0x9fe   : > { %5079 = vmax.xlane.f32.xlu0 %v5078_v27  ;;  %v7174_v49 = vpop.f32.mrb[100].mxu1  ;;  %v10821_v21 = vadd.f32 %v4985_v1, %v4741_v34  ;;  %v7992_v27 = vld [vmem:[%s11516_s6 + $0x80] sm:$0xff]  ;;  %v5072_v7 = vsel %vm1158_vm2, %v10811_v26, -inf  ;;  %v7993_v1 = vld [vmem:[%s11516_s6 + $0x88] sm:$0xff] }
 0x9ff   : > { %v4843_v14 = vpop.f32.mrb[101].mxu1  ;;  %v5081_v29 = vsel %vm1158_vm2, %v10813_v60, -inf  ;;  %v4988_v0 = vadd.f32 %v7992_v27, %v10649_v17  ;;  %v10833_v34 = vadd.f32 %v7171_v8, %v4991_v54  ;;  %v4989_v57 = vadd.f32 %v7993_v1, %v10663_v23  ;;  %v7994_v27 = vld [vmem:[%s11516_s6 + $0xb0] sm:$0xff]  ;;  %v7995_v1 = vld [vmem:[%s11516_s6 + $0xb8] sm:$0xff] }
 0xa00   : > { %5082 = vmax.xlane.f32.xlu1 %v5081_v29  ;;  %v7175_v15 = vpop.f32.mrb[102].mxu1  ;;  %v5075_v18 = vsel %vm1158_vm2, %v10821_v21, -inf  ;;  %v5090_v8 = vsel %vm1158_vm2, %v10825_v43, -inf }
 0xa01   : > { %v4846_v62 = vpop.f32.mrb[103].mxu1  ;;  %v10841_v29 = vadd.f32 %v4988_v0, %v4827_v28  ;;  %v10849_v54 = vadd.f32 %v4989_v57, %v4830_v58  ;;  %v5093_v28 = vsel %vm1158_vm2, %v10833_v34, -inf }
 0xa02   : > { %5073 = vmax.xlane.f32.xlu0 %v5072_v7  ;;  %v4994_v7 = vadd.f32 %v7994_v27, %v10684_v2  ;;  %v7996_v27 = vld [vmem:[%s11516_s6 + $0xa0] sm:$0xff] }
 0xa03   : > { %v5084_v58 = vsel %vm1158_vm2, %v10841_v29, -inf }
 0xa04   : > { %5076 = vmax.xlane.f32.xlu1 %v5075_v18  ;;  %v4995_v18 = vadd.f32 %v7995_v1, %v10702_v12  ;;  %v10857_v0 = vadd.f32 %v7174_v49, %v4994_v7  ;;  %v7997_v1 = vld [vmem:[%s11516_s6 + $0xa8] sm:$0xff]  ;;  %v5087_v49 = vsel %vm1158_vm2, %v10849_v54, -inf }
 0xa06   : > { %5091 = vmax.xlane.f32.xlu0 %v5090_v8  ;;  %v4992_v8 = vadd.f32 %v7996_v27, %v10697_v46  ;;  %v10865_v57 = vadd.f32 %v7175_v15, %v4995_v18  ;;  %v5102_v27 = vsel %vm1158_vm2, %v10857_v0, -inf  ;;  %v7998_v18 = vld [vmem:[%s11516_s6 + $0xd0] sm:$0xff] }
 0xa08   : > { %5094 = vmax.xlane.f32.xlu1 %v5093_v28  ;;  %v4993_v28 = vadd.f32 %v7997_v1, %v10713_v9  ;;  %v10873_v7 = vadd.f32 %v4992_v8, %v4843_v14  ;;  %v5105_v15 = vsel %vm1158_vm2, %v10865_v57, -inf  ;;  %v7999_v8 = vld [vmem:[%s11516_s6 + $0xc0] sm:$0xff]  ;;  %v8000_v1 = vld [vmem:[%s11516_s6 + $0xd8] sm:$0xff] }
 0xa0a   : > { %5085 = vmax.xlane.f32.xlu0 %v5084_v58  ;;  %v10877_v59 = vadd.f32 %v4993_v28, %v4846_v62  ;;  %v4998_v58 = vadd.f32 %v7998_v18, %v10644_v35  ;;  %v5096_v14 = vsel %vm1158_vm2, %v10873_v7, -inf  ;;  %v4996_v62 = vadd.f32 %v7999_v8, %v10649_v17  ;;  %v8001_v18 = vld [vmem:[%s11516_s6 + $0xc8] sm:$0xff] }
 0xa0b   : > { %v4999_v28 = vadd.f32 %v8000_v1, %v10658_v61  ;;  %v4997_v17 = vadd.f32 %v8001_v18, %v10663_v23  ;;  %v8002_v23 = vld [vmem:[%s11516_s6 + $0xf0] sm:$0xff] }
 0xa0c   : > { %5088 = vmax.xlane.f32.xlu1 %v5087_v49 }
 0xa0e   : > { %5103 = vmax.xlane.f32.xlu0 %v5102_v27 }
 0xa10   : > { %5106 = vmax.xlane.f32.xlu1 %v5105_v15  ;;  %v5099_v15 = vsel %vm1158_vm2, %v10877_v59, -inf }
 0xa12   : > { %v7186_v49 = vpop.f32.mrb[144].mxu0  ;;  %5097 = vmax.xlane.f32.xlu0 %v5096_v14 }
 0xa13   : > { %v10895_v27 = vadd.f32 %v7186_v49, %v4998_v58  ;;  %v4932_v35 = vpop.f32.mrb[145].mxu0  ;;  %v5002_v49 = vadd.f32 %v8002_v23, %v10684_v2 }
 0xa14   : > { %v7187_v8 = vpop.f32.mrb[146].mxu0  ;;  %5100 = vmax.xlane.f32.xlu1 %v5099_v15  ;;  %v10903_v52 = vadd.f32 %v4996_v62, %v4932_v35  ;;  %v8004_v15 = vld [vmem:[%s11516_s6 + $0xf8] sm:$0xff] }
 0xa15   : > { %v10905_v20 = vadd.f32 %v7187_v8, %v4999_v28  ;;  %v4935_v61 = vpop.f32.mrb[147].mxu0  ;;  %v5114_v58 = vsel %vm1158_vm2, %v10895_v27, -inf  ;;  %v8003_v28 = vld [vmem:[%s11516_s6 + $0xe0] sm:$0xff]  ;;  %v5003_v18 = vadd.f32 %v8004_v15, %v10702_v12 }
 0xa16   : > { %5115 = vmax.xlane.f32.xlu0 %v5114_v58  ;;  %v10909_v14 = vadd.f32 %v4997_v17, %v4935_v61  ;;  %v5108_v62 = vsel %vm1158_vm2, %v10903_v52, -inf  ;;  %v5000_v35 = vadd.f32 %v8003_v28, %v10697_v46  ;;  %v8005_v58 = vld [vmem:[%s11516_s6 + $0xe8] sm:$0xff] }
 0xa17   : > { %v5117_v1 = vsel %vm1158_vm2, %v10905_v20, -inf  ;;  %v5001_v46 = vadd.f32 %v8005_v58, %v10713_v9 }
 0xa18   : > { %5118 = vmax.xlane.f32.xlu1 %v5117_v1  ;;  %v5111_v61 = vsel %vm1158_vm2, %v10909_v14, -inf }
 0xa1a   : > { %v7190_v17 = vpop.f32.mrb[148].mxu0  ;;  %5109 = vmax.xlane.f32.xlu0 %v5108_v62 }
 0xa1b   : > { %v10927_v8 = vadd.f32 %v7190_v17, %v5002_v49  ;;  %v4948_v2 = vpop.f32.mrb[149].mxu0  ;;  %v10955_v17 = vpop.permute.xlu0 %5586 }
 0xa1c   : > { %v7191_v1 = vpop.f32.mrb[150].mxu0  ;;  %5112 = vmax.xlane.f32.xlu1 %v5111_v61  ;;  %v10935_v23 = vadd.f32 %v5000_v35, %v4948_v2  ;;  %11760 = vst [vmem:[#allocation53_spill] sm:$0xff] %v10955_v17 }
 0xa1d   : > { %v10937_v28 = vadd.f32 %v7191_v1, %v5003_v18  ;;  %v4951_v12 = vpop.f32.mrb[151].mxu0  ;;  %v5126_v49 = vsel %vm1158_vm2, %v10927_v8, -inf  ;;  %v10953_v18 = vpop.permute.xlu1 %5584 }
 0xa1e   : > { %5127 = vmax.xlane.f32.xlu0 %v5126_v49  ;;  %v10941_v62 = vadd.f32 %v5001_v46, %v4951_v12  ;;  %v5120_v9 = vsel %vm1158_vm2, %v10935_v23, -inf  ;;  %11759 = vst [vmem:[#allocation51_spill] sm:$0xff] %v10953_v18 }
 0xa1f   : > { %v5129_v15 = vsel %vm1158_vm2, %v10937_v28, -inf }
 0xa20   : > { %5130 = vmax.xlane.f32.xlu1 %v5129_v15  ;;  %v5123_v35 = vsel %vm1158_vm2, %v10941_v62, -inf }
 0xa21   : > { %v10957_v2 = vpop.permute.xlu1 %5588 }
 0xa22   : > { %5121 = vmax.xlane.f32.xlu0 %v5120_v9  ;;  %11761 = vst [vmem:[#allocation54_spill] sm:$0xff] %v10957_v2 }
 0xa24   : > { %5124 = vmax.xlane.f32.xlu1 %v5123_v35 }
 0xa35   : > { %5673 = vrot.lane.b32.xlu1 %v8207_v24, %s8024_s11 }
 0xa38   : > { %5671 = vrot.lane.b32.xlu0 %v8209_v25, %s8024_s11 }
 0xa54   : > { %v5044_v61 = vpop.xlane.xlu0 %5043 }
 0xa55   : > { %v5134_v58 = vsub.f32 %v10677_v40, %v5044_v61  ;;  %v5038_v46 = vpop.xlane.xlu1 %5037 }
 0xa56   : > { %v5132_v1 = vsub.f32 %v10679_v3, %v5038_v46 }
 0xa57   : > { %v5168_v12 = vmul.f32 1.442695, %v5134_v58 }
 0xa58   : > { %v5164_v49 = vmul.f32 1.442695, %v5132_v1  ;;  %v5041_v15 = vpop.xlane.xlu0 %5040 }
 0xa59   : > { %7782 = vpow2.f32 %v5168_v12  ;;  %v5133_v24 = vsub.f32 %v10690_v31, %v5041_v15  ;;  %v5047_v9 = vpop.xlane.xlu1 %5046 }
 0xa5a   : > { %v5135_v25 = vsub.f32 %v10688_v11, %v5047_v9  ;;  %7784 = vpow2.f32 %v5164_v49 }
 0xa5b   : > { %v5166_v35 = vmul.f32 1.442695, %v5133_v24 }
 0xa5c   : > { %v5170_v17 = vmul.f32 1.442695, %v5135_v25  ;;  %v5056_v18 = vpop.xlane.xlu0 %5055 }
 0xa5d   : > { %v5138_v2 = vsub.f32 %v10725_v47, %v5056_v18 }
 0xa5e   : > { %7786 = vpow2.f32 %v5170_v17  ;;  %v5059_v40 = vpop.xlane.xlu1 %5058 }
 0xa5f   : > { %v5176_v61 = vmul.f32 1.442695, %v5138_v2  ;;  %v5139_v3 = vsub.f32 %v10733_v53, %v5059_v40  ;;  %7788 = vpow2.f32 %v5166_v35 }
 0xa60   : > { %v5050_v58 = vpop.xlane.xlu0 %5049 }
 0xa61   : > { %7790 = vpow2.f32 %v5176_v61  ;;  %v5178_v46 = vmul.f32 1.442695, %v5139_v3  ;;  %v5136_v31 = vsub.f32 %v10731_v30, %v5050_v58 }
 0xa62   : > { %v5053_v1 = vpop.xlane.xlu1 %5052 }
 0xa63   : > { %v10966_v12 = vpop.eup %7782  ;;  %v5172_v11 = vmul.f32 1.442695, %v5136_v31  ;;  %v5137_v49 = vsub.f32 %v10737_v33, %v5053_v1  ;;  %7792 = vpow2.f32 %v5178_v46 }
 0xa64   : > { %v5234_v47 = vsel %vm1158_vm2, %v10966_v12, 0.0  ;;  %v10971_v18 = vpop.eup %7784 }
 0xa65   : > { %7794 = vpow2.f32 %v5172_v11  ;;  %v5174_v53 = vmul.f32 1.442695, %v5137_v49  ;;  %5235 = vadd.xlane.f32.xlu0 %v5234_v47  ;;  %v5228_v30 = vsel %vm1158_vm2, %v10971_v18, 0.0 }
 0xa67   : > { %7796 = vpow2.f32 %v5174_v53 }
 0xa68   : > { %v10973_v17 = vpop.eup %7786 }
 0xa69   : > { %5229 = vadd.xlane.f32.xlu0 %v5228_v30  ;;  %v5237_v2 = vsel %vm1158_vm2, %v10973_v17, 0.0  ;;  %v10979_v33 = vpop.eup %7788 }
 0xa6a   : > { %5238 = vadd.xlane.f32.xlu1 %v5237_v2  ;;  %v5231_v9 = vsel %vm1158_vm2, %v10979_v33, 0.0 }
 0xa6b   : > { %v10981_v15 = vpop.eup %7790 }
 0xa6c   : > { %v5246_v24 = vsel %vm1158_vm2, %v10981_v15, 0.0 }
 0xa6d   : > { %5247 = vadd.xlane.f32.xlu0 %v5246_v24  ;;  %v10987_v25 = vpop.eup %7792 }
 0xa6e   : > { %5232 = vadd.xlane.f32.xlu1 %v5231_v9  ;;  %v5249_v61 = vsel %vm1158_vm2, %v10987_v25, 0.0 }
 0xa6f   : > { %v10989_v35 = vpop.eup %7794 }
 0xa70   : > { %v5240_v40 = vsel %vm1158_vm2, %v10989_v35, 0.0 }
 0xa71   : > { %5241 = vadd.xlane.f32.xlu0 %v5240_v40  ;;  %v10995_v3 = vpop.eup %7796 }
 0xa72   : > { %5250 = vadd.xlane.f32.xlu1 %v5249_v61  ;;  %v5243_v58 = vsel %vm1158_vm2, %v10995_v3, 0.0 }
 0xa76   : > { %5244 = vadd.xlane.f32.xlu1 %v5243_v58 }
 0xa83   : > { %v5068_v46 = vpop.xlane.xlu0 %5067 }
 0xa84   : > { %v5142_v31 = vsub.f32 %v10769_v50, %v5068_v46 }
 0xa85   : > { %v5071_v1 = vpop.xlane.xlu1 %5070 }
 0xa86   : > { %v5184_v11 = vmul.f32 1.442695, %v5142_v31  ;;  %v5143_v49 = vsub.f32 %v10777_v44, %v5071_v1 }
 0xa87   : > { %v5062_v47 = vpop.xlane.xlu0 %5061 }
 0xa88   : > { %7798 = vpow2.f32 %v5184_v11  ;;  %v5140_v53 = vsub.f32 %v10775_v55, %v5062_v47  ;;  %v5186_v2 = vmul.f32 1.442695, %v5143_v49 }
 0xa89   : > { %v5065_v30 = vpop.xlane.xlu1 %5064 }
 0xa8a   : > { %v5180_v24 = vmul.f32 1.442695, %v5140_v53  ;;  %v5141_v9 = vsub.f32 %v10781_v56, %v5065_v30 }
 0xa8b   : > { %v5080_v40 = vpop.xlane.xlu0 %5079 }
 0xa8c   : > { %7800 = vpow2.f32 %v5180_v24  ;;  %v5146_v61 = vsub.f32 %v10799_v41, %v5080_v40  ;;  %v5182_v50 = vmul.f32 1.442695, %v5141_v9 }
 0xa8d   : > { %v5083_v58 = vpop.xlane.xlu1 %5082  ;;  %7802 = vpow2.f32 %v5186_v2 }
 0xa8e   : > { %v5192_v46 = vmul.f32 1.442695, %v5146_v61  ;;  %v5147_v31 = vsub.f32 %v10813_v60, %v5083_v58 }
 0xa8f   : > { %v5074_v44 = vpop.xlane.xlu0 %5073 }
 0xa90   : > { %7804 = vpow2.f32 %v5192_v46  ;;  %v5144_v1 = vsub.f32 %v10811_v26, %v5074_v44  ;;  %v5194_v55 = vmul.f32 1.442695, %v5147_v31 }
 0xa91   : > { %v5077_v11 = vpop.xlane.xlu1 %5076  ;;  %7806 = vpow2.f32 %v5182_v50 }
 0xa92   : > { %v11006_v49 = vpop.eup %7798  ;;  %v5188_v56 = vmul.f32 1.442695, %v5144_v1  ;;  %v5145_v47 = vsub.f32 %v10821_v21, %v5077_v11 }
 0xa93   : > { %v5092_v53 = vpop.xlane.xlu0 %5091  ;;  %v5258_v41 = vsel %vm1158_vm2, %v11006_v49, 0.0 }
 0xa94   : > { %7808 = vpow2.f32 %v5188_v56  ;;  %v5190_v30 = vmul.f32 1.442695, %v5145_v47  ;;  %v5150_v60 = vsub.f32 %v10825_v43, %v5092_v53  ;;  %5259 = vadd.xlane.f32.xlu1 %v5258_v41 }
 0xa95   : > { %7810 = vpow2.f32 %v5194_v55  ;;  %v5095_v2 = vpop.xlane.xlu1 %5094 }
 0xa96   : > { %v11012_v26 = vpop.eup %7800  ;;  %7812 = vpow2.f32 %v5190_v30  ;;  %v5200_v24 = vmul.f32 1.442695, %v5150_v60  ;;  %v5151_v43 = vsub.f32 %v10833_v34, %v5095_v2 }
 0xa97   : > { %v5086_v9 = vpop.xlane.xlu0 %5085  ;;  %v5252_v40 = vsel %vm1158_vm2, %v11012_v26, 0.0  ;;  %v11016_v21 = vpop.eup %7802 }
 0xa98   : > { %v5148_v61 = vsub.f32 %v10841_v29, %v5086_v9  ;;  %5253 = vadd.xlane.f32.xlu1 %v5252_v40  ;;  %7814 = vpow2.f32 %v5200_v24  ;;  %v5261_v1 = vsel %vm1158_vm2, %v11016_v21, 0.0  ;;  %v5202_v53 = vmul.f32 1.442695, %v5151_v43 }
 0xa99   : > { %v5089_v58 = vpop.xlane.xlu1 %5088 }
 0xa9a   : > { %v11019_v50 = vpop.eup %7804  ;;  %v5196_v46 = vmul.f32 1.442695, %v5148_v61  ;;  %v5149_v31 = vsub.f32 %v10849_v54, %v5089_v58 }
 0xa9b   : > { %v5104_v44 = vpop.xlane.xlu0 %5103  ;;  %v5270_v55 = vsel %vm1158_vm2, %v11019_v50, 0.0  ;;  %v11027_v11 = vpop.eup %7806 }
 0xa9c   : > { %v5198_v29 = vmul.f32 1.442695, %v5149_v31  ;;  %v5154_v56 = vsub.f32 %v10857_v0, %v5104_v44  ;;  %5262 = vadd.xlane.f32.xlu1 %v5261_v1  ;;  %5271 = vadd.xlane.f32.xlu0 %v5270_v55  ;;  %7816 = vpow2.f32 %v5196_v46  ;;  %v5255_v2 = vsel %vm1158_vm2, %v11027_v11, 0.0 }
 0xa9d   : > { %v5107_v47 = vpop.xlane.xlu1 %5106 }
 0xa9e   : > { %v11030_v34 = vpop.eup %7808  ;;  %7818 = vpow2.f32 %v5198_v29  ;;  %v5208_v54 = vmul.f32 1.442695, %v5154_v56  ;;  %v5155_v41 = vsub.f32 %v10865_v57, %v5107_v47 }
 0xa9f   : > { %v11033_v30 = vpop.eup %7810  ;;  %v5098_v60 = vpop.xlane.xlu0 %5097  ;;  %v5264_v0 = vsel %vm1158_vm2, %v11030_v34, 0.0 }
 0xaa0   : > { %v11039_v24 = vpop.eup %7812  ;;  %7820 = vpow2.f32 %v5208_v54  ;;  %v5152_v9 = vsub.f32 %v10873_v7, %v5098_v60  ;;  %5256 = vadd.xlane.f32.xlu1 %v5255_v2  ;;  %5265 = vadd.xlane.f32.xlu0 %v5264_v0  ;;  %v5210_v61 = vmul.f32 1.442695, %v5155_v41  ;;  %v5273_v31 = vsel %vm1158_vm2, %v11033_v30, 0.0 }
 0xaa1   : > { %v5101_v40 = vpop.xlane.xlu1 %5100  ;;  %7822 = vpow2.f32 %v5202_v53  ;;  %v5267_v46 = vsel %vm1158_vm2, %v11039_v24, 0.0 }
 0xaa2   : > { %v5204_v57 = vmul.f32 1.442695, %v5152_v9  ;;  %v5153_v58 = vsub.f32 %v10877_v59, %v5101_v40  ;;  %v11047_v44 = vpop.eup %7814 }
 0xaa3   : > { %v5116_v43 = vpop.xlane.xlu0 %5115  ;;  %v5282_v53 = vsel %vm1158_vm2, %v11047_v44, 0.0 }
 0xaa4   : > { %7824 = vpow2.f32 %v5204_v57  ;;  %v5158_v7 = vsub.f32 %v10895_v27, %v5116_v43  ;;  %5268 = vadd.xlane.f32.xlu1 %v5267_v46  ;;  %5274 = vadd.xlane.f32.xlu0 %v5273_v31  ;;  %v5206_v55 = vmul.f32 1.442695, %v5153_v58 }
 0xaa5   : > { %v5119_v1 = vpop.xlane.xlu1 %5118  ;;  %7826 = vpow2.f32 %v5210_v61 }
 0xaa6   : > { %v5216_v29 = vmul.f32 1.442695, %v5158_v7  ;;  %v5159_v59 = vsub.f32 %v10905_v20, %v5119_v1  ;;  %v11051_v56 = vpop.eup %7816 }
 0xaa7   : > { %v5110_v47 = vpop.xlane.xlu0 %5109  ;;  %v5276_v61 = vsel %vm1158_vm2, %v11051_v56, 0.0 }
 0xaa8   : > { %v11055_v54 = vpop.eup %7818  ;;  %7828 = vpow2.f32 %v5216_v29  ;;  %v5156_v41 = vsub.f32 %v10903_v52, %v5110_v47  ;;  %5283 = vadd.xlane.f32.xlu0 %v5282_v53  ;;  %v5218_v20 = vmul.f32 1.442695, %v5159_v59 }
 0xaa9   : > { %v5113_v27 = vpop.xlane.xlu1 %5112  ;;  %v5279_v60 = vsel %vm1158_vm2, %v11055_v54, 0.0  ;;  %7830 = vpow2.f32 %v5206_v55 }
 0xaaa   : > { %v11060_v2 = vpop.eup %7820  ;;  %v5212_v0 = vmul.f32 1.442695, %v5156_v41  ;;  %v5157_v9 = vsub.f32 %v10909_v14, %v5113_v27  ;;  %5280 = vadd.xlane.f32.xlu1 %v5279_v60 }
 0xaab   : > { %v5128_v40 = vpop.xlane.xlu0 %5127  ;;  %v11065_v57 = vpop.eup %7822  ;;  %v5294_v43 = vsel %vm1158_vm2, %v11060_v2, 0.0 }
 0xaac   : > { %7832 = vpow2.f32 %v5212_v0  ;;  %v5162_v52 = vsub.f32 %v10927_v8, %v5128_v40  ;;  %5277 = vadd.xlane.f32.xlu0 %v5276_v61  ;;  %v5214_v31 = vmul.f32 1.442695, %v5157_v9  ;;  %v5285_v55 = vsel %vm1158_vm2, %v11065_v57, 0.0 }
 0xaad   : > { %v5131_v58 = vpop.xlane.xlu1 %5130  ;;  %7834 = vpow2.f32 %v5218_v20 }
 0xaae   : > { %v11070_v46 = vpop.eup %7824  ;;  %v5224_v14 = vmul.f32 1.442695, %v5162_v52  ;;  %v5163_v7 = vsub.f32 %v10937_v28, %v5131_v58  ;;  %5295 = vadd.xlane.f32.xlu1 %v5294_v43 }
 0xaaf   : > { %v5122_v1 = vpop.xlane.xlu0 %5121  ;;  %v11075_v29 = vpop.eup %7826  ;;  %v5288_v47 = vsel %vm1158_vm2, %v11070_v46, 0.0 }
 0xab0   : > { %7836 = vpow2.f32 %v5224_v14  ;;  %v5160_v8 = vsub.f32 %v10935_v23, %v5122_v1  ;;  %5286 = vadd.xlane.f32.xlu0 %v5285_v55  ;;  %v5226_v41 = vmul.f32 1.442695, %v5163_v7  ;;  %v5297_v20 = vsel %vm1158_vm2, %v11075_v29, 0.0 }
 0xab1   : > { %v5125_v59 = vpop.xlane.xlu1 %5124  ;;  %7838 = vpow2.f32 %v5214_v31 }
 0xab2   : > { %v11080_v53 = vpop.eup %7828  ;;  %v5220_v28 = vmul.f32 1.442695, %v5160_v8  ;;  %v5161_v27 = vsub.f32 %v10941_v62, %v5125_v59  ;;  %5289 = vadd.xlane.f32.xlu1 %v5288_v47 }
 0xab3   : > { %v11083_v60 = vpop.permute.xlu0 %5671  ;;  %v11087_v0 = vpop.eup %7830  ;;  %v5306_v23 = vsel %vm1158_vm2, %v11080_v53, 0.0 }
 0xab4   : > { %7840 = vpow2.f32 %v5220_v28  ;;  %5298 = vadd.xlane.f32.xlu0 %v5297_v20  ;;  %7240 = vmatprep.subr.bf16.mxu0 %v11083_v60  ;;  %v5222_v40 = vmul.f32 1.442695, %v5161_v27  ;;  %v5291_v62 = vsel %vm1158_vm2, %v11087_v0, 0.0  ;;  %v11762_v28 = vld [vmem:[#allocation8_spill] sm:$0xff]  ;;  %v11763_v27 = vld [vmem:[#allocation6_spill] sm:$0xff] }
 0xab5   : > { %7842 = vpow2.f32 %v5226_v41  ;;  %v11764_v20 = vpack.c.bf16 %v11762_v28, %v11763_v27 }
 0xab6   : > { %v11092_v9 = vpop.eup %7832  ;;  %5307 = vadd.xlane.f32.xlu1 %v5306_v23  ;;  %7844 = vpow2.f32 %v5222_v40  ;;  %v11765_v23 = vpack.c.bf16 %v10565_v37, %v10559_v6  ;;  %v11766_v40 = vld [vmem:[#allocation11_spill] sm:$0xff]  ;;  %v11773_v6 = vpack.c.bf16 %v10561_v45, %v10557_v36  ;;  %v11775_v37 = vld [vmem:[#allocation20_spill] sm:$0xff]  ;;  %v11781_v36 = vpack.c.bf16 %v10573_v10, %v10569_v13  ;;  %v11782_v45 = vld [vmem:[#allocation22_spill] sm:$0xff] }
 0xab7   : > { %v11096_v61 = vpop.eup %7834  ;;  %v5300_v52 = vsel %vm1158_vm2, %v11092_v9, 0.0  ;;  %v11789_v10 = vpack.c.bf16 %v10585_v38, %v10581_v16  ;;  %v11796_v16 = vpack.c.bf16 %v10597_v4, %v10593_v32 }
 0xab8   : > { %5292 = vadd.xlane.f32.xlu0 %v5291_v62  ;;  %v5309_v43 = vsel %vm1158_vm2, %v11096_v61, 0.0  ;;  %v11767_v62 = vld [vmem:[#allocation10_spill] sm:$0xff] }
 0xaba   : > { %v11100_v58 = vpop.eup %7836  ;;  %5301 = vadd.xlane.f32.xlu1 %v5300_v52  ;;  %v11768_v52 = vpack.c.bf16 %v11766_v40, %v11767_v62  ;;  %v11786_v40 = vld [vmem:[#allocation13_spill] sm:$0xff] }
 0xabb   : > { %v11104_v31 = vpop.eup %7838  ;;  %v5318_v14 = vsel %vm1158_vm2, %v11100_v58, 0.0 }
 0xabc   : > { %5310 = vadd.xlane.f32.xlu0 %v5309_v43  ;;  %v5303_v1 = vsel %vm1158_vm2, %v11104_v31, 0.0  ;;  %v11770_v43 = vld [vmem:[#allocation19_spill] sm:$0xff] }
 0xabe   : > { %v11108_v7 = vpop.eup %7840  ;;  %5319 = vadd.xlane.f32.xlu1 %v5318_v14 }
 0xabf   : > { %v11112_v55 = vpop.eup %7842  ;;  %v5312_v8 = vsel %vm1158_vm2, %v11108_v7, 0.0 }
 0xac0   : > { %5304 = vadd.xlane.f32.xlu0 %v5303_v1  ;;  %v5321_v59 = vsel %vm1158_vm2, %v11112_v55, 0.0  ;;  %v11118_v47 = vpop.eup %7844  ;;  %v11772_v1 = vpack.c.bf16 %v10577_v19, %v10571_v5  ;;  %v11780_v5 = vpack.c.bf16 %v10589_v51, %v10583_v63  ;;  %v11783_v19 = vld [vmem:[#allocation16_spill] sm:$0xff]  ;;  %v11788_v63 = vpack.c.bf16 %v10601_v42, %v10595_v48 }
 0xac1   : > { %v5315_v41 = vsel %vm1158_vm2, %v11118_v47, 0.0  ;;  %v11784_v27 = vpack.c.bf16 %v11782_v45, %v11783_v19 }
 0xac2   : > { %5313 = vadd.xlane.f32.xlu1 %v5312_v8 }
 0xac4   : > { %5322 = vadd.xlane.f32.xlu0 %v5321_v59  ;;  %v11777_v59 = vld [vmem:[#allocation12_spill] sm:$0xff] }
 0xac8   : > { %5316 = vadd.xlane.f32.xlu0 %v5315_v41  ;;  %v11778_v41 = vld [vmem:[#allocation9_spill] sm:$0xff] }
 0xac9   : > { %v11779_v28 = vpack.c.bf16 %v11777_v59, %v11778_v41  ;;  %v11798_v59 = vld [vmem:[#allocation23_spill] sm:$0xff] }
 0xad3   : > { %5675 = vrot.lane.b32.xlu1 %v8221_v39, %s8024_s11  ;;  %v11769_v39 = vld [vmem:[#allocation7_spill] sm:$0xff] }
 0xad4   : > { %v11771_v14 = vpack.c.bf16 %v11769_v39, %v11770_v43  ;;  %v11790_v39 = vld [vmem:[#allocation26_spill] sm:$0xff]  ;;  %v11791_v43 = vld [vmem:[#allocation24_spill] sm:$0xff] }
 0xad7   : > { %3164 = vrot.lane.b32.xlu1 %v11764_v20, %s8025_s16 }
 0xadb   : > { %4478 = vrot.lane.b32.xlu1 %v11765_v23, %s8026_s17  ;;  %v11785_v23 = vld [vmem:[#allocation21_spill] sm:$0xff] }
 0xadc   : > { %v11787_v62 = vpack.c.bf16 %v11785_v23, %v11786_v40 }
 0xade   : > { %5677 = vrot.lane.b32.xlu0 %v11663_v22, %s8024_s11  ;;  %v11774_v22 = vld [vmem:[#allocation18_spill] sm:$0xff] }
 0xadf   : > { %3168 = vrot.lane.b32.xlu1 %v11768_v52, %s8025_s16  ;;  %v11776_v8 = vpack.c.bf16 %v11774_v22, %v11775_v37  ;;  %v11174_v52 = vpop.permute.xlu1 %5673  ;;  %v11794_v22 = vld [vmem:[#allocation14_spill] sm:$0xff] }
 0xae2   : > { %3166 = vrot.lane.b32.xlu0 %v11771_v14, %s8025_s16  ;;  %v11792_v14 = vpack.c.bf16 %v11790_v39, %v11791_v43  ;;  %v11801_v39 = vld [vmem:[#allocation51_spill] sm:$0xff] }
 0xae3   : > { %4482 = vrot.lane.b32.xlu1 %v11772_v1, %s8026_s17 }
 0xae6   : > { %4480 = vrot.lane.b32.xlu0 %v11773_v6, %s8026_s17  ;;  %v11793_v6 = vld [vmem:[#allocation15_spill] sm:$0xff] }
 0xae7   : > { %3172 = vrot.lane.b32.xlu1 %v11776_v8, %s8025_s16  ;;  %v11795_v48 = vpack.c.bf16 %v11793_v6, %v11794_v22  ;;  %v11797_v8 = vld [vmem:[#allocation25_spill] sm:$0xff]  ;;  %v11803_v6 = vld [vmem:[#allocation54_spill] sm:$0xff] }
 0xae8   : > { %v11799_v41 = vpack.c.bf16 %v11797_v8, %v11798_v59 }
 0xaea   : > { %3170 = vrot.lane.b32.xlu0 %v11779_v28, %s8025_s16 }
 0xaeb   : > { %4486 = vrot.lane.b32.xlu1 %v11780_v5, %s8026_s17 }
 0xaee   : > { %4484 = vrot.lane.b32.xlu0 %v11781_v36, %s8026_s17 }
 0xaef   : > { %3176 = vrot.lane.b32.xlu1 %v11784_v27, %s8025_s16 }
 0xaf2   : > { %v5236_v20 = vpop.xlane.xlu0 %5235  ;;  %3174 = vrot.lane.b32.xlu0 %v11787_v62, %s8025_s16 }
 0xaf3   : > { %4490 = vrot.lane.b32.xlu1 %v11788_v63, %s8026_s17 }
 0xaf6   : > { %v5230_v13 = vpop.xlane.xlu0 %5229  ;;  %4488 = vrot.lane.b32.xlu0 %v11789_v10, %s8026_s17  ;;  %v11800_v10 = vld [vmem:[#allocation3_spill] sm:$0xff] }
 0xaf7   : > { %v5239_v51 = vpop.xlane.xlu1 %5238  ;;  %3180 = vrot.lane.b32.xlu1 %v11792_v14, %s8025_s16  ;;  %v11802_v14 = vld [vmem:[#allocation53_spill] sm:$0xff] }
 0xaf8   : > { %7846 = vrcp.f32 %v5239_v51 }
 0xaf9   : > { %7848 = vrcp.f32 %v5230_v13 }
 0xafa   : > { %v5248_v1 = vpop.xlane.xlu0 %5247  ;;  %3178 = vrot.lane.b32.xlu0 %v11795_v48, %s8025_s16  ;;  %7850 = vrcp.f32 %v5236_v20 }
 0xafb   : > { %v5233_v42 = vpop.xlane.xlu1 %5232 }
 0xafc   : > { %7852 = vrcp.f32 %v5233_v42 }
 0xafe   : > { %4492 = vrot.lane.b32.xlu0 %v11796_v16, %s8026_s17  ;;  %v5242_v38 = vpop.xlane.xlu0 %5241 }
 0xaff   : > { %v5251_v37 = vpop.xlane.xlu1 %5250 }
 0xb00   : > { %7854 = vrcp.f32 %v5251_v37 }
 0xb01   : > { %7856 = vrcp.f32 %v5242_v38 }
 0xb02   : > { %3182 = vrot.lane.b32.xlu0 %v11799_v41, %s8025_s16  ;;  %v7847_v28 = vpop.eup %7846  ;;  %7858 = vrcp.f32 %v5248_v1 }
 0xb03   : > { %v5245_v5 = vpop.xlane.xlu1 %5244  ;;  %v7849_v36 = vpop.eup %7848  ;;  %v5359_v27 = vmul.f32 %v7847_v28, %v10973_v17 }
 0xb04   : > { %7860 = vrcp.f32 %v5245_v5  ;;  %v7851_v45 = vpop.eup %7850  ;;  %v5356_v32 = vmul.f32 %v7849_v36, %v10971_v18 }
 0xb05   : > { %v5358_v20 = vmul.f32 %v7851_v45, %v10966_v12 }
 0xb06   : > { %v7853_v19 = vpop.eup %7852 }
 0xb07   : > { %v5357_v4 = vmul.f32 %v7853_v19, %v10979_v33  ;;  %v5389_v40 = vpack.c.bf16 %v5359_v27, %v5358_v20 }
 0xb09   : > { %v5388_v23 = vpack.c.bf16 %v5357_v4, %v5356_v32 }
 0xb0a   : > { %v7855_v62 = vpop.eup %7854 }
 0xb0b   : > { %7200 = vmatprep.mubr.msk.bf16.mxu1 %vm1158_vm2, %v5388_v23  ;;  %v7857_v63 = vpop.eup %7856  ;;  %v5363_v18 = vmul.f32 %v7855_v62, %v10987_v25 }
 0xb0c   : > { %7201 = vmatmul.mubr.msk.bf16.vlgmr.msra.gmra.mrb[104].mxu1 %vm1158_vm2, %v5389_v40  ;;  %v7859_v13 = vpop.eup %7858  ;;  %v5360_v17 = vmul.f32 %v7857_v63, %v10989_v35 }
 0xb0d   : > { %7225 = vmatpush3.bf16.msra.mxu1 %v11800_v10  ;;  %v5362_v33 = vmul.f32 %v7859_v13, %v10981_v15 }
 0xb0e   : > { %v7861_v51 = vpop.eup %7860  ;;  %7226 = vmatprep.subr.bf16.mxu1 %v11801_v39 }
 0xb0f   : > { %v5361_v12 = vmul.f32 %v7861_v51, %v10995_v3  ;;  %v5391_v1 = vpack.c.bf16 %v5363_v18, %v5362_v33 }
 0xb11   : > { %7227 = vmatpush3.bf16.msra.mxu1 %v11801_v39  ;;  %v5390_v43 = vpack.c.bf16 %v5361_v12, %v5360_v17 }
 0xb12   : > { %7228 = vmatprep.subr.bf16.mxu1 %v11802_v14 }
 0xb13   : > { %7204 = vmatprep.mubr.msk.bf16.mxu1 %vm1158_vm2, %v5390_v43 }
 0xb14   : > { %7205 = vmatmul.mubr.msk.bf16.gmra.mrb[108].mxu1 %vm1158_vm2, %v5391_v1 }
 0xb15   : > { %7229 = vmatpush3.bf16.msra.mxu1 %v11802_v14 }
 0xb16   : > { %7230 = vmatprep.subr.bf16.mxu1 %v11803_v6 }
 0xb19   : > { %7231 = vmatpush3.bf16.msra.mxu1 %v11803_v6 }
 0xb21   : > { %v5260_v25 = vpop.xlane.xlu1 %5259 }
 0xb25   : > { %v5254_v35 = vpop.xlane.xlu1 %5253 }
 0xb29   : > { %v5263_v3 = vpop.xlane.xlu1 %5262  ;;  %v5272_v15 = vpop.xlane.xlu0 %5271 }
 0xb2a   : > { %7862 = vrcp.f32 %v5263_v3 }
 0xb2b   : > { %7864 = vrcp.f32 %v5254_v35 }
 0xb2c   : > { %7866 = vrcp.f32 %v5260_v25 }
 0xb2d   : > { %v5257_v22 = vpop.xlane.xlu1 %5256  ;;  %v5266_v48 = vpop.xlane.xlu0 %5265 }
 0xb2e   : > { %7868 = vrcp.f32 %v5257_v22 }
 0xb2f   : > { %7870 = vrcp.f32 %v5266_v48 }
 0xb31   : > { %v5269_v42 = vpop.xlane.xlu1 %5268  ;;  %v5275_v16 = vpop.xlane.xlu0 %5274 }
 0xb32   : > { %7872 = vrcp.f32 %v5269_v42 }
 0xb33   : > { %7874 = vrcp.f32 %v5275_v16 }
 0xb34   : > { %v7863_v38 = vpop.eup %7862  ;;  %7876 = vrcp.f32 %v5272_v15 }
 0xb35   : > { %v5284_v37 = vpop.xlane.xlu0 %5283  ;;  %v7865_v8 = vpop.eup %7864  ;;  %v5367_v5 = vmul.f32 %v7863_v38, %v11016_v21 }
 0xb36   : > { %v7867_v59 = vpop.eup %7866  ;;  %v5364_v45 = vmul.f32 %v7865_v8, %v11012_v26 }
 0xb37   : > { %v5281_v41 = vpop.xlane.xlu1 %5280  ;;  %v5366_v32 = vmul.f32 %v7867_v59, %v11006_v49 }
 0xb38   : > { %v7869_v28 = vpop.eup %7868  ;;  %7878 = vrcp.f32 %v5281_v41 }
 0xb39   : > { %v5278_v36 = vpop.xlane.xlu0 %5277  ;;  %v5365_v19 = vmul.f32 %v7869_v28, %v11027_v11  ;;  %v7871_v27 = vpop.eup %7870  ;;  %v5393_v40 = vpack.c.bf16 %v5367_v5, %v5366_v32 }
 0xb3a   : > { %7880 = vrcp.f32 %v5278_v36  ;;  %v5368_v21 = vmul.f32 %v7871_v27, %v11030_v34 }
 0xb3b   : > { %v5296_v4 = vpop.xlane.xlu1 %5295  ;;  %v5392_v20 = vpack.c.bf16 %v5365_v19, %v5364_v45  ;;  %7882 = vrcp.f32 %v5284_v37 }
 0xb3c   : > { %v7873_v23 = vpop.eup %7872 }
 0xb3d   : > { %v7875_v62 = vpop.eup %7874  ;;  %7216 = vmatprep.mubr.msk.bf16.mxu0 %vm1158_vm2, %v5392_v20  ;;  %v5287_v63 = vpop.xlane.xlu0 %5286  ;;  %v5369_v13 = vmul.f32 %v7873_v23, %v11039_v24 }
 0xb3e   : > { %7884 = vrcp.f32 %v5287_v63  ;;  %7217 = vmatmul.mubr.msk.bf16.vlgmr.msra.gmra.mrb[152].mxu0 %vm1158_vm2, %v5393_v40  ;;  %v7877_v26 = vpop.eup %7876  ;;  %v5371_v10 = vmul.f32 %v7875_v62, %v11033_v30 }
 0xb3f   : > { %7241 = vmatpush3.bf16.msra.mxu0 %v11083_v60  ;;  %v5290_v49 = vpop.xlane.xlu1 %5289  ;;  %v5394_v11 = vpack.c.bf16 %v5369_v13, %v5368_v21  ;;  %v5370_v34 = vmul.f32 %v7877_v26, %v11019_v50 }
 0xb40   : > { %7242 = vmatprep.subr.bf16.mxu0 %v11174_v52 }
 0xb41   : > { %7220 = vmatprep.mubr.msk.bf16.mxu0 %vm1158_vm2, %v5394_v11  ;;  %v5299_v51 = vpop.xlane.xlu0 %5298  ;;  %v5395_v17 = vpack.c.bf16 %v5371_v10, %v5370_v34 }
 0xb42   : > { %v7879_v39 = vpop.eup %7878  ;;  %7886 = vrcp.f32 %v5299_v51 }
 0xb43   : > { %7243 = vmatpush3.bf16.msra.mxu0 %v11174_v52  ;;  %v5308_v24 = vpop.xlane.xlu1 %5307  ;;  %7888 = vrcp.f32 %v5290_v49  ;;  %v5373_v33 = vmul.f32 %v7879_v39, %v11055_v54 }
 0xb44   : > { %v7881_v18 = vpop.eup %7880  ;;  %7890 = vrcp.f32 %v5296_v4 }
 0xb45   : > { %v5293_v60 = vpop.xlane.xlu0 %5292  ;;  %v5372_v12 = vmul.f32 %v7881_v18, %v11051_v56  ;;  %v7883_v30 = vpop.eup %7882 }
 0xb46   : > { %7892 = vrcp.f32 %v5293_v60  ;;  %7221 = vmatmul.mubr.msk.bf16.gmra.mrb[156].mxu0 %vm1158_vm2, %v5395_v17  ;;  %v5374_v1 = vmul.f32 %v7883_v30, %v11047_v44  ;;  %v7397_v30 = vld [vmem:[%s11513_s3 + $0x8] sm:$0xff]  }
 0xb47   : > { %v5302_v43 = vpop.xlane.xlu1 %5301  ;;  %v5396_v14 = vpack.c.bf16 %v5373_v33, %v5372_v12  ;;  %v7396_v33 = vld [vmem:[%s11513_s3] sm:$0xff]  }
 0xb48   : > { %v7885_v50 = vpop.eup %7884  ;;  %7256 = vmatprep.subr.bf16.mxu1 %v7396_v33 }
 0xb49   : > { %v5375_v52 = vmul.f32 %v7885_v50, %v11065_v57  ;;  %7232 = vmatprep.mubr.msk.bf16.mxu1 %vm1158_vm2, %v5396_v14  ;;  %v5311_v6 = vpop.xlane.xlu0 %5310 }
 0xb4a   : > { %7894 = vrcp.f32 %v5311_v6 }
 0xb4b   : > { %v5397_v25 = vpack.c.bf16 %v5375_v52, %v5374_v1  ;;  %v5320_v35 = vpop.xlane.xlu1 %5319  ;;  %7896 = vrcp.f32 %v5302_v43 }
 0xb4c   : > { %v7887_v56 = vpop.eup %7886  ;;  %7898 = vrcp.f32 %v5308_v24 }
 0xb4d   : > { %7233 = vmatmul.mubr.msk.bf16.vlgmr.msra.gmra.mrb[112].mxu1 %vm1158_vm2, %v5397_v25  ;;  %v5305_v54 = vpop.xlane.xlu0 %5304  ;;  %v7889_v3 = vpop.eup %7888  ;;  %v5379_v44 = vmul.f32 %v7887_v56, %v11075_v29  ;;  %v11805_v56 = vld [vmem:[#allocation4_spill] sm:$0xff] }
 0xb4e   : > { %7900 = vrcp.f32 %v5305_v54  ;;  %v7891_v15 = vpop.eup %7890  ;;  %v5376_v42 = vmul.f32 %v7889_v3, %v11070_v46  ;;  %7257 = vmatpush3.bf16.msra.mxu1 %v7396_v33 }
 0xb4f   : > { %v5314_v22 = vpop.xlane.xlu1 %5313  ;;  %v5378_v38 = vmul.f32 %v7891_v15, %v11060_v2  ;;  %7258 = vmatprep.subr.bf16.mxu1 %v7397_v30  ;;  %v11807_v15 = vld [vmem:[#allocation39_spill] sm:$0xff] }
 0xb50   : > { %v7893_v48 = vpop.eup %7892 }
 0xb51   : > { %v5323_v57 = vpop.xlane.xlu0 %5322  ;;  %v5377_v16 = vmul.f32 %v7893_v48, %v11087_v0  ;;  %v5399_v59 = vpack.c.bf16 %v5379_v44, %v5378_v38  ;;  %v11810_v38 = vld [vmem:[#allocation29_spill] sm:$0xff] }
 0xb52   : > { %7902 = vrcp.f32 %v5323_v57  ;;  %7259 = vmatpush3.bf16.msra.mxu1 %v7397_v30 }
 0xb53   : > { %v5676_v37 = vpop.permute.xlu1 %5675  ;;  %v5398_v8 = vpack.c.bf16 %v5377_v16, %v5376_v42  ;;  %7904 = vrcp.f32 %v5314_v22  ;;  %v11808_v22 = vld [vmem:[#allocation5_spill] sm:$0xff] }
 0xb54   : > { %7244 = vmatprep.subr.bf16.mxu0 %v5676_v37  ;;  %v7895_v41 = vpop.eup %7894  ;;  %7906 = vrcp.f32 %v5320_v35  ;;  %v11804_v35 = vld [vmem:[#allocation17_spill] sm:$0xff]  ;;  %v11809_v48 = vpack.c.bf16 %v11807_v15, %v11808_v22 }
 0xb55   : > { %7236 = vmatprep.mubr.msk.bf16.mxu1 %vm1158_vm2, %v5398_v8  ;;  %7245 = vmatpush3.bf16.msra.mxu0 %v5676_v37  ;;  %v5317_v28 = vpop.xlane.xlu0 %5316  ;;  %v7897_v29 = vpop.eup %7896  ;;  %v5383_v5 = vmul.f32 %v7895_v41, %v11096_v61  ;;  %v11806_v54 = vpack.c.bf16 %v11804_v35, %v11805_v56  ;;  %v11811_v37 = vld [vmem:[#allocation27_spill] sm:$0xff]  ;;  %v11814_v41 = vld [vmem:[#allocation28_spill] sm:$0xff]  ;;  %v11837_v35 = vld [vmem:[#allocation38_spill] sm:$0xff] }
 0xb56   : > { %7908 = vrcp.f32 %v5317_v28  ;;  %7237 = vmatmul.mubr.msk.bf16.gmra.mrb[116].mxu1 %vm1158_vm2, %v5399_v59  ;;  %v7899_v46 = vpop.eup %7898  ;;  %v5380_v45 = vmul.f32 %v7897_v29, %v11092_v9  ;;  %v11812_v8 = vpack.c.bf16 %v11810_v38, %v11811_v37  ;;  %v11813_v59 = vld [vmem:[#allocation30_spill] sm:$0xff]  ;;  %v11838_v56 = vld [vmem:[#allocation36_spill] sm:$0xff] }
 0xb57   : > { %v3165_v0 = vpop.permute.xlu1 %3164  ;;  %v5382_v27 = vmul.f32 %v7899_v46, %v11080_v53  ;;  %v11815_v28 = vpack.c.bf16 %v11813_v59, %v11814_v41  ;;  %v11843_v37 = vld [vmem:[#allocation48_spill] sm:$0xff] }
 0xb58   : > { %v7901_v2 = vpop.eup %7900  ;;  %3213 = vst.msk [vmem:[#allocation2] sm:$0xff] %vm3212_vm3, %v3165_v0 }
 0xb59   : > { %v5678_v36 = vpop.permute.xlu0 %5677  ;;  %v5381_v19 = vmul.f32 %v7901_v2, %v11104_v31  ;;  %v5401_v20 = vpack.c.bf16 %v5383_v5, %v5382_v27  ;;  %v11817_v27 = vld [vmem:[#allocation40_spill] sm:$0xff] }
 0xb5a   : > { %7246 = vmatprep.subr.bf16.mxu0 %v5678_v36 }
 0xb5b   : > { %v4479_v32 = vpop.permute.xlu1 %4478  ;;  %7247 = vmatpush3.bf16.msra.mxu0 %v5678_v36  ;;  %v5400_v4 = vpack.c.bf16 %v5381_v19, %v5380_v45  ;;  %v11816_v19 = vld [vmem:[#allocation43_spill] sm:$0xff] }
 0xb5c   : > { %4527 = vst.msk [vmem:[#allocation2] sm:$0xff] %vm4526_vm4, %v4479_v32  ;;  %v7903_v23 = vpop.eup %7902  ;;  %v11818_v32 = vpack.c.bf16 %v11816_v19, %v11817_v27 }
 0xb5d   : > { %7248 = vmatprep.mubr.msk.bf16.mxu0 %vm1158_vm2, %v5400_v4  ;;  %v3167_v61 = vpop.permute.xlu0 %3166  ;;  %v7905_v40 = vpop.eup %7904  ;;  %v5387_v53 = vmul.f32 %v7903_v23, %v11112_v55  ;;  %v11820_v23 = vld [vmem:[#allocation41_spill] sm:$0xff] }
 0xb5e   : > { %3214 = vst.msk [vmem:[#allocation2 + $0x8] sm:$0xff] %vm3212_vm3, %v3167_v61  ;;  %7249 = vmatmul.mubr.msk.bf16.vlgmr.msra.gmra.mrb[160].mxu0 %vm1158_vm2, %v5401_v20  ;;  %v7907_v9 = vpop.eup %7906  ;;  %v5384_v21 = vmul.f32 %v7905_v40, %v11108_v7  ;;  %v11819_v20 = vld [vmem:[#allocation42_spill] sm:$0xff] }
 0xb5f   : > { %v3169_v31 = vpop.permute.xlu1 %3168  ;;  %v5386_v26 = vmul.f32 %v7907_v9, %v11100_v58  ;;  %v11821_v61 = vpack.c.bf16 %v11819_v20, %v11820_v23 }
 0xb60   : > { %v7909_v62 = vpop.eup %7908  ;;  %3215 = vst.msk [vmem:[#allocation2 + $0x10] sm:$0xff] %vm3212_vm3, %v3169_v31 }
 0xb61   : > { %v4481_v63 = vpop.permute.xlu0 %4480  ;;  %v5385_v13 = vmul.f32 %v7909_v62, %v11118_v47  ;;  %v5403_v10 = vpack.c.bf16 %v5387_v53, %v5386_v26 }
 0xb62   : > { %4528 = vst.msk [vmem:[#allocation2 + $0x8] sm:$0xff] %vm4526_vm4, %v4481_v63 }
 0xb63   : > { %v4483_v49 = vpop.permute.xlu1 %4482  ;;  %v5402_v11 = vpack.c.bf16 %v5385_v13, %v5384_v21  ;;  %v11822_v21 = vld [vmem:[#allocation33_spill] sm:$0xff]  ;;  %v11823_v13 = vld [vmem:[#allocation31_spill] sm:$0xff] }
 0xb64   : > { %4529 = vst.msk [vmem:[#allocation2 + $0x10] sm:$0xff] %vm4526_vm4, %v4483_v49  ;;  %v11824_v26 = vpack.c.bf16 %v11822_v21, %v11823_v13 }
 0xb65   : > { %7252 = vmatprep.mubr.msk.bf16.mxu0 %vm1158_vm2, %v5402_v11  ;;  %v3171_v51 = vpop.permute.xlu0 %3170 }
 0xb66   : > { %3216 = vst.msk [vmem:[#allocation2 + $0x18] sm:$0xff] %vm3212_vm3, %v3171_v51  ;;  %7253 = vmatmul.mubr.msk.bf16.gmra.mrb[164].mxu0 %vm1158_vm2, %v5403_v10  ;;  %v11825_v10 = vld [vmem:[#allocation34_spill] sm:$0xff]  ;;  %v11826_v51 = vld [vmem:[#allocation32_spill] sm:$0xff] }
 0xb67   : > { %v3173_v55 = vpop.permute.xlu1 %3172 }
 0xb68   : > { %3217 = vst.msk [vmem:[#allocation2 + $0x20] sm:$0xff] %vm3212_vm3, %v3173_v55  ;;  %v11827_v55 = vpack.c.bf16 %v11825_v10, %v11826_v51 }
 0xb69   : > { %v4485_v7 = vpop.permute.xlu0 %4484 }
 0xb6a   : > { %4530 = vst.msk [vmem:[#allocation2 + $0x18] sm:$0xff] %vm4526_vm4, %v4485_v7 }
 0xb6b   : > { %v4487_v47 = vpop.permute.xlu1 %4486 }
 0xb6c   : > { %4531 = vst.msk [vmem:[#allocation2 + $0x20] sm:$0xff] %vm4526_vm4, %v4487_v47 }
 0xb6d   : > { %v3175_v58 = vpop.permute.xlu0 %3174 }
 0xb6e   : > { %3218 = vst.msk [vmem:[#allocation2 + $0x28] sm:$0xff] %vm3212_vm3, %v3175_v58 }
 0xb6f   : > { %v3177_v39 = vpop.permute.xlu1 %3176 }
 0xb70   : > { %3219 = vst.msk [vmem:[#allocation2 + $0x30] sm:$0xff] %vm3212_vm3, %v3177_v39  ;;  %v11828_v39 = vld [vmem:[#allocation44_spill] sm:$0xff] }
 0xb71   : > { %v4489_v34 = vpop.permute.xlu0 %4488 }
 0xb72   : > { %4532 = vst.msk [vmem:[#allocation2 + $0x28] sm:$0xff] %vm4526_vm4, %v4489_v34  ;;  %v11829_v34 = vld [vmem:[#allocation47_spill] sm:$0xff] }
 0xb73   : > { %v4491_v24 = vpop.permute.xlu1 %4490 }
 0xb74   : > { %4533 = vst.msk [vmem:[#allocation2 + $0x30] sm:$0xff] %vm4526_vm4, %v4491_v24  ;;  %v11830_v24 = vpack.c.bf16 %v11828_v39, %v11829_v34 }
 0xb75   : > { %v3179_v18 = vpop.permute.xlu0 %3178 }
 0xb76   : > { %3220 = vst.msk [vmem:[#allocation2 + $0x38] sm:$0xff] %vm3212_vm3, %v3179_v18 }
 0xb77   : > { %v3181_v17 = vpop.permute.xlu1 %3180 }
 0xb78   : > { %3221 = vst.msk [vmem:[#allocation2 + $0x40] sm:$0xff] %vm3212_vm3, %v3181_v17  ;;  %v11831_v17 = vld [vmem:[#allocation46_spill] sm:$0xff] }
 0xb79   : > { %v4493_v60 = vpop.permute.xlu0 %4492 }
 0xb7a   : > { %4534 = vst.msk [vmem:[#allocation2 + $0x38] sm:$0xff] %vm4526_vm4, %v4493_v60  ;;  %v11832_v60 = vld [vmem:[#allocation52_spill] sm:$0xff] }
 0xb7d   : > { %v3183_v12 = vpop.permute.xlu0 %3182 }
 0xb7e   : > { %3222 = vst.msk [vmem:[#allocation2 + $0x48] sm:$0xff] %vm3212_vm3, %v3183_v12  ;;  %v11833_v12 = vpack.c.bf16 %v11831_v17, %v11832_v60 }
 0xbdf   : > { %v7202_v43 = vpop.f32.mrb[104].mxu1 }
 0xbe0   : > { %v5462_v14 = vpop.f32.mrb[105].mxu1 }
 0xbe1   : > { %v7203_v50 = vpop.f32.mrb[106].mxu1 }
 0xbe2   : > { %v5761_v1 = vpack.c.bf16 %v7203_v50, %v7202_v43  ;;  %v5465_v52 = vpop.f32.mrb[107].mxu1 }
 0xbe3   : > { %v5760_v6 = vpack.c.bf16 %v5465_v52, %v5462_v14  ;;  %v11835_v52 = vld [vmem:[#allocation35_spill] sm:$0xff] }
 0xbe4   : > { %5794 = vrot.lane.b32.xlu0 %v5761_v1, %s8027_s15  ;;  %v11834_v1 = vld [vmem:[#allocation37_spill] sm:$0xff] }
 0xbe5   : > { %5792 = vrot.lane.b32.xlu1 %v5760_v6, %s8027_s15  ;;  %v11836_v6 = vpack.c.bf16 %v11834_v1, %v11835_v52 }
 0xbe7   : > { %v7206_v25 = vpop.f32.mrb[108].mxu1 }
 0xbe8   : > { %4496 = vrot.lane.b32.xlu0 %v11806_v54, %s8026_s17  ;;  %v5478_v3 = vpop.f32.mrb[109].mxu1  ;;  %v11839_v54 = vpack.c.bf16 %v11837_v35, %v11838_v56  ;;  %v11404_v56 = vld [vmem:[%s11514_s4] ss:$0 sm:$0xff] }
 0xbe9   : > { %4494 = vrot.lane.b32.xlu1 %v11809_v48, %s8026_s17  ;;  %v7207_v44 = vpop.f32.mrb[110].mxu1 }
 0xbea   : > { %v5763_v57 = vpack.c.bf16 %v7207_v44, %v7206_v25  ;;  %v5481_v42 = vpop.f32.mrb[111].mxu1 }
 0xbeb   : > { %v5762_v16 = vpack.c.bf16 %v5481_v42, %v5478_v3  ;;  %v11841_v42 = vld [vmem:[#allocation45_spill] sm:$0xff] }
 0xbec   : > { %5798 = vrot.lane.b32.xlu0 %v5763_v57, %s8027_s15  ;;  %v11840_v57 = vld [vmem:[#allocation50_spill] sm:$0xff] }
 0xbed   : > { %5796 = vrot.lane.b32.xlu1 %v5762_v16, %s8027_s15  ;;  %v11842_v16 = vpack.c.bf16 %v11840_v57, %v11841_v42 }
 0xbf0   : > { %3186 = vrot.lane.b32.xlu0 %v11812_v8, %s8025_s16  ;;  %v11844_v8 = vld [vmem:[#allocation49_spill] sm:$0xff] }
 0xbf1   : > { %3184 = vrot.lane.b32.xlu1 %v11815_v28, %s8025_s16  ;;  %v11845_v59 = vpack.c.bf16 %v11843_v37, %v11844_v8 }
 0xc11   : > { %v7218_v29 = vpop.f32.mrb[152].mxu0 }
 0xc12   : > { %v5551_v46 = vpop.f32.mrb[153].mxu0 }
 0xc13   : > { %v7219_v0 = vpop.f32.mrb[154].mxu0 }
 0xc14   : > { %v5765_v2 = vpack.c.bf16 %v7219_v0, %v7218_v29  ;;  %v5554_v5 = vpop.f32.mrb[155].mxu0 }
 0xc15   : > { %v5764_v36 = vpack.c.bf16 %v5554_v5, %v5551_v46 }
 0xc16   : > { %5802 = vrot.lane.b32.xlu0 %v5765_v2, %s8027_s15 }
 0xc17   : > { %5800 = vrot.lane.b32.xlu1 %v5764_v36, %s8027_s15 }
 0xc19   : > { %v7222_v45 = vpop.f32.mrb[156].mxu0 }
 0xc1a   : > { %4500 = vrot.lane.b32.xlu0 %v11818_v32, %s8026_s17  ;;  %v5567_v4 = vpop.f32.mrb[157].mxu0 }
 0xc1b   : > { %4498 = vrot.lane.b32.xlu1 %v11821_v61, %s8026_s17  ;;  %v7223_v40 = vpop.f32.mrb[158].mxu0 }
 0xc1c   : > { %v5767_v9 = vpack.c.bf16 %v7223_v40, %v7222_v45  ;;  %v5570_v31 = vpop.f32.mrb[159].mxu0 }
 0xc1d   : > { %v5766_v62 = vpack.c.bf16 %v5570_v31, %v5567_v4 }
 0xc1e   : > { %5806 = vrot.lane.b32.xlu0 %v5767_v9, %s8027_s15 }
 0xc1f   : > { %5804 = vrot.lane.b32.xlu1 %v5766_v62, %s8027_s15 }
 0xc20   : > { %v7234_v53 = vpop.f32.mrb[112].mxu1 }
 0xc21   : > { %v5640_v63 = vpop.f32.mrb[113].mxu1 }
 0xc22   : > { %3190 = vrot.lane.b32.xlu0 %v11824_v26, %s8025_s16  ;;  %v7235_v49 = vpop.f32.mrb[114].mxu1 }
 0xc23   : > { %v5769_v11 = vpack.c.bf16 %v7235_v49, %v7234_v53  ;;  %3188 = vrot.lane.b32.xlu1 %v11827_v55, %s8025_s16  ;;  %v5643_v7 = vpop.f32.mrb[115].mxu1 }
 0xc24   : > { %v5768_v47 = vpack.c.bf16 %v5643_v7, %v5640_v63 }
 0xc26   : > { %5810 = vrot.lane.b32.xlu0 %v5769_v11, %s8027_s15 }
 0xc27   : > { %5808 = vrot.lane.b32.xlu1 %v5768_v47, %s8027_s15 }
 0xc29   : > { %v7238_v58 = vpop.f32.mrb[116].mxu1 }
 0xc2a   : > { %4504 = vrot.lane.b32.xlu0 %v11830_v24, %s8026_s17  ;;  %v5656_v18 = vpop.f32.mrb[117].mxu1 }
 0xc2b   : > { %4502 = vrot.lane.b32.xlu1 %v11833_v12, %s8026_s17  ;;  %v7239_v33 = vpop.f32.mrb[118].mxu1 }
 0xc2c   : > { %v5771_v30 = vpack.c.bf16 %v7239_v33, %v7238_v58  ;;  %v5659_v43 = vpop.f32.mrb[119].mxu1 }
 0xc2d   : > { %v5770_v14 = vpack.c.bf16 %v5659_v43, %v5656_v18 }
 0xc2e   : > { %5814 = vrot.lane.b32.xlu0 %v5771_v30, %s8027_s15 }
 0xc2f   : > { %5812 = vrot.lane.b32.xlu1 %v5770_v14, %s8027_s15 }
 0xc31   : > { %v7250_v50 = vpop.f32.mrb[160].mxu0 }
 0xc32   : > { %3194 = vrot.lane.b32.xlu0 %v11836_v6, %s8025_s16  ;;  %v5729_v25 = vpop.f32.mrb[161].mxu0 }
 0xc33   : > { %3192 = vrot.lane.b32.xlu1 %v11839_v54, %s8025_s16  ;;  %v7251_v3 = vpop.f32.mrb[162].mxu0 }
 0xc34   : > { %v5773_v15 = vpack.c.bf16 %v7251_v3, %v7250_v50  ;;  %v5732_v22 = vpop.f32.mrb[163].mxu0 }
 0xc35   : > { %v5772_v48 = vpack.c.bf16 %v5732_v22, %v5729_v25 }
 0xc36   : > { %5818 = vrot.lane.b32.xlu0 %v5773_v15, %s8027_s15 }
 0xc37   : > { %5816 = vrot.lane.b32.xlu1 %v5772_v48, %s8027_s15 }
 0xc39   : > { %v7254_v44 = vpop.f32.mrb[164].mxu0 }
 0xc3a   : > { %4508 = vrot.lane.b32.xlu0 %v11842_v16, %s8026_s17  ;;  %v5745_v38 = vpop.f32.mrb[165].mxu0 }
 0xc3b   : > { %4506 = vrot.lane.b32.xlu1 %v11845_v59, %s8026_s17  ;;  %v7255_v41 = vpop.f32.mrb[166].mxu0 }
 0xc3c   : > { %v5775_v28 = vpack.c.bf16 %v7255_v41, %v7254_v44  ;;  %v5748_v29 = vpop.f32.mrb[167].mxu0 }
 0xc3d   : > { %v5774_v46 = vpack.c.bf16 %v5748_v29, %v5745_v38 }
 0xc3e   : > { %5822 = vrot.lane.b32.xlu0 %v5775_v28, %s8027_s15 }
 0xc3f   : > { %5820 = vrot.lane.b32.xlu1 %v5774_v46, %s8027_s15 }
 0xc56   : > { %v5795_v0 = vpop.permute.xlu0 %5794 }
 0xc57   : > { %5842 = vst.msk [vmem:[#allocation2 + $0x8] sm:$0xff] %vm5840_vm5, %v5795_v0  ;;  %v5793_v2 = vpop.permute.xlu1 %5792 }
 0xc58   : > { %5841 = vst.msk [vmem:[#allocation2] sm:$0xff] %vm5840_vm5, %v5793_v2 }
 0xc5a   : > { %v4497_v5 = vpop.permute.xlu0 %4496 }
 0xc5b   : > { %4536 = vst.msk [vmem:[#allocation2 + $0x48] sm:$0xff] %vm4526_vm4, %v4497_v5  ;;  %v4495_v36 = vpop.permute.xlu1 %4494 }
 0xc5c   : > { %4535 = vst.msk [vmem:[#allocation2 + $0x40] sm:$0xff] %vm4526_vm4, %v4495_v36 }
 0xc5e   : > { %v5799_v45 = vpop.permute.xlu0 %5798  ;;  %v5858_v32 = vld [vmem:[#allocation2 + $0x8] sm:$0xff] }
 0xc5f   : > { %5844 = vst.msk [vmem:[#allocation2 + $0x18] sm:$0xff] %vm5840_vm5, %v5799_v45  ;;  %v5797_v19 = vpop.permute.xlu1 %5796  ;;  %v5857_v27 = vld [vmem:[#allocation2] sm:$0xff] }
 0xc60   : > { %5843 = vst.msk [vmem:[#allocation2 + $0x10] sm:$0xff] %vm5840_vm5, %v5797_v19  ;;  %7260 = vmatprep.mubr.msk.bf16.mxu1 %vm423_vm0, %v5857_v27 }
 0xc61   : > { %7261 = vmatmul.mubr.msk.bf16.vlgmr.msra.gmra.mrb[120].mxu1 %vm423_vm0, %v5858_v32 }
 0xc62   : > { %v3187_v4 = vpop.permute.xlu0 %3186 }
 0xc63   : > { %3224 = vst.msk [vmem:[#allocation2 + $0x58] sm:$0xff] %vm3212_vm3, %v3187_v4  ;;  %v3185_v20 = vpop.permute.xlu1 %3184 }
 0xc64   : > { %3223 = vst.msk [vmem:[#allocation2 + $0x50] sm:$0xff] %vm3212_vm3, %v3185_v20 }
 0xc66   : > { %v5860_v61 = vld [vmem:[#allocation2 + $0x18] sm:$0xff] }
 0xc67   : > { %v5859_v23 = vld [vmem:[#allocation2 + $0x10] sm:$0xff] }
 0xc68   : > { %7264 = vmatprep.mubr.msk.bf16.mxu1 %vm423_vm0, %v5859_v23 }
 0xc69   : > { %7265 = vmatmul.mubr.msk.bf16.gmra.mrb[124].mxu1 %vm423_vm0, %v5860_v61 }
 0xc88   : > { %v5803_v40 = vpop.permute.xlu0 %5802 }
 0xc89   : > { %5846 = vst.msk [vmem:[#allocation2 + $0x28] sm:$0xff] %vm5840_vm5, %v5803_v40  ;;  %v5801_v9 = vpop.permute.xlu1 %5800 }
 0xc8a   : > { %5845 = vst.msk [vmem:[#allocation2 + $0x20] sm:$0xff] %vm5840_vm5, %v5801_v9 }
 0xc8c   : > { %v4501_v31 = vpop.permute.xlu0 %4500 }
 0xc8d   : > { %4538 = vst.msk [vmem:[#allocation2 + $0x58] sm:$0xff] %vm4526_vm4, %v4501_v31  ;;  %v4499_v62 = vpop.permute.xlu1 %4498 }
 0xc8e   : > { %4537 = vst.msk [vmem:[#allocation2 + $0x50] sm:$0xff] %vm4526_vm4, %v4499_v62 }
 0xc90   : > { %v5807_v53 = vpop.permute.xlu0 %5806  ;;  %v5862_v13 = vld [vmem:[#allocation2 + $0x28] sm:$0xff] }
 0xc91   : > { %5848 = vst.msk [vmem:[#allocation2 + $0x38] sm:$0xff] %vm5840_vm5, %v5807_v53  ;;  %v5805_v63 = vpop.permute.xlu1 %5804  ;;  %v5861_v21 = vld [vmem:[#allocation2 + $0x20] sm:$0xff] }
 0xc92   : > { %5847 = vst.msk [vmem:[#allocation2 + $0x30] sm:$0xff] %vm5840_vm5, %v5805_v63  ;;  %7268 = vmatprep.mubr.msk.bf16.mxu1 %vm423_vm0, %v5861_v21 }
 0xc93   : > { %7269 = vmatmul.mubr.msk.bf16.gmra.mrb[128].mxu1 %vm423_vm0, %v5862_v13 }
 0xc94   : > { %v3191_v26 = vpop.permute.xlu0 %3190 }
 0xc95   : > { %3226 = vst.msk [vmem:[#allocation2 + $0x68] sm:$0xff] %vm3212_vm3, %v3191_v26  ;;  %v3189_v49 = vpop.permute.xlu1 %3188 }
 0xc96   : > { %3225 = vst.msk [vmem:[#allocation2 + $0x60] sm:$0xff] %vm3212_vm3, %v3189_v49 }
 0xc98   : > { %v5811_v11 = vpop.permute.xlu0 %5810  ;;  %v5864_v55 = vld [vmem:[#allocation2 + $0x38] sm:$0xff] }
 0xc99   : > { %5850 = vst.msk [vmem:[#allocation2 + $0x48] sm:$0xff] %vm5840_vm5, %v5811_v11  ;;  %v5809_v10 = vpop.permute.xlu1 %5808  ;;  %v5863_v51 = vld [vmem:[#allocation2 + $0x30] sm:$0xff] }
 0xc9a   : > { %5849 = vst.msk [vmem:[#allocation2 + $0x40] sm:$0xff] %vm5840_vm5, %v5809_v10  ;;  %7272 = vmatprep.mubr.msk.bf16.mxu1 %vm423_vm0, %v5863_v51 }
 0xc9b   : > { %7273 = vmatmul.mubr.msk.bf16.gmra.mrb[132].mxu1 %vm423_vm0, %v5864_v55 }
 0xc9c   : > { %v4505_v7 = vpop.permute.xlu0 %4504 }
 0xc9d   : > { %4540 = vst.msk [vmem:[#allocation2 + $0x68] sm:$0xff] %vm4526_vm4, %v4505_v7  ;;  %v4503_v47 = vpop.permute.xlu1 %4502 }
 0xc9e   : > { %4539 = vst.msk [vmem:[#allocation2 + $0x60] sm:$0xff] %vm4526_vm4, %v4503_v47 }
 0xca0   : > { %v5815_v58 = vpop.permute.xlu0 %5814  ;;  %v5866_v24 = vld [vmem:[#allocation2 + $0x48] sm:$0xff] }
 0xca1   : > { %5852 = vst.msk [vmem:[#allocation2 + $0x58] sm:$0xff] %vm5840_vm5, %v5815_v58  ;;  %v5813_v39 = vpop.permute.xlu1 %5812  ;;  %v5865_v34 = vld [vmem:[#allocation2 + $0x40] sm:$0xff] }
 0xca2   : > { %5851 = vst.msk [vmem:[#allocation2 + $0x50] sm:$0xff] %vm5840_vm5, %v5813_v39  ;;  %7276 = vmatprep.mubr.msk.bf16.mxu1 %vm423_vm0, %v5865_v34 }
 0xca3   : > { %7277 = vmatmul.mubr.msk.bf16.gmra.mrb[136].mxu1 %vm423_vm0, %v5866_v24 }
 0xca4   : > { %v3195_v18 = vpop.permute.xlu0 %3194 }
 0xca5   : > { %3228 = vst.msk [vmem:[#allocation2 + $0x78] sm:$0xff] %vm3212_vm3, %v3195_v18  ;;  %v3193_v17 = vpop.permute.xlu1 %3192 }
 0xca6   : > { %3227 = vst.msk [vmem:[#allocation2 + $0x70] sm:$0xff] %vm3212_vm3, %v3193_v17 }
 0xca8   : > { %v5819_v60 = vpop.permute.xlu0 %5818  ;;  %v5868_v30 = vld [vmem:[#allocation2 + $0x58] sm:$0xff] }
 0xca9   : > { %5854 = vst.msk [vmem:[#allocation2 + $0x68] sm:$0xff] %vm5840_vm5, %v5819_v60  ;;  %v5817_v12 = vpop.permute.xlu1 %5816  ;;  %v5867_v33 = vld [vmem:[#allocation2 + $0x50] sm:$0xff] }
 0xcaa   : > { %5853 = vst.msk [vmem:[#allocation2 + $0x60] sm:$0xff] %vm5840_vm5, %v5817_v12  ;;  %7280 = vmatprep.mubr.msk.bf16.mxu1 %vm423_vm0, %v5867_v33 }
 0xcab   : > { %7281 = vmatmul.mubr.msk.bf16.gmra.mrb[140].mxu1 %vm423_vm0, %v5868_v30 }
 0xcac   : > { %v4509_v43 = vpop.permute.xlu0 %4508 }
 0xcad   : > { %4542 = vst.msk [vmem:[#allocation2 + $0x78] sm:$0xff] %vm4526_vm4, %v4509_v43  ;;  %v4507_v14 = vpop.permute.xlu1 %4506 }
 0xcae   : > { %4541 = vst.msk [vmem:[#allocation2 + $0x70] sm:$0xff] %vm4526_vm4, %v4507_v14 }
 0xcb0   : > { %v5823_v50 = vpop.permute.xlu0 %5822  ;;  %v5870_v6 = vld [vmem:[#allocation2 + $0x68] sm:$0xff] }
 0xcb1   : > { %5856 = vst.msk [vmem:[#allocation2 + $0x78] sm:$0xff] %vm5840_vm5, %v5823_v50  ;;  %v5821_v1 = vpop.permute.xlu1 %5820  ;;  %v5869_v52 = vld [vmem:[#allocation2 + $0x60] sm:$0xff] }
 0xcb2   : > { %5855 = vst.msk [vmem:[#allocation2 + $0x70] sm:$0xff] %vm5840_vm5, %v5821_v1  ;;  %7284 = vmatprep.mubr.msk.bf16.mxu1 %vm423_vm0, %v5869_v52 }
 0xcb3   : > { %7285 = vmatmul.mubr.msk.bf16.gmra.mrb[144].mxu1 %vm423_vm0, %v5870_v6 }
 0xcb8   : > { %v5872_v35 = vld [vmem:[#allocation2 + $0x78] sm:$0xff] }
 0xcb9   : > { %v5871_v25 = vld [vmem:[#allocation2 + $0x70] sm:$0xff] }
 0xcba   : > { %7288 = vmatprep.mubr.msk.bf16.mxu1 %vm423_vm0, %v5871_v25 }
 0xcbb   : > { %7289 = vmatmul.mubr.msk.bf16.gmra.mrb[148].mxu1 %vm423_vm0, %v5872_v35 }
 0xd34   : > { %v7262_v54 = vpop.f32.mrb[120].mxu1 }
 0xd35   : > { %v5987_v3 = vadd.f32 %v7262_v54, %v11404_v56  ;;  %v5978_v15 = vpop.f32.mrb[121].mxu1 }
 0xd36   : > { %v5979_v22 = vadd.f32 %v11404_v56, %v5978_v15  ;;  %v7263_v48 = vpop.f32.mrb[122].mxu1 }
 0xd37   : > { %6107 = vst.msk [vmem:[%s11409_s23 + $0x10] sm:$0xff] %vm423_vm0, %v5987_v3  ;;  %v5990_v44 = vadd.f32 %v7263_v48, %v11404_v56  ;;  %v5981_v57 = vpop.f32.mrb[123].mxu1 }
 0xd38   : > { %6105 = vst.msk [vmem:[%s11409_s23] sm:$0xff] %vm423_vm0, %v5979_v22  ;;  %v5982_v42 = vadd.f32 %v11404_v56, %v5981_v57 }
 0xd39   : > { %6108 = vst.msk [vmem:[%s11409_s23 + $0x18] sm:$0xff] %vm423_vm0, %v5990_v44 }
 0xd3a   : > { %6106 = vst.msk [vmem:[%s11409_s23 + $0x8] sm:$0xff] %vm423_vm0, %v5982_v42 }
 0xd3c   : > { %v7266_v16 = vpop.f32.mrb[124].mxu1 }
 0xd3d   : > { %v6003_v38 = vadd.f32 %v7266_v16, %v11404_v56  ;;  %v5994_v37 = vpop.f32.mrb[125].mxu1 }
 0xd3e   : > { %v5995_v8 = vadd.f32 %v11404_v56, %v5994_v37  ;;  %v7267_v59 = vpop.f32.mrb[126].mxu1 }
 0xd3f   : > { %6111 = vst.msk [vmem:[%s11409_s23 + $0x30] sm:$0xff] %vm423_vm0, %v6003_v38  ;;  %v6006_v41 = vadd.f32 %v7267_v59, %v11404_v56  ;;  %v5997_v28 = vpop.f32.mrb[127].mxu1 }
 0xd40   : > { %6109 = vst.msk [vmem:[%s11409_s23 + $0x20] sm:$0xff] %vm423_vm0, %v5995_v8  ;;  %v5998_v29 = vadd.f32 %v11404_v56, %v5997_v28 }
 0xd41   : > { %6112 = vst.msk [vmem:[%s11409_s23 + $0x38] sm:$0xff] %vm423_vm0, %v6006_v41 }
 0xd42   : > { %6110 = vst.msk [vmem:[%s11409_s23 + $0x28] sm:$0xff] %vm423_vm0, %v5998_v29 }
 0xd66   : > { %v7270_v46 = vpop.f32.mrb[128].mxu1 }
 0xd67   : > { %v6019_v0 = vadd.f32 %v7270_v46, %v11404_v56  ;;  %v6010_v2 = vpop.f32.mrb[129].mxu1 }
 0xd68   : > { %v6011_v5 = vadd.f32 %v11404_v56, %v6010_v2  ;;  %v7271_v36 = vpop.f32.mrb[130].mxu1 }
 0xd69   : > { %6115 = vst.msk [vmem:[%s11409_s23 + $0x50] sm:$0xff] %vm423_vm0, %v6019_v0  ;;  %v6022_v45 = vadd.f32 %v7271_v36, %v11404_v56  ;;  %v6013_v19 = vpop.f32.mrb[131].mxu1 }
 0xd6a   : > { %6113 = vst.msk [vmem:[%s11409_s23 + $0x40] sm:$0xff] %vm423_vm0, %v6011_v5  ;;  %v6014_v27 = vadd.f32 %v11404_v56, %v6013_v19 }
 0xd6b   : > { %6116 = vst.msk [vmem:[%s11409_s23 + $0x58] sm:$0xff] %vm423_vm0, %v6022_v45 }
 0xd6c   : > { %6114 = vst.msk [vmem:[%s11409_s23 + $0x48] sm:$0xff] %vm423_vm0, %v6014_v27 }
 0xd6e   : > { %v7274_v32 = vpop.f32.mrb[132].mxu1 }
 0xd6f   : > { %v6035_v4 = vadd.f32 %v7274_v32, %v11404_v56  ;;  %v6026_v20 = vpop.f32.mrb[133].mxu1 }
 0xd70   : > { %v6027_v23 = vadd.f32 %v11404_v56, %v6026_v20  ;;  %v7275_v61 = vpop.f32.mrb[134].mxu1 }
 0xd71   : > { %6119 = vst.msk [vmem:[%s11409_s23 + $0x70] sm:$0xff] %vm423_vm0, %v6035_v4  ;;  %v6038_v40 = vadd.f32 %v7275_v61, %v11404_v56  ;;  %v6029_v9 = vpop.f32.mrb[135].mxu1 }
 0xd72   : > { %6117 = vst.msk [vmem:[%s11409_s23 + $0x60] sm:$0xff] %vm423_vm0, %v6027_v23  ;;  %v6030_v31 = vadd.f32 %v11404_v56, %v6029_v9 }
 0xd73   : > { %6120 = vst.msk [vmem:[%s11409_s23 + $0x78] sm:$0xff] %vm423_vm0, %v6038_v40 }
 0xd74   : > { %6118 = vst.msk [vmem:[%s11409_s23 + $0x68] sm:$0xff] %vm423_vm0, %v6030_v31 }
 0xd76   : > { %v7278_v62 = vpop.f32.mrb[136].mxu1 }
 0xd77   : > { %v6051_v53 = vadd.f32 %v7278_v62, %v11404_v56  ;;  %v6042_v63 = vpop.f32.mrb[137].mxu1 }
 0xd78   : > { %v6043_v21 = vadd.f32 %v11404_v56, %v6042_v63  ;;  %v7279_v13 = vpop.f32.mrb[138].mxu1 }
 0xd79   : > { %6123 = vst.msk [vmem:[%s11409_s23 + $0x90] sm:$0xff] %vm423_vm0, %v6051_v53  ;;  %v6054_v26 = vadd.f32 %v7279_v13, %v11404_v56  ;;  %v6045_v49 = vpop.f32.mrb[139].mxu1 }
 0xd7a   : > { %6121 = vst.msk [vmem:[%s11409_s23 + $0x80] sm:$0xff] %vm423_vm0, %v6043_v21  ;;  %v6046_v11 = vadd.f32 %v11404_v56, %v6045_v49 }
 0xd7b   : > { %6124 = vst.msk [vmem:[%s11409_s23 + $0x98] sm:$0xff] %vm423_vm0, %v6054_v26 }
 0xd7c   : > { %6122 = vst.msk [vmem:[%s11409_s23 + $0x88] sm:$0xff] %vm423_vm0, %v6046_v11 }
 0xd7e   : > { %v7282_v10 = vpop.f32.mrb[140].mxu1 }
 0xd7f   : > { %v6067_v51 = vadd.f32 %v7282_v10, %v11404_v56  ;;  %v6058_v55 = vpop.f32.mrb[141].mxu1 }
 0xd80   : > { %v6059_v7 = vadd.f32 %v11404_v56, %v6058_v55  ;;  %v7283_v47 = vpop.f32.mrb[142].mxu1 }
 0xd81   : > { %6127 = vst.msk [vmem:[%s11409_s23 + $0xb0] sm:$0xff] %vm423_vm0, %v6067_v51  ;;  %v6070_v58 = vadd.f32 %v7283_v47, %v11404_v56  ;;  %v6061_v39 = vpop.f32.mrb[143].mxu1 }
 0xd82   : > { %6125 = vst.msk [vmem:[%s11409_s23 + $0xa0] sm:$0xff] %vm423_vm0, %v6059_v7  ;;  %v6062_v34 = vadd.f32 %v11404_v56, %v6061_v39 }
 0xd83   : > { %6128 = vst.msk [vmem:[%s11409_s23 + $0xb8] sm:$0xff] %vm423_vm0, %v6070_v58 }
 0xd84   : > { %6126 = vst.msk [vmem:[%s11409_s23 + $0xa8] sm:$0xff] %vm423_vm0, %v6062_v34 }
 0xd86   : > { %v7286_v24 = vpop.f32.mrb[144].mxu1 }
 0xd87   : > { %v6083_v18 = vadd.f32 %v7286_v24, %v11404_v56  ;;  %v6074_v17 = vpop.f32.mrb[145].mxu1 }
 0xd88   : > { %v6075_v60 = vadd.f32 %v11404_v56, %v6074_v17  ;;  %v7287_v12 = vpop.f32.mrb[146].mxu1 }
 0xd89   : > { %6131 = vst.msk [vmem:[%s11409_s23 + $0xd0] sm:$0xff] %vm423_vm0, %v6083_v18  ;;  %v6086_v33 = vadd.f32 %v7287_v12, %v11404_v56  ;;  %v6077_v30 = vpop.f32.mrb[147].mxu1 }
 0xd8a   : > { %6129 = vst.msk [vmem:[%s11409_s23 + $0xc0] sm:$0xff] %vm423_vm0, %v6075_v60  ;;  %v6078_v43 = vadd.f32 %v11404_v56, %v6077_v30 }
 0xd8b   : > { %6132 = vst.msk [vmem:[%s11409_s23 + $0xd8] sm:$0xff] %vm423_vm0, %v6086_v33 }
 0xd8c   : > { %6130 = vst.msk [vmem:[%s11409_s23 + $0xc8] sm:$0xff] %vm423_vm0, %v6078_v43 }
 0xd8e   : > { %v7290_v14 = vpop.f32.mrb[148].mxu1 }
 0xd8f   : > { %v6099_v50 = vadd.f32 %v7290_v14, %v11404_v56  ;;  %v6090_v1 = vpop.f32.mrb[149].mxu1 }
 0xd90   : > { %v6091_v52 = vadd.f32 %v11404_v56, %v6090_v1  ;;  %v7291_v6 = vpop.f32.mrb[150].mxu1 }
 0xd91   : > { %6135 = vst.msk [vmem:[%s11409_s23 + $0xf0] sm:$0xff] %vm423_vm0, %v6099_v50  ;;  %v6102_v25 = vadd.f32 %v7291_v6, %v11404_v56  ;;  %v6093_v35 = vpop.f32.mrb[151].mxu1 }
 0xd92   : > { %6133 = vst.msk [vmem:[%s11409_s23 + $0xe0] sm:$0xff] %vm423_vm0, %v6091_v52  ;;  %v6094_v54 = vadd.f32 %v11404_v56, %v6093_v35 }
 0xd93   : > { %6136 = vst.msk [vmem:[%s11409_s23 + $0xf8] sm:$0xff] %vm423_vm0, %v6102_v25 }
 0xd94   : > { %6134 = vst.msk [vmem:[%s11409_s23 + $0xe8] sm:$0xff] %vm423_vm0, %v6094_v54 }
 0xd95 PF: > { %s17_s24 = sadd.s32 1, %s8012_s24  }
 0xd96   : > { %p14_p4 = scmp.ge.s32.totalorder %s17_s24, 6  }
 0xd98   :  { %16 = sbr.rel (!%p14_p4) target bundleno = 1 (0x1), region = 81 }

</bundles_post_ra>
